<compile_context>
chip_gen: v6e
topology: v6e:2x2x1
jax: 0.10.0
libtpu: 0.0.40
codegen_flags: <defaults>
</compile_context>

<pallas_src>
import functools

import jax
import jax.numpy as jnp
from jax.experimental import pallas as pl
from jax.experimental.pallas import tpu as pltpu

# ----------------------------- model config (from the PyTorch module) ---------------------------
DROPOUT = 0.2            # inference: identity
KERNEL_SIZE = 3
FEATURE_SIZE = 6
NUM_CHANNELS = [128, 256, 256]
NUM_CLASSES = 3

DILATIONS = tuple(2 ** i for i in range(len(NUM_CHANNELS)))                 # (1, 2, 4)
PADDINGS = tuple((KERNEL_SIZE - 1) * d // 2 for d in DILATIONS)             # (1, 2, 4)
MAX_PAD = max(PADDINGS)
C_MAX = max(NUM_CHANNELS)
NC_PAD = 128             # lane-padded class dim so the head store is lane-dense


# ----------------------------------- fused Pallas kernel ----------------------------------------
def _tcn_fused_kernel(
    x_ref,                                                    # (BT, T, 6) f32
    w1a_ref, b1a_ref, w2a_ref, b2a_ref,                       # block 1:   6 -> 128, dil 1 (conv1 fused w/ downsample)
    w1b_ref, b1b_ref, w2b_ref, b2b_ref, wdb_ref, bdb_ref,     # block 2: 128 -> 256, dil 2
    w1c_ref, b1c_ref, w2c_ref, b2c_ref,                       # block 3: 256 -> 256, dil 4
    wout_ref, bout_ref,                                       # head (lane-padded to NC_PAD)
    o_ref,                                                    # (BT, NC_PAD) f32
    pad_ref,                                                  # VMEM scratch (BT, T + 2*MAX_PAD, C_MAX) bf16
    *, T, BT,
):
    K = KERNEL_SIZE
    M = BT * T
    relu = lambda v: jnp.maximum(v, 0.0)

    # Zero the halo rows once per grid step.  Staging only ever writes rows [MAX_PAD, MAX_PAD+T),
    # so the halo stays zero for every conv inside this step.
    zhalo = jnp.zeros((BT, MAX_PAD, C_MAX), jnp.bfloat16)
    pad_ref[:, 0:MAX_PAD, :] = zhalo
    pad_ref[:, MAX_PAD + T:, :] = zhalo

    def stage(h_bf, cin):
        # h_bf: (M, cin) bf16, placed at the fixed MAX_PAD row offset.
        pad_ref[:, MAX_PAD:MAX_PAD + T, 0:cin] = h_bf.reshape(BT, T, cin)

    def tap(dil, cin, k):
        off = MAX_PAD - (K - 1) * dil // 2 + k * dil          # static Python int
        return pad_ref[:, off:off + T, 0:cin].reshape(M, cin)

    def dconv(h_bf, w_ref, b_ref, dil, cin):
        # Dilated 'same' Conv1d as K accumulating MXU matmuls (no lane concat),
        # f32 accumulation, bias folded into the accumulator init.
        stage(h_bf, cin)
        acc = b_ref[...]                                      # (1, cout) broadcasts
        for k in range(K):
            acc = acc + jnp.dot(tap(dil, cin, k), w_ref[k],
                                preferred_element_type=jnp.float32)
        return acc

    # TODO(synk): nn.Dropout(0.2) is identity in inference mode; train-mode dropout not implemented.

    # ---- block 1: 6 -> 128, dilation 1.  conv1 + 1x1 downsample share one fused weight:
    #      output columns [0:128] = conv1 pre-activation, [128:256] = downsample residual. ----
    x_bf = x_ref[...].astype(jnp.bfloat16).reshape(M, FEATURE_SIZE)
    fused = dconv(x_bf, w1a_ref, b1a_ref, DILATIONS[0], FEATURE_SIZE)        # (M, 256)
    c1 = relu(fused[:, :NUM_CHANNELS[0]])
    res = fused[:, NUM_CHANNELS[0]:]
    c2 = relu(dconv(c1.astype(jnp.bfloat16), w2a_ref, b2a_ref, DILATIONS[0], NUM_CHANNELS[0]))
    h = relu(c2 + res)

    # ---- block 2: 128 -> 256, dilation 2 ----
    h_bf = h.astype(jnp.bfloat16)                             # cast once; reused by res + conv1
    res = jnp.dot(h_bf, wdb_ref[...], preferred_element_type=jnp.float32) + bdb_ref[...]
    c1 = relu(dconv(h_bf, w1b_ref, b1b_ref, DILATIONS[1], NUM_CHANNELS[0]))
    c2 = relu(dconv(c1.astype(jnp.bfloat16), w2b_ref, b2b_ref, DILATIONS[1], NUM_CHANNELS[1]))
    h = relu(c2 + res)

    # ---- block 3: 256 -> 256, dilation 4 (identity residual) ----
    h_bf = h.astype(jnp.bfloat16)
    c1 = relu(dconv(h_bf, w1c_ref, b1c_ref, DILATIONS[2], NUM_CHANNELS[1]))
    c2 = relu(dconv(c1.astype(jnp.bfloat16), w2c_ref, b2c_ref, DILATIONS[2], NUM_CHANNELS[2]))
    h = relu(c2 + h)

    # ---- head: mean over time -> linear -> softmax (padded classes carry a -1e30 bias) ----
    m = jnp.sum(h.reshape(BT, T, NUM_CHANNELS[-1]), axis=1) * (1.0 / T)      # (BT, 256)
    logits = jnp.dot(m, wout_ref[...], preferred_element_type=jnp.float32) + bout_ref[...]
    logits = logits - jnp.max(logits, axis=-1, keepdims=True)
    e = jnp.exp(logits)
    o_ref[...] = (e / jnp.sum(e, axis=-1, keepdims=True)).astype(o_ref.dtype)


# ----------------------------------- wrapper -----------------------------------------------------
_PARAM_KEYS = ("w1a", "b1a", "w2a", "b2a",
               "w1b", "b1b", "w2b", "b2b", "wdb", "bdb",
               "w1c", "b1c", "w2c", "b2c",
               "w_out", "b_out")


def _choose_b_tile(B, T):
    # Fill the MXU M dimension (target ~256 rows for v6e/v7x; 128+ already saturates v5e),
    # but keep >= 2 grid steps when batch allows so both v7x TensorCores get work.
    bt = max(1, min(B, 256 // max(T, 1)))
    while bt > 1 and B // bt < 2:
        bt //= 2
    return bt


def tcn_forward(x, params):
    """x: (B, T, FEATURE_SIZE) float32 -> softmax probs (B, NUM_CLASSES)."""
    B, T, F = x.shape
    bt = _choose_b_tile(B, T)
    steps = -(-B // bt)
    Bp = steps * bt
    if Bp != B:  # pad batch to a multiple of the batch tile (padded rows discarded below)
        x = jnp.concatenate([x, jnp.zeros((Bp - B, T, F), x.dtype)], axis=0)

    weights = [params[k] for k in _PARAM_KEYS]

    out = pl.pallas_call(
        functools.partial(_tcn_fused_kernel, T=T, BT=bt),
        out_shape=jax.ShapeDtypeStruct((steps, bt, NC_PAD), jnp.float32),
        grid=(steps,),
        in_specs=[pl.BlockSpec((bt, T, F), lambda i: (i, 0, 0))]
                 + [pl.BlockSpec(memory_space=pltpu.MemorySpace.VMEM) for _ in weights],
        out_specs=pl.BlockSpec((None, bt, NC_PAD), lambda i: (i, 0, 0)),
        scratch_shapes=[pltpu.VMEM((bt, T + 2 * MAX_PAD, C_MAX), jnp.bfloat16)],
        compiler_params=pltpu.CompilerParams(dimension_semantics=("parallel",)),
    )(x, *weights)
    return out.reshape(Bp, NC_PAD)[:B, :NUM_CLASSES]


# ----------------------------------- parameters (synthetic, deterministic) ----------------------
def _weight_norm(v, g):
    # PyTorch weight_norm (dim=0): w[o] = g[o] * v[o] / ||v[o]||_2, norm over (Cin, K).
    norm = jnp.sqrt(jnp.sum(v * v, axis=(1, 2), keepdims=True))
    return g.reshape(-1, 1, 1) * v / norm


def _taps_layout(w):
    # (Cout, Cin, K) -> (K, Cin, Cout): per-tap matmul weights.
    return jnp.transpose(w, (2, 1, 0))


def init_params(key):
    def conv_v(k, cin, cout, ksz):
        scale = 1.0 / jnp.sqrt(cin * ksz)
        return scale * jax.random.normal(k, (cout, cin, ksz), jnp.float32)

    p = {}
    c0 = NUM_CHANNELS[0]

    # ---- block 1 (conv1 fused with the 1x1 downsample residual) ----
    key, k1, k2, k3, k4, k5, k6, k7, k8 = jax.random.split(key, 9)
    w1 = _weight_norm(conv_v(k1, FEATURE_SIZE, c0, KERNEL_SIZE),
                      1.0 + 0.1 * jax.random.normal(k2, (c0,), jnp.float32))
    b1 = 0.01 * jax.random.normal(k3, (c0,), jnp.float32)
    w2 = _weight_norm(conv_v(k4, c0, c0, KERNEL_SIZE),
                      1.0 + 0.1 * jax.random.normal(k5, (c0,), jnp.float32))
    b2 = 0.01 * jax.random.normal(k6, (c0,), jnp.float32)
    wd = (1.0 / jnp.sqrt(FEATURE_SIZE)) * jax.random.normal(k7, (c0, FEATURE_SIZE, 1), jnp.float32)
    bd = 0.01 * jax.random.normal(k8, (c0,), jnp.float32)

    w1a = jnp.zeros((KERNEL_SIZE, FEATURE_SIZE, 2 * c0), jnp.float32)
    w1a = w1a.at[:, :, :c0].set(_taps_layout(w1))
    # the 1x1 downsample acts on x itself == the centre tap (k=1) of the dilation-1 conv
    w1a = w1a.at[1, :, c0:].set(jnp.transpose(wd[:, :, 0]))
    p["w1a"] = w1a.astype(jnp.bfloat16)                                      # (K, 6, 256)
    p["b1a"] = jnp.concatenate([b1, bd]).reshape(1, 2 * c0)                  # (1, 256) f32
    p["w2a"] = _taps_layout(w2).astype(jnp.bfloat16)                         # (K, 128, 128)
    p["b2a"] = b2.reshape(1, c0)

    # ---- blocks 2, 3 ----
    in_ch = c0
    for i, name in ((1, "b"), (2, "c")):
        out_ch = NUM_CHANNELS[i]
        key, k1, k2, k3, k4, k5, k6, k7, k8 = jax.random.split(key, 9)
        w1 = _weight_norm(conv_v(k1, in_ch, out_ch, KERNEL_SIZE),
                          1.0 + 0.1 * jax.random.normal(k2, (out_ch,), jnp.float32))
        w2 = _weight_norm(conv_v(k4, out_ch, out_ch, KERNEL_SIZE),
                          1.0 + 0.1 * jax.random.normal(k5, (out_ch,), jnp.float32))
        p[f"w1{name}"] = _taps_layout(w1).astype(jnp.bfloat16)               # (K, Cin, Cout)
        p[f"b1{name}"] = (0.01 * jax.random.normal(k3, (out_ch,), jnp.float32)).reshape(1, out_ch)
        p[f"w2{name}"] = _taps_layout(w2).astype(jnp.bfloat16)
        p[f"b2{name}"] = (0.01 * jax.random.normal(k6, (out_ch,), jnp.float32)).reshape(1, out_ch)
        if in_ch != out_ch:  # 1x1 downsample conv (block 2 only)
            wd = (1.0 / jnp.sqrt(in_ch)) * jax.random.normal(k7, (out_ch, in_ch, 1), jnp.float32)
            p[f"wd{name}"] = jnp.transpose(wd[:, :, 0]).astype(jnp.bfloat16)  # (Cin, Cout)
            p[f"bd{name}"] = (0.01 * jax.random.normal(k8, (out_ch,), jnp.float32)).reshape(1, out_ch)
        in_ch = out_ch

    # ---- head, lane-padded to NC_PAD classes (-1e30 bias so softmax zeroes the pads) ----
    key, ka, kb = jax.random.split(key, 3)
    c_last = NUM_CHANNELS[-1]
    w_out = (1.0 / jnp.sqrt(c_last)) * jax.random.normal(ka, (c_last, NUM_CLASSES), jnp.float32)
    b_out = 0.01 * jax.random.normal(kb, (NUM_CLASSES,), jnp.float32)
    p["w_out"] = jnp.zeros((c_last, NC_PAD), jnp.float32).at[:, :NUM_CLASSES].set(w_out)
    p["b_out"] = jnp.full((1, NC_PAD), -1e30, jnp.float32).at[0, :NUM_CLASSES].set(b_out)
    return p


# ----------------------------------------- main -------------------------------------------------
if __name__ == "__main__":
    key = jax.random.PRNGKey(0)
    key, kx, kp = jax.random.split(key, 3)

    B, T = 2, 16
    x = jax.random.normal(kx, (B, T, FEATURE_SIZE), jnp.float32)  # PyTorch input layout (B, seq, feat)
    params = init_params(kp)

    out = jax.jit(tcn_forward)(x, params)
    out = jax.block_until_ready(out)

    assert out.shape == (B, NUM_CLASSES)
    # softmax rows sum to 1
    assert bool(jnp.all(jnp.abs(jnp.sum(out, axis=1) - 1.0) < 1e-5))
    print("KERNEL_OK")
</pallas_src>

<mosaic_0001>
module attributes {stable_mosaic.version = 11 : i64} {
  func.func @_tcn_fused_kernel(%arg0: i32, %arg1: memref<1x16x6xf32, #tpu.memory_space<vmem>>, %arg2: memref<3x6x256xbf16, #tpu.memory_space<vmem>>, %arg3: memref<1x256xf32, #tpu.memory_space<vmem>>, %arg4: memref<3x128x128xbf16, #tpu.memory_space<vmem>>, %arg5: memref<1x128xf32, #tpu.memory_space<vmem>>, %arg6: memref<3x128x256xbf16, #tpu.memory_space<vmem>>, %arg7: memref<1x256xf32, #tpu.memory_space<vmem>>, %arg8: memref<3x256x256xbf16, #tpu.memory_space<vmem>>, %arg9: memref<1x256xf32, #tpu.memory_space<vmem>>, %arg10: memref<128x256xbf16, #tpu.memory_space<vmem>>, %arg11: memref<1x256xf32, #tpu.memory_space<vmem>>, %arg12: memref<3x256x256xbf16, #tpu.memory_space<vmem>>, %arg13: memref<1x256xf32, #tpu.memory_space<vmem>>, %arg14: memref<3x256x256xbf16, #tpu.memory_space<vmem>>, %arg15: memref<1x256xf32, #tpu.memory_space<vmem>>, %arg16: memref<256x128xf32, #tpu.memory_space<vmem>>, %arg17: memref<1x128xf32, #tpu.memory_space<vmem>>, %arg18: memref<1x1x128xf32, #tpu.memory_space<vmem>>, %arg19: memref<1x24x256xbf16, #tpu.memory_space<vmem>>) attributes {dimension_semantics = [#tpu.dimension_semantics<parallel>], iteration_bounds = array<i64: 2>, scalar_prefetch = 0 : i64, scratch_operands = 1 : i64, tpu.core_type = #tpu.core_type<tc>, window_params = [{transform_indices = @transform_0, window_bounds = array<i64: 1, 16, 6>}, {pipeline_mode = #tpu.pipeline_mode<synchronous>, transform_indices = @transform_1, window_bounds = array<i64: 3, 6, 256>}, {pipeline_mode = #tpu.pipeline_mode<synchronous>, transform_indices = @transform_2, window_bounds = array<i64: 1, 256>}, {pipeline_mode = #tpu.pipeline_mode<synchronous>, transform_indices = @transform_3, window_bounds = array<i64: 3, 128, 128>}, {pipeline_mode = #tpu.pipeline_mode<synchronous>, transform_indices = @transform_4, window_bounds = array<i64: 1, 128>}, {pipeline_mode = #tpu.pipeline_mode<synchronous>, transform_indices = @transform_5, window_bounds = array<i64: 3, 128, 256>}, {pipeline_mode = #tpu.pipeline_mode<synchronous>, transform_indices = @transform_6, window_bounds = array<i64: 1, 256>}, {pipeline_mode = #tpu.pipeline_mode<synchronous>, transform_indices = @transform_7, window_bounds = array<i64: 3, 256, 256>}, {pipeline_mode = #tpu.pipeline_mode<synchronous>, transform_indices = @transform_8, window_bounds = array<i64: 1, 256>}, {pipeline_mode = #tpu.pipeline_mode<synchronous>, transform_indices = @transform_9, window_bounds = array<i64: 128, 256>}, {pipeline_mode = #tpu.pipeline_mode<synchronous>, transform_indices = @transform_10, window_bounds = array<i64: 1, 256>}, {pipeline_mode = #tpu.pipeline_mode<synchronous>, transform_indices = @transform_11, window_bounds = array<i64: 3, 256, 256>}, {pipeline_mode = #tpu.pipeline_mode<synchronous>, transform_indices = @transform_12, window_bounds = array<i64: 1, 256>}, {pipeline_mode = #tpu.pipeline_mode<synchronous>, transform_indices = @transform_13, window_bounds = array<i64: 3, 256, 256>}, {pipeline_mode = #tpu.pipeline_mode<synchronous>, transform_indices = @transform_14, window_bounds = array<i64: 1, 256>}, {pipeline_mode = #tpu.pipeline_mode<synchronous>, transform_indices = @transform_15, window_bounds = array<i64: 256, 128>}, {pipeline_mode = #tpu.pipeline_mode<synchronous>, transform_indices = @transform_16, window_bounds = array<i64: 1, 128>}, {transform_indices = @transform_17, window_bounds = array<i64: 1, 1, 128>}]} {
    %cst = arith.constant 0.000000e+00 : bf16
    %0 = vector.broadcast %cst : bf16 to vector<1x4x256xbf16>
    %c0 = arith.constant 0 : index
    %c0_0 = arith.constant 0 : index
    %c0_1 = arith.constant 0 : index
    %1 = vector.load %arg19[%c0, %c0_0, %c0_1] : memref<1x24x256xbf16, #tpu.memory_space<vmem>>, vector<1x4x256xbf16>
    tpu.vector_store %arg19[%c0, %c0_0, %c0_1], %0 {strides = array<i32>} : memref<1x24x256xbf16, #tpu.memory_space<vmem>>, vector<1x4x256xbf16>,
    %c0_2 = arith.constant 0 : index
    %c20 = arith.constant 20 : index
    %c0_3 = arith.constant 0 : index
    %2 = vector.load %arg19[%c0_2, %c20, %c0_3] : memref<1x24x256xbf16, #tpu.memory_space<vmem>>, vector<1x4x256xbf16>
    tpu.vector_store %arg19[%c0_2, %c20, %c0_3], %0 {strides = array<i32>} : memref<1x24x256xbf16, #tpu.memory_space<vmem>>, vector<1x4x256xbf16>,
    %c0_4 = arith.constant 0 : index
    %c0_5 = arith.constant 0 : index
    %c0_6 = arith.constant 0 : index
    %3 = vector.load %arg1[%c0_4, %c0_5, %c0_6] : memref<1x16x6xf32, #tpu.memory_space<vmem>>, vector<1x16x6xf32>
    %4 = arith.truncf %3 : vector<1x16x6xf32> to vector<1x16x6xbf16>
    %5 = vector.shape_cast %4 : vector<1x16x6xbf16> to vector<16x6xbf16>
    %6 = vector.shape_cast %5 : vector<16x6xbf16> to vector<1x16x6xbf16>
    %c0_7 = arith.constant 0 : index
    %c4 = arith.constant 4 : index
    %c0_8 = arith.constant 0 : index
    %7 = vector.load %arg19[%c0_7, %c4, %c0_8] : memref<1x24x256xbf16, #tpu.memory_space<vmem>>, vector<1x16x6xbf16>
    tpu.vector_store %arg19[%c0_7, %c4, %c0_8], %6 {strides = array<i32>} : memref<1x24x256xbf16, #tpu.memory_space<vmem>>, vector<1x16x6xbf16>,
    %c0_9 = arith.constant 0 : index
    %c0_10 = arith.constant 0 : index
    %8 = vector.load %arg3[%c0_9, %c0_10] : memref<1x256xf32, #tpu.memory_space<vmem>>, vector<1x256xf32>
    %c0_11 = arith.constant 0 : index
    %c3 = arith.constant 3 : index
    %c0_12 = arith.constant 0 : index
    %9 = vector.load %arg19[%c0_11, %c3, %c0_12] : memref<1x24x256xbf16, #tpu.memory_space<vmem>>, vector<1x16x6xbf16>
    %10 = vector.shape_cast %9 : vector<1x16x6xbf16> to vector<16x6xbf16>
    %c0_13 = arith.constant 0 : index
    %c0_14 = arith.constant 0 : index
    %c0_15 = arith.constant 0 : index
    %11 = vector.load %arg2[%c0_13, %c0_14, %c0_15] : memref<3x6x256xbf16, #tpu.memory_space<vmem>>, vector<1x6x256xbf16>
    %12 = vector.shape_cast %11 : vector<1x6x256xbf16> to vector<6x256xbf16>
    %cst_16 = arith.constant dense<0.000000e+00> : vector<16x256xf32>
    %13 = tpu.matmul %10, %12, %cst_16 {dimension_numbers = #tpu.dot_dimension_numbers<[1], [0], [0], [1], [0, 0, 1, 1], [], []>} : vector<16x6xbf16>, vector<6x256xbf16>, vector<16x256xf32> -> vector<16x256xf32>
    %14 = vector.broadcast %8 : vector<1x256xf32> to vector<16x256xf32>
    %15 = arith.addf %14, %13 : vector<16x256xf32>
    %c0_17 = arith.constant 0 : index
    %c4_18 = arith.constant 4 : index
    %c0_19 = arith.constant 0 : index
    %16 = vector.load %arg19[%c0_17, %c4_18, %c0_19] : memref<1x24x256xbf16, #tpu.memory_space<vmem>>, vector<1x16x6xbf16>
    %17 = vector.shape_cast %16 : vector<1x16x6xbf16> to vector<16x6xbf16>
    %c1 = arith.constant 1 : index
    %c0_20 = arith.constant 0 : index
    %c0_21 = arith.constant 0 : index
    %18 = vector.load %arg2[%c1, %c0_20, %c0_21] : memref<3x6x256xbf16, #tpu.memory_space<vmem>>, vector<1x6x256xbf16>
    %19 = vector.shape_cast %18 : vector<1x6x256xbf16> to vector<6x256xbf16>
    %cst_22 = arith.constant dense<0.000000e+00> : vector<16x256xf32>
    %20 = tpu.matmul %17, %19, %cst_22 {dimension_numbers = #tpu.dot_dimension_numbers<[1], [0], [0], [1], [0, 0, 1, 1], [], []>} : vector<16x6xbf16>, vector<6x256xbf16>, vector<16x256xf32> -> vector<16x256xf32>
    %21 = arith.addf %15, %20 : vector<16x256xf32>
    %c0_23 = arith.constant 0 : index
    %c5 = arith.constant 5 : index
    %c0_24 = arith.constant 0 : index
    %22 = vector.load %arg19[%c0_23, %c5, %c0_24] : memref<1x24x256xbf16, #tpu.memory_space<vmem>>, vector<1x16x6xbf16>
    %23 = vector.shape_cast %22 : vector<1x16x6xbf16> to vector<16x6xbf16>
    %c2 = arith.constant 2 : index
    %c0_25 = arith.constant 0 : index
    %c0_26 = arith.constant 0 : index
    %24 = vector.load %arg2[%c2, %c0_25, %c0_26] : memref<3x6x256xbf16, #tpu.memory_space<vmem>>, vector<1x6x256xbf16>
    %25 = vector.shape_cast %24 : vector<1x6x256xbf16> to vector<6x256xbf16>
    %cst_27 = arith.constant dense<0.000000e+00> : vector<16x256xf32>
    %26 = tpu.matmul %23, %25, %cst_27 {dimension_numbers = #tpu.dot_dimension_numbers<[1], [0], [0], [1], [0, 0, 1, 1], [], []>} : vector<16x6xbf16>, vector<6x256xbf16>, vector<16x256xf32> -> vector<16x256xf32>
    %27 = arith.addf %21, %26 : vector<16x256xf32>
    %28 = vector.extract_strided_slice %27 {offsets = [0, 0], sizes = [16, 128], strides = [1, 1]} : vector<16x256xf32> to vector<16x128xf32>
    %cst_28 = arith.constant 0.000000e+00 : f32
    %29 = vector.broadcast %cst_28 : f32 to vector<16x128xf32>
    %30 = arith.maximumf %28, %29 : vector<16x128xf32>
    %31 = vector.extract_strided_slice %27 {offsets = [0, 128], sizes = [16, 128], strides = [1, 1]} : vector<16x256xf32> to vector<16x128xf32>
    %32 = arith.truncf %30 : vector<16x128xf32> to vector<16x128xbf16>
    %33 = vector.shape_cast %32 : vector<16x128xbf16> to vector<1x16x128xbf16>
    %c0_29 = arith.constant 0 : index
    %c4_30 = arith.constant 4 : index
    %c0_31 = arith.constant 0 : index
    %34 = vector.load %arg19[%c0_29, %c4_30, %c0_31] : memref<1x24x256xbf16, #tpu.memory_space<vmem>>, vector<1x16x128xbf16>
    tpu.vector_store %arg19[%c0_29, %c4_30, %c0_31], %33 {strides = array<i32>} : memref<1x24x256xbf16, #tpu.memory_space<vmem>>, vector<1x16x128xbf16>,
    %c0_32 = arith.constant 0 : index
    %c0_33 = arith.constant 0 : index
    %35 = vector.load %arg5[%c0_32, %c0_33] : memref<1x128xf32, #tpu.memory_space<vmem>>, vector<1x128xf32>
    %c0_34 = arith.constant 0 : index
    %c3_35 = arith.constant 3 : index
    %c0_36 = arith.constant 0 : index
    %36 = vector.load %arg19[%c0_34, %c3_35, %c0_36] : memref<1x24x256xbf16, #tpu.memory_space<vmem>>, vector<1x16x128xbf16>
    %37 = vector.shape_cast %36 : vector<1x16x128xbf16> to vector<16x128xbf16>
    %c0_37 = arith.constant 0 : index
    %c0_38 = arith.constant 0 : index
    %c0_39 = arith.constant 0 : index
    %38 = vector.load %arg4[%c0_37, %c0_38, %c0_39] : memref<3x128x128xbf16, #tpu.memory_space<vmem>>, vector<1x128x128xbf16>
    %39 = vector.shape_cast %38 : vector<1x128x128xbf16> to vector<128x128xbf16>
    %cst_40 = arith.constant dense<0.000000e+00> : vector<16x128xf32>
    %40 = tpu.matmul %37, %39, %cst_40 {dimension_numbers = #tpu.dot_dimension_numbers<[1], [0], [0], [1], [0, 0, 1, 1], [], []>} : vector<16x128xbf16>, vector<128x128xbf16>, vector<16x128xf32> -> vector<16x128xf32>
    %41 = vector.broadcast %35 : vector<1x128xf32> to vector<16x128xf32>
    %42 = arith.addf %41, %40 : vector<16x128xf32>
    %c0_41 = arith.constant 0 : index
    %c4_42 = arith.constant 4 : index
    %c0_43 = arith.constant 0 : index
    %43 = vector.load %arg19[%c0_41, %c4_42, %c0_43] : memref<1x24x256xbf16, #tpu.memory_space<vmem>>, vector<1x16x128xbf16>
    %44 = vector.shape_cast %43 : vector<1x16x128xbf16> to vector<16x128xbf16>
    %c1_44 = arith.constant 1 : index
    %c0_45 = arith.constant 0 : index
    %c0_46 = arith.constant 0 : index
    %45 = vector.load %arg4[%c1_44, %c0_45, %c0_46] : memref<3x128x128xbf16, #tpu.memory_space<vmem>>, vector<1x128x128xbf16>
    %46 = vector.shape_cast %45 : vector<1x128x128xbf16> to vector<128x128xbf16>
    %cst_47 = arith.constant dense<0.000000e+00> : vector<16x128xf32>
    %47 = tpu.matmul %44, %46, %cst_47 {dimension_numbers = #tpu.dot_dimension_numbers<[1], [0], [0], [1], [0, 0, 1, 1], [], []>} : vector<16x128xbf16>, vector<128x128xbf16>, vector<16x128xf32> -> vector<16x128xf32>
    %48 = arith.addf %42, %47 : vector<16x128xf32>
    %c0_48 = arith.constant 0 : index
    %c5_49 = arith.constant 5 : index
    %c0_50 = arith.constant 0 : index
    %49 = vector.load %arg19[%c0_48, %c5_49, %c0_50] : memref<1x24x256xbf16, #tpu.memory_space<vmem>>, vector<1x16x128xbf16>
    %50 = vector.shape_cast %49 : vector<1x16x128xbf16> to vector<16x128xbf16>
    %c2_51 = arith.constant 2 : index
    %c0_52 = arith.constant 0 : index
    %c0_53 = arith.constant 0 : index
    %51 = vector.load %arg4[%c2_51, %c0_52, %c0_53] : memref<3x128x128xbf16, #tpu.memory_space<vmem>>, vector<1x128x128xbf16>
    %52 = vector.shape_cast %51 : vector<1x128x128xbf16> to vector<128x128xbf16>
    %cst_54 = arith.constant dense<0.000000e+00> : vector<16x128xf32>
    %53 = tpu.matmul %50, %52, %cst_54 {dimension_numbers = #tpu.dot_dimension_numbers<[1], [0], [0], [1], [0, 0, 1, 1], [], []>} : vector<16x128xbf16>, vector<128x128xbf16>, vector<16x128xf32> -> vector<16x128xf32>
    %54 = arith.addf %48, %53 : vector<16x128xf32>
    %cst_55 = arith.constant 0.000000e+00 : f32
    %55 = vector.broadcast %cst_55 : f32 to vector<16x128xf32>
    %56 = arith.maximumf %54, %55 : vector<16x128xf32>
    %57 = arith.addf %56, %31 : vector<16x128xf32>
    %cst_56 = arith.constant 0.000000e+00 : f32
    %58 = vector.broadcast %cst_56 : f32 to vector<16x128xf32>
    %59 = arith.maximumf %57, %58 : vector<16x128xf32>
    %60 = arith.truncf %59 : vector<16x128xf32> to vector<16x128xbf16>
    %c0_57 = arith.constant 0 : index
    %c0_58 = arith.constant 0 : index
    %61 = vector.load %arg10[%c0_57, %c0_58] : memref<128x256xbf16, #tpu.memory_space<vmem>>, vector<128x256xbf16>
    %cst_59 = arith.constant dense<0.000000e+00> : vector<16x256xf32>
    %62 = tpu.matmul %60, %61, %cst_59 {dimension_numbers = #tpu.dot_dimension_numbers<[1], [0], [0], [1], [0, 0, 1, 1], [], []>} : vector<16x128xbf16>, vector<128x256xbf16>, vector<16x256xf32> -> vector<16x256xf32>
    %c0_60 = arith.constant 0 : index
    %c0_61 = arith.constant 0 : index
    %63 = vector.load %arg11[%c0_60, %c0_61] : memref<1x256xf32, #tpu.memory_space<vmem>>, vector<1x256xf32>
    %64 = vector.broadcast %63 : vector<1x256xf32> to vector<16x256xf32>
    %65 = arith.addf %62, %64 : vector<16x256xf32>
    %66 = vector.shape_cast %60 : vector<16x128xbf16> to vector<1x16x128xbf16>
    %c0_62 = arith.constant 0 : index
    %c4_63 = arith.constant 4 : index
    %c0_64 = arith.constant 0 : index
    %67 = vector.load %arg19[%c0_62, %c4_63, %c0_64] : memref<1x24x256xbf16, #tpu.memory_space<vmem>>, vector<1x16x128xbf16>
    tpu.vector_store %arg19[%c0_62, %c4_63, %c0_64], %66 {strides = array<i32>} : memref<1x24x256xbf16, #tpu.memory_space<vmem>>, vector<1x16x128xbf16>,
    %c0_65 = arith.constant 0 : index
    %c0_66 = arith.constant 0 : index
    %68 = vector.load %arg7[%c0_65, %c0_66] : memref<1x256xf32, #tpu.memory_space<vmem>>, vector<1x256xf32>
    %c0_67 = arith.constant 0 : index
    %c2_68 = arith.constant 2 : index
    %c0_69 = arith.constant 0 : index
    %69 = vector.load %arg19[%c0_67, %c2_68, %c0_69] : memref<1x24x256xbf16, #tpu.memory_space<vmem>>, vector<1x16x128xbf16>
    %70 = vector.shape_cast %69 : vector<1x16x128xbf16> to vector<16x128xbf16>
    %c0_70 = arith.constant 0 : index
    %c0_71 = arith.constant 0 : index
    %c0_72 = arith.constant 0 : index
    %71 = vector.load %arg6[%c0_70, %c0_71, %c0_72] : memref<3x128x256xbf16, #tpu.memory_space<vmem>>, vector<1x128x256xbf16>
    %72 = vector.shape_cast %71 : vector<1x128x256xbf16> to vector<128x256xbf16>
    %cst_73 = arith.constant dense<0.000000e+00> : vector<16x256xf32>
    %73 = tpu.matmul %70, %72, %cst_73 {dimension_numbers = #tpu.dot_dimension_numbers<[1], [0], [0], [1], [0, 0, 1, 1], [], []>} : vector<16x128xbf16>, vector<128x256xbf16>, vector<16x256xf32> -> vector<16x256xf32>
    %74 = vector.broadcast %68 : vector<1x256xf32> to vector<16x256xf32>
    %75 = arith.addf %74, %73 : vector<16x256xf32>
    %c0_74 = arith.constant 0 : index
    %c4_75 = arith.constant 4 : index
    %c0_76 = arith.constant 0 : index
    %76 = vector.load %arg19[%c0_74, %c4_75, %c0_76] : memref<1x24x256xbf16, #tpu.memory_space<vmem>>, vector<1x16x128xbf16>
    %77 = vector.shape_cast %76 : vector<1x16x128xbf16> to vector<16x128xbf16>
    %c1_77 = arith.constant 1 : index
    %c0_78 = arith.constant 0 : index
    %c0_79 = arith.constant 0 : index
    %78 = vector.load %arg6[%c1_77, %c0_78, %c0_79] : memref<3x128x256xbf16, #tpu.memory_space<vmem>>, vector<1x128x256xbf16>
    %79 = vector.shape_cast %78 : vector<1x128x256xbf16> to vector<128x256xbf16>
    %cst_80 = arith.constant dense<0.000000e+00> : vector<16x256xf32>
    %80 = tpu.matmul %77, %79, %cst_80 {dimension_numbers = #tpu.dot_dimension_numbers<[1], [0], [0], [1], [0, 0, 1, 1], [], []>} : vector<16x128xbf16>, vector<128x256xbf16>, vector<16x256xf32> -> vector<16x256xf32>
    %81 = arith.addf %75, %80 : vector<16x256xf32>
    %c0_81 = arith.constant 0 : index
    %c6 = arith.constant 6 : index
    %c0_82 = arith.constant 0 : index
    %82 = vector.load %arg19[%c0_81, %c6, %c0_82] : memref<1x24x256xbf16, #tpu.memory_space<vmem>>, vector<1x16x128xbf16>
    %83 = vector.shape_cast %82 : vector<1x16x128xbf16> to vector<16x128xbf16>
    %c2_83 = arith.constant 2 : index
    %c0_84 = arith.constant 0 : index
    %c0_85 = arith.constant 0 : index
    %84 = vector.load %arg6[%c2_83, %c0_84, %c0_85] : memref<3x128x256xbf16, #tpu.memory_space<vmem>>, vector<1x128x256xbf16>
    %85 = vector.shape_cast %84 : vector<1x128x256xbf16> to vector<128x256xbf16>
    %cst_86 = arith.constant dense<0.000000e+00> : vector<16x256xf32>
    %86 = tpu.matmul %83, %85, %cst_86 {dimension_numbers = #tpu.dot_dimension_numbers<[1], [0], [0], [1], [0, 0, 1, 1], [], []>} : vector<16x128xbf16>, vector<128x256xbf16>, vector<16x256xf32> -> vector<16x256xf32>
    %87 = arith.addf %81, %86 : vector<16x256xf32>
    %cst_87 = arith.constant 0.000000e+00 : f32
    %88 = vector.broadcast %cst_87 : f32 to vector<16x256xf32>
    %89 = arith.maximumf %87, %88 : vector<16x256xf32>
    %90 = arith.truncf %89 : vector<16x256xf32> to vector<16x256xbf16>
    %91 = vector.shape_cast %90 : vector<16x256xbf16> to vector<1x16x256xbf16>
    %c0_88 = arith.constant 0 : index
    %c4_89 = arith.constant 4 : index
    %c0_90 = arith.constant 0 : index
    %92 = vector.load %arg19[%c0_88, %c4_89, %c0_90] : memref<1x24x256xbf16, #tpu.memory_space<vmem>>, vector<1x16x256xbf16>
    tpu.vector_store %arg19[%c0_88, %c4_89, %c0_90], %91 {strides = array<i32>} : memref<1x24x256xbf16, #tpu.memory_space<vmem>>, vector<1x16x256xbf16>,
    %c0_91 = arith.constant 0 : index
    %c0_92 = arith.constant 0 : index
    %93 = vector.load %arg9[%c0_91, %c0_92] : memref<1x256xf32, #tpu.memory_space<vmem>>, vector<1x256xf32>
    %c0_93 = arith.constant 0 : index
    %c2_94 = arith.constant 2 : index
    %c0_95 = arith.constant 0 : index
    %94 = vector.load %arg19[%c0_93, %c2_94, %c0_95] : memref<1x24x256xbf16, #tpu.memory_space<vmem>>, vector<1x16x256xbf16>
    %95 = vector.shape_cast %94 : vector<1x16x256xbf16> to vector<16x256xbf16>
    %c0_96 = arith.constant 0 : index
    %c0_97 = arith.constant 0 : index
    %c0_98 = arith.constant 0 : index
    %96 = vector.load %arg8[%c0_96, %c0_97, %c0_98] : memref<3x256x256xbf16, #tpu.memory_space<vmem>>, vector<1x256x256xbf16>
    %97 = vector.shape_cast %96 : vector<1x256x256xbf16> to vector<256x256xbf16>
    %cst_99 = arith.constant dense<0.000000e+00> : vector<16x256xf32>
    %98 = tpu.matmul %95, %97, %cst_99 {dimension_numbers = #tpu.dot_dimension_numbers<[1], [0], [0], [1], [0, 0, 1, 1], [], []>} : vector<16x256xbf16>, vector<256x256xbf16>, vector<16x256xf32> -> vector<16x256xf32>
    %99 = vector.broadcast %93 : vector<1x256xf32> to vector<16x256xf32>
    %100 = arith.addf %99, %98 : vector<16x256xf32>
    %c0_100 = arith.constant 0 : index
    %c4_101 = arith.constant 4 : index
    %c0_102 = arith.constant 0 : index
    %101 = vector.load %arg19[%c0_100, %c4_101, %c0_102] : memref<1x24x256xbf16, #tpu.memory_space<vmem>>, vector<1x16x256xbf16>
    %102 = vector.shape_cast %101 : vector<1x16x256xbf16> to vector<16x256xbf16>
    %c1_103 = arith.constant 1 : index
    %c0_104 = arith.constant 0 : index
    %c0_105 = arith.constant 0 : index
    %103 = vector.load %arg8[%c1_103, %c0_104, %c0_105] : memref<3x256x256xbf16, #tpu.memory_space<vmem>>, vector<1x256x256xbf16>
    %104 = vector.shape_cast %103 : vector<1x256x256xbf16> to vector<256x256xbf16>
    %cst_106 = arith.constant dense<0.000000e+00> : vector<16x256xf32>
    %105 = tpu.matmul %102, %104, %cst_106 {dimension_numbers = #tpu.dot_dimension_numbers<[1], [0], [0], [1], [0, 0, 1, 1], [], []>} : vector<16x256xbf16>, vector<256x256xbf16>, vector<16x256xf32> -> vector<16x256xf32>
    %106 = arith.addf %100, %105 : vector<16x256xf32>
    %c0_107 = arith.constant 0 : index
    %c6_108 = arith.constant 6 : index
    %c0_109 = arith.constant 0 : index
    %107 = vector.load %arg19[%c0_107, %c6_108, %c0_109] : memref<1x24x256xbf16, #tpu.memory_space<vmem>>, vector<1x16x256xbf16>
    %108 = vector.shape_cast %107 : vector<1x16x256xbf16> to vector<16x256xbf16>
    %c2_110 = arith.constant 2 : index
    %c0_111 = arith.constant 0 : index
    %c0_112 = arith.constant 0 : index
    %109 = vector.load %arg8[%c2_110, %c0_111, %c0_112] : memref<3x256x256xbf16, #tpu.memory_space<vmem>>, vector<1x256x256xbf16>
    %110 = vector.shape_cast %109 : vector<1x256x256xbf16> to vector<256x256xbf16>
    %cst_113 = arith.constant dense<0.000000e+00> : vector<16x256xf32>
    %111 = tpu.matmul %108, %110, %cst_113 {dimension_numbers = #tpu.dot_dimension_numbers<[1], [0], [0], [1], [0, 0, 1, 1], [], []>} : vector<16x256xbf16>, vector<256x256xbf16>, vector<16x256xf32> -> vector<16x256xf32>
    %112 = arith.addf %106, %111 : vector<16x256xf32>
    %cst_114 = arith.constant 0.000000e+00 : f32
    %113 = vector.broadcast %cst_114 : f32 to vector<16x256xf32>
    %114 = arith.maximumf %112, %113 : vector<16x256xf32>
    %115 = arith.addf %114, %65 : vector<16x256xf32>
    %cst_115 = arith.constant 0.000000e+00 : f32
    %116 = vector.broadcast %cst_115 : f32 to vector<16x256xf32>
    %117 = arith.maximumf %115, %116 : vector<16x256xf32>
    %118 = arith.truncf %117 : vector<16x256xf32> to vector<16x256xbf16>
    %119 = vector.shape_cast %118 : vector<16x256xbf16> to vector<1x16x256xbf16>
    %c0_116 = arith.constant 0 : index
    %c4_117 = arith.constant 4 : index
    %c0_118 = arith.constant 0 : index
    %120 = vector.load %arg19[%c0_116, %c4_117, %c0_118] : memref<1x24x256xbf16, #tpu.memory_space<vmem>>, vector<1x16x256xbf16>
    tpu.vector_store %arg19[%c0_116, %c4_117, %c0_118], %119 {strides = array<i32>} : memref<1x24x256xbf16, #tpu.memory_space<vmem>>, vector<1x16x256xbf16>,
    %c0_119 = arith.constant 0 : index
    %c0_120 = arith.constant 0 : index
    %121 = vector.load %arg13[%c0_119, %c0_120] : memref<1x256xf32, #tpu.memory_space<vmem>>, vector<1x256xf32>
    %c0_121 = arith.constant 0 : index
    %c0_122 = arith.constant 0 : index
    %c0_123 = arith.constant 0 : index
    %122 = vector.load %arg19[%c0_121, %c0_122, %c0_123] : memref<1x24x256xbf16, #tpu.memory_space<vmem>>, vector<1x16x256xbf16>
    %123 = vector.shape_cast %122 : vector<1x16x256xbf16> to vector<16x256xbf16>
    %c0_124 = arith.constant 0 : index
    %c0_125 = arith.constant 0 : index
    %c0_126 = arith.constant 0 : index
    %124 = vector.load %arg12[%c0_124, %c0_125, %c0_126] : memref<3x256x256xbf16, #tpu.memory_space<vmem>>, vector<1x256x256xbf16>
    %125 = vector.shape_cast %124 : vector<1x256x256xbf16> to vector<256x256xbf16>
    %cst_127 = arith.constant dense<0.000000e+00> : vector<16x256xf32>
    %126 = tpu.matmul %123, %125, %cst_127 {dimension_numbers = #tpu.dot_dimension_numbers<[1], [0], [0], [1], [0, 0, 1, 1], [], []>} : vector<16x256xbf16>, vector<256x256xbf16>, vector<16x256xf32> -> vector<16x256xf32>
    %127 = vector.broadcast %121 : vector<1x256xf32> to vector<16x256xf32>
    %128 = arith.addf %127, %126 : vector<16x256xf32>
    %c0_128 = arith.constant 0 : index
    %c4_129 = arith.constant 4 : index
    %c0_130 = arith.constant 0 : index
    %129 = vector.load %arg19[%c0_128, %c4_129, %c0_130] : memref<1x24x256xbf16, #tpu.memory_space<vmem>>, vector<1x16x256xbf16>
    %130 = vector.shape_cast %129 : vector<1x16x256xbf16> to vector<16x256xbf16>
    %c1_131 = arith.constant 1 : index
    %c0_132 = arith.constant 0 : index
    %c0_133 = arith.constant 0 : index
    %131 = vector.load %arg12[%c1_131, %c0_132, %c0_133] : memref<3x256x256xbf16, #tpu.memory_space<vmem>>, vector<1x256x256xbf16>
    %132 = vector.shape_cast %131 : vector<1x256x256xbf16> to vector<256x256xbf16>
    %cst_134 = arith.constant dense<0.000000e+00> : vector<16x256xf32>
    %133 = tpu.matmul %130, %132, %cst_134 {dimension_numbers = #tpu.dot_dimension_numbers<[1], [0], [0], [1], [0, 0, 1, 1], [], []>} : vector<16x256xbf16>, vector<256x256xbf16>, vector<16x256xf32> -> vector<16x256xf32>
    %134 = arith.addf %128, %133 : vector<16x256xf32>
    %c0_135 = arith.constant 0 : index
    %c8 = arith.constant 8 : index
    %c0_136 = arith.constant 0 : index
    %135 = vector.load %arg19[%c0_135, %c8, %c0_136] : memref<1x24x256xbf16, #tpu.memory_space<vmem>>, vector<1x16x256xbf16>
    %136 = vector.shape_cast %135 : vector<1x16x256xbf16> to vector<16x256xbf16>
    %c2_137 = arith.constant 2 : index
    %c0_138 = arith.constant 0 : index
    %c0_139 = arith.constant 0 : index
    %137 = vector.load %arg12[%c2_137, %c0_138, %c0_139] : memref<3x256x256xbf16, #tpu.memory_space<vmem>>, vector<1x256x256xbf16>
    %138 = vector.shape_cast %137 : vector<1x256x256xbf16> to vector<256x256xbf16>
    %cst_140 = arith.constant dense<0.000000e+00> : vector<16x256xf32>
    %139 = tpu.matmul %136, %138, %cst_140 {dimension_numbers = #tpu.dot_dimension_numbers<[1], [0], [0], [1], [0, 0, 1, 1], [], []>} : vector<16x256xbf16>, vector<256x256xbf16>, vector<16x256xf32> -> vector<16x256xf32>
    %140 = arith.addf %134, %139 : vector<16x256xf32>
    %cst_141 = arith.constant 0.000000e+00 : f32
    %141 = vector.broadcast %cst_141 : f32 to vector<16x256xf32>
    %142 = arith.maximumf %140, %141 : vector<16x256xf32>
    %143 = arith.truncf %142 : vector<16x256xf32> to vector<16x256xbf16>
    %144 = vector.shape_cast %143 : vector<16x256xbf16> to vector<1x16x256xbf16>
    %c0_142 = arith.constant 0 : index
    %c4_143 = arith.constant 4 : index
    %c0_144 = arith.constant 0 : index
    %145 = vector.load %arg19[%c0_142, %c4_143, %c0_144] : memref<1x24x256xbf16, #tpu.memory_space<vmem>>, vector<1x16x256xbf16>
    tpu.vector_store %arg19[%c0_142, %c4_143, %c0_144], %144 {strides = array<i32>} : memref<1x24x256xbf16, #tpu.memory_space<vmem>>, vector<1x16x256xbf16>,
    %c0_145 = arith.constant 0 : index
    %c0_146 = arith.constant 0 : index
    %146 = vector.load %arg15[%c0_145, %c0_146] : memref<1x256xf32, #tpu.memory_space<vmem>>, vector<1x256xf32>
    %c0_147 = arith.constant 0 : index
    %c0_148 = arith.constant 0 : index
    %c0_149 = arith.constant 0 : index
    %147 = vector.load %arg19[%c0_147, %c0_148, %c0_149] : memref<1x24x256xbf16, #tpu.memory_space<vmem>>, vector<1x16x256xbf16>
    %148 = vector.shape_cast %147 : vector<1x16x256xbf16> to vector<16x256xbf16>
    %c0_150 = arith.constant 0 : index
    %c0_151 = arith.constant 0 : index
    %c0_152 = arith.constant 0 : index
    %149 = vector.load %arg14[%c0_150, %c0_151, %c0_152] : memref<3x256x256xbf16, #tpu.memory_space<vmem>>, vector<1x256x256xbf16>
    %150 = vector.shape_cast %149 : vector<1x256x256xbf16> to vector<256x256xbf16>
    %cst_153 = arith.constant dense<0.000000e+00> : vector<16x256xf32>
    %151 = tpu.matmul %148, %150, %cst_153 {dimension_numbers = #tpu.dot_dimension_numbers<[1], [0], [0], [1], [0, 0, 1, 1], [], []>} : vector<16x256xbf16>, vector<256x256xbf16>, vector<16x256xf32> -> vector<16x256xf32>
    %152 = vector.broadcast %146 : vector<1x256xf32> to vector<16x256xf32>
    %153 = arith.addf %152, %151 : vector<16x256xf32>
    %c0_154 = arith.constant 0 : index
    %c4_155 = arith.constant 4 : index
    %c0_156 = arith.constant 0 : index
    %154 = vector.load %arg19[%c0_154, %c4_155, %c0_156] : memref<1x24x256xbf16, #tpu.memory_space<vmem>>, vector<1x16x256xbf16>
    %155 = vector.shape_cast %154 : vector<1x16x256xbf16> to vector<16x256xbf16>
    %c1_157 = arith.constant 1 : index
    %c0_158 = arith.constant 0 : index
    %c0_159 = arith.constant 0 : index
    %156 = vector.load %arg14[%c1_157, %c0_158, %c0_159] : memref<3x256x256xbf16, #tpu.memory_space<vmem>>, vector<1x256x256xbf16>
    %157 = vector.shape_cast %156 : vector<1x256x256xbf16> to vector<256x256xbf16>
    %cst_160 = arith.constant dense<0.000000e+00> : vector<16x256xf32>
    %158 = tpu.matmul %155, %157, %cst_160 {dimension_numbers = #tpu.dot_dimension_numbers<[1], [0], [0], [1], [0, 0, 1, 1], [], []>} : vector<16x256xbf16>, vector<256x256xbf16>, vector<16x256xf32> -> vector<16x256xf32>
    %159 = arith.addf %153, %158 : vector<16x256xf32>
    %c0_161 = arith.constant 0 : index
    %c8_162 = arith.constant 8 : index
    %c0_163 = arith.constant 0 : index
    %160 = vector.load %arg19[%c0_161, %c8_162, %c0_163] : memref<1x24x256xbf16, #tpu.memory_space<vmem>>, vector<1x16x256xbf16>
    %161 = vector.shape_cast %160 : vector<1x16x256xbf16> to vector<16x256xbf16>
    %c2_164 = arith.constant 2 : index
    %c0_165 = arith.constant 0 : index
    %c0_166 = arith.constant 0 : index
    %162 = vector.load %arg14[%c2_164, %c0_165, %c0_166] : memref<3x256x256xbf16, #tpu.memory_space<vmem>>, vector<1x256x256xbf16>
    %163 = vector.shape_cast %162 : vector<1x256x256xbf16> to vector<256x256xbf16>
    %cst_167 = arith.constant dense<0.000000e+00> : vector<16x256xf32>
    %164 = tpu.matmul %161, %163, %cst_167 {dimension_numbers = #tpu.dot_dimension_numbers<[1], [0], [0], [1], [0, 0, 1, 1], [], []>} : vector<16x256xbf16>, vector<256x256xbf16>, vector<16x256xf32> -> vector<16x256xf32>
    %165 = arith.addf %159, %164 : vector<16x256xf32>
    %cst_168 = arith.constant 0.000000e+00 : f32
    %166 = vector.broadcast %cst_168 : f32 to vector<16x256xf32>
    %167 = arith.maximumf %165, %166 : vector<16x256xf32>
    %168 = arith.addf %167, %117 : vector<16x256xf32>
    %cst_169 = arith.constant 0.000000e+00 : f32
    %169 = vector.broadcast %cst_169 : f32 to vector<16x256xf32>
    %170 = arith.maximumf %168, %169 : vector<16x256xf32>
    %171 = vector.shape_cast %170 : vector<16x256xf32> to vector<1x16x256xf32>
    %cst_170 = arith.constant dense<0.000000e+00> : vector<1x256xf32>
    %172 = vector.multi_reduction <add>, %171, %cst_170 [1] : vector<1x16x256xf32> to vector<1x256xf32>
    %cst_171 = arith.constant 6.250000e-02 : f32
    %173 = vector.broadcast %cst_171 : f32 to vector<1x256xf32>
    %174 = arith.mulf %172, %173 : vector<1x256xf32>
    %c0_172 = arith.constant 0 : index
    %c0_173 = arith.constant 0 : index
    %175 = vector.load %arg16[%c0_172, %c0_173] : memref<256x128xf32, #tpu.memory_space<vmem>>, vector<256x128xf32>
    %cst_174 = arith.constant dense<0.000000e+00> : vector<1x128xf32>
    %176 = tpu.matmul %174, %175, %cst_174 {dimension_numbers = #tpu.dot_dimension_numbers<[1], [0], [0], [1], [0, 0, 1, 1], [], []>} : vector<1x256xf32>, vector<256x128xf32>, vector<1x128xf32> -> vector<1x128xf32>
    %c0_175 = arith.constant 0 : index
    %c0_176 = arith.constant 0 : index
    %177 = vector.load %arg17[%c0_175, %c0_176] : memref<1x128xf32, #tpu.memory_space<vmem>>, vector<1x128xf32>
    %178 = arith.addf %176, %177 : vector<1x128xf32>
    %cst_177 = arith.constant dense<0xFF800000> : vector<1xf32>
    %179 = vector.multi_reduction <maximumf>, %178, %cst_177 [1] : vector<1x128xf32> to vector<1xf32>
    %180 = vector.shape_cast %179 : vector<1xf32> to vector<1x1xf32>
    %181 = vector.broadcast %180 : vector<1x1xf32> to vector<1x128xf32>
    %182 = arith.subf %178, %181 : vector<1x128xf32>
    %183 = math.exp %182 : vector<1x128xf32>
    %cst_178 = arith.constant dense<0.000000e+00> : vector<1xf32>
    %184 = vector.multi_reduction <add>, %183, %cst_178 [1] : vector<1x128xf32> to vector<1xf32>
    %185 = vector.shape_cast %184 : vector<1xf32> to vector<1x1xf32>
    %186 = vector.broadcast %185 : vector<1x1xf32> to vector<1x128xf32>
    %187 = arith.divf %183, %186 : vector<1x128xf32>
    %c0_179 = arith.constant 0 : index
    %c0_180 = arith.constant 0 : index
    %c0_181 = arith.constant 0 : index
    %188 = vector.load %arg18[%c0_179, %c0_180, %c0_181] : memref<1x1x128xf32, #tpu.memory_space<vmem>>, vector<1x1x128xf32>
    %189 = vector.shape_cast %188 : vector<1x1x128xf32> to vector<1x128xf32>
    %190 = vector.shape_cast %187 : vector<1x128xf32> to vector<1x1x128xf32>
    tpu.vector_store %arg18[%c0_179, %c0_180, %c0_181], %190 {strides = array<i32>} : memref<1x1x128xf32, #tpu.memory_space<vmem>>, vector<1x1x128xf32>,
    return
  }
  func.func @transform_0(%arg0: i32) -> (i32, i32, i32) {
    %c0_i32 = arith.constant 0 : i32
    %c0_i32_0 = arith.constant 0 : i32
    %c0_i32_1 = arith.constant 0 : i32
    return %arg0, %c0_i32, %c0_i32_0 : i32, i32, i32
  }
  func.func @transform_1(%arg0: i32) -> (i32, i32, i32) {
    %c0_i32 = arith.constant 0 : i32
    %c0_i32_0 = arith.constant 0 : i32
    %c0_i32_1 = arith.constant 0 : i32
    %c0_i32_2 = arith.constant 0 : i32
    return %c0_i32, %c0_i32_0, %c0_i32_1 : i32, i32, i32
  }
  func.func @transform_2(%arg0: i32) -> (i32, i32) {
    %c0_i32 = arith.constant 0 : i32
    %c0_i32_0 = arith.constant 0 : i32
    %c0_i32_1 = arith.constant 0 : i32
    return %c0_i32, %c0_i32_0 : i32, i32
  }
  func.func @transform_3(%arg0: i32) -> (i32, i32, i32) {
    %c0_i32 = arith.constant 0 : i32
    %c0_i32_0 = arith.constant 0 : i32
    %c0_i32_1 = arith.constant 0 : i32
    %c0_i32_2 = arith.constant 0 : i32
    return %c0_i32, %c0_i32_0, %c0_i32_1 : i32, i32, i32
  }
  func.func @transform_4(%arg0: i32) -> (i32, i32) {
    %c0_i32 = arith.constant 0 : i32
    %c0_i32_0 = arith.constant 0 : i32
    %c0_i32_1 = arith.constant 0 : i32
    return %c0_i32, %c0_i32_0 : i32, i32
  }
  func.func @transform_5(%arg0: i32) -> (i32, i32, i32) {
    %c0_i32 = arith.constant 0 : i32
    %c0_i32_0 = arith.constant 0 : i32
    %c0_i32_1 = arith.constant 0 : i32
    %c0_i32_2 = arith.constant 0 : i32
    return %c0_i32, %c0_i32_0, %c0_i32_1 : i32, i32, i32
  }
  func.func @transform_6(%arg0: i32) -> (i32, i32) {
    %c0_i32 = arith.constant 0 : i32
    %c0_i32_0 = arith.constant 0 : i32
    %c0_i32_1 = arith.constant 0 : i32
    return %c0_i32, %c0_i32_0 : i32, i32
  }
  func.func @transform_7(%arg0: i32) -> (i32, i32, i32) {
    %c0_i32 = arith.constant 0 : i32
    %c0_i32_0 = arith.constant 0 : i32
    %c0_i32_1 = arith.constant 0 : i32
    %c0_i32_2 = arith.constant 0 : i32
    return %c0_i32, %c0_i32_0, %c0_i32_1 : i32, i32, i32
  }
  func.func @transform_8(%arg0: i32) -> (i32, i32) {
    %c0_i32 = arith.constant 0 : i32
    %c0_i32_0 = arith.constant 0 : i32
    %c0_i32_1 = arith.constant 0 : i32
    return %c0_i32, %c0_i32_0 : i32, i32
  }
  func.func @transform_9(%arg0: i32) -> (i32, i32) {
    %c0_i32 = arith.constant 0 : i32
    %c0_i32_0 = arith.constant 0 : i32
    %c0_i32_1 = arith.constant 0 : i32
    return %c0_i32, %c0_i32_0 : i32, i32
  }
  func.func @transform_10(%arg0: i32) -> (i32, i32) {
    %c0_i32 = arith.constant 0 : i32
    %c0_i32_0 = arith.constant 0 : i32
    %c0_i32_1 = arith.constant 0 : i32
    return %c0_i32, %c0_i32_0 : i32, i32
  }
  func.func @transform_11(%arg0: i32) -> (i32, i32, i32) {
    %c0_i32 = arith.constant 0 : i32
    %c0_i32_0 = arith.constant 0 : i32
    %c0_i32_1 = arith.constant 0 : i32
    %c0_i32_2 = arith.constant 0 : i32
    return %c0_i32, %c0_i32_0, %c0_i32_1 : i32, i32, i32
  }
  func.func @transform_12(%arg0: i32) -> (i32, i32) {
    %c0_i32 = arith.constant 0 : i32
    %c0_i32_0 = arith.constant 0 : i32
    %c0_i32_1 = arith.constant 0 : i32
    return %c0_i32, %c0_i32_0 : i32, i32
  }
  func.func @transform_13(%arg0: i32) -> (i32, i32, i32) {
    %c0_i32 = arith.constant 0 : i32
    %c0_i32_0 = arith.constant 0 : i32
    %c0_i32_1 = arith.constant 0 : i32
    %c0_i32_2 = arith.constant 0 : i32
    return %c0_i32, %c0_i32_0, %c0_i32_1 : i32, i32, i32
  }
  func.func @transform_14(%arg0: i32) -> (i32, i32) {
    %c0_i32 = arith.constant 0 : i32
    %c0_i32_0 = arith.constant 0 : i32
    %c0_i32_1 = arith.constant 0 : i32
    return %c0_i32, %c0_i32_0 : i32, i32
  }
  func.func @transform_15(%arg0: i32) -> (i32, i32) {
    %c0_i32 = arith.constant 0 : i32
    %c0_i32_0 = arith.constant 0 : i32
    %c0_i32_1 = arith.constant 0 : i32
    return %c0_i32, %c0_i32_0 : i32, i32
  }
  func.func @transform_16(%arg0: i32) -> (i32, i32) {
    %c0_i32 = arith.constant 0 : i32
    %c0_i32_0 = arith.constant 0 : i32
    %c0_i32_1 = arith.constant 0 : i32
    return %c0_i32, %c0_i32_0 : i32, i32
  }
  func.func @transform_17(%arg0: i32) -> (i32, i32, i32) {
    %c0_i32 = arith.constant 0 : i32
    %c0_i32_0 = arith.constant 0 : i32
    %c0_i32_1 = arith.constant 0 : i32
    return %arg0, %c0_i32, %c0_i32_0 : i32, i32, i32
  }
}

</mosaic_0001>

<bundles_post_ra>
// kernel: tcn_forward.1
= control target key start
LH: loop header
LB: loop body
LE: loop exit
PB: predicated region body
PF: predicated region fallthrough
CT: control target
= control target key end

     0   :  { %s6800_s0 = inlined_call_operand.vmem [shape: f32[2,16,6], index: 0, kind: input, shape index: {}]   ;;  %s6801_s1 = inlined_call_operand.vmem [shape: bf16[3,6,256], index: 1, kind: input, shape index: {}]   ;;  %s6802_s2 = inlined_call_operand.vmem [shape: f32[1,256], index: 2, kind: input, shape index: {}]   ;;  %s6803_s3 = inlined_call_operand.hbm [shape: bf16[3,128,128], index: 3, kind: input, shape index: {}]   ;;  %s6804_s4 = inlined_call_operand.vmem [shape: f32[1,128], index: 4, kind: input, shape index: {}]   ;;  %s6805_s5 = inlined_call_operand.hbm [shape: bf16[3,128,256], index: 5, kind: input, shape index: {}]   ;;  %s6806_s6 = inlined_call_operand.vmem [shape: f32[1,256], index: 6, kind: input, shape index: {}]   ;;  %s6807_s7 = inlined_call_operand.hbm [shape: bf16[3,256,256], index: 7, kind: input, shape index: {}]   ;;  %s6808_s8 = inlined_call_operand.vmem [shape: f32[1,256], index: 8, kind: input, shape index: {}]   ;;  %s6809_s9 = inlined_call_operand.hbm [shape: bf16[128,256], index: 9, kind: input, shape index: {}]   ;;  %s6810_s10 = inlined_call_operand.vmem [shape: f32[1,256], index: 10, kind: input, shape index: {}]   ;;  %s6811_s11 = inlined_call_operand.hbm [shape: bf16[3,256,256], index: 11, kind: input, shape index: {}]   ;;  %s6812_s12 = inlined_call_operand.vmem [shape: f32[1,256], index: 12, kind: input, shape index: {}]   ;;  %s6813_s13 = inlined_call_operand.hbm [shape: bf16[3,256,256], index: 13, kind: input, shape index: {}]   ;;  %s6814_s14 = inlined_call_operand.vmem [shape: f32[1,256], index: 14, kind: input, shape index: {}]   ;;  %s6815_s15 = inlined_call_operand.hbm [shape: f32[256,128], index: 15, kind: input, shape index: {}]   ;;  %s6816_s16 = inlined_call_operand.vmem [shape: f32[1,128], index: 16, kind: input, shape index: {}]   ;;  %s6817_s17 = inlined_call_operand.hbm [shape: f32[2,1,128], index: 17, kind: output, shape index: {}]  }
   0x1   :  { %6831 = sst [smem:[#allocation27_spill]] %s6800_s0 }
   0x2   :  { %6832 = sst [smem:[#allocation28_spill]] %s6801_s1 }
   0x3   :  { %6833 = sst [smem:[#allocation29_spill]] %s6802_s2 }
   0x4   :  { %6834 = sst [smem:[#allocation30_spill]] %s6805_s5 }
   0x5   :  { %6835 = sst [smem:[#allocation31_spill]] %s6817_s17 }
   0x6   :  { %22 = vsyncpa [#allocation4], 0 }
   0x7   :  { %23 = vsyncpa [#allocation7], 0 }
   0x8   :  { %24 = vsyncpa [#allocation10], 0 }
   0x9   :  { %25 = vsyncpa [#allocation13], 0 }
   0xa   :  { %26 = vsyncpa [#allocation5], 0 }
   0xb   :  { %28 = vsyncpa [#allocation5 + $0x1], 0  ;;  %s6382_s24 = smov 0   ;;  %s6384_s25 = smov 0  }
   0xc   :  { %s6386_s26 = smov 0   ;;  %s6388_s27 = smov 0  }
   0xd LB: > { %6836 = sst [smem:[#allocation21_spill]] %s6263_s24  ;;  %s6403_s28 = sadd.s32 4294967295, %s6275_s27   ;;  %s6275_s27 = sphi %s6388_s27, %s6870_s27   ;;  %s6271_s26 = sphi %s6386_s26, %s6872_s26   ;;  %s6267_s25 = sphi %s6384_s25, %s6874_s25   ;;  %s6263_s24 = sphi %s6382_s24, %s6873_s24  }
   0xe   : > { %6837 = sst [smem:[#allocation22_spill]] %s6271_s26  ;;  %s4712_s29 = sadd.s32 4294967294, %s6275_s27  }
   0xf   : > { %6838 = sst [smem:[#allocation23_spill]] %s6275_s27  ;;  %s6407_s0 = sadd.s32 1, %s6275_s27  }
  0x10   : > { %6839 = sst [smem:[#allocation24_spill]] %s6407_s0  ;;  %s403_s30 = sadd.s32 1, %s6271_s26 }
  0x11   : > { %s400_s18 = ssub.s32 %s6275_s27, %s6407_s0  ;;  %p413_p0 = scmp.ne.s32.totalorder %s6271_s26, %s6267_s25 }
  0x12   : > { %p401_p1 = scmp.eq.s32.totalorder %s400_s18, 0  ;;  %p414_p2 = scmp.eq.s32.totalorder %s6403_s28, 1 }
  0x13   : > { %p419_p3 = scmp.ne.s32.totalorder %s6267_s25, %s6263_s24  ;;  %p420_p4 = scmp.eq.s32.totalorder %s4712_s29, 1 }
  0x14   : > { %s6418_s19 = scalar_select %p401_p1, %s6271_s26, %s403_s30  }
  0x15   : > { %p6420_p5 = por %p414_p2, %p413_p0  ;;  %p6424_p6 = por %p420_p4, %p419_p3 }
  0x16   : > { %6840 = sst [smem:[#allocation25_spill]] %s6418_s19  ;;  %p4713_p7 = scmp.ge.s32.totalorder %s6275_s27, 1 }
  0x17   : > { %s6842_s20 = scalar_select %p6424_p6, 1, 0 }
  0x18   : > { %p427_p8 = scmp.lt.s32.totalorder %s6275_s27, 3  ;;  %p6826_p9 = scmp.eq.s32.totalorder %s6403_s28, 0 }
  0x19   : > { %6843 = sst [smem:[#allocation26_spill]] %s6842_s20  ;;  %s6277_s22 = smov [#allocation6]  }
  0x1a   : > { %p6431_p10 = pnand %p4713_p7, %p427_p8  ;;  %s461_s23 = sshll.u32 %s6277_s22, 4  ;;  %s462_s23 = int_to_ptr.vmem [resolvable:$true] %s461_s23 }
  0x1b   : > { %s6278_s30 = smov [#allocation9]   ;;  %s6279_s19 = smov [#allocation12]  }
  0x1c   : > { %p5345_p11 = pneg %p6431_p10  ;;  %s493_s18 = sshll.u32 %s6278_s30, 4  ;;  %s494_s18 = int_to_ptr.vmem [resolvable:$true] %s493_s18 }
  0x1d   : > { %s525_s26 = sshll.u32 %s6279_s19, 4  ;;  %s6028_s22 = scalar_lea.vmem %s462_s23, 6144  ;;  %s526_s26 = int_to_ptr.vmem [resolvable:$true] %s525_s26 }
  0x1e   : > { %p6439_p12 = pnand %p6826_p9, %p5345_p11  ;;  %p6029_p0 = scmp.ne.s32.totalorder %s462_s23, %s6028_s22 }
  0x1f   : > { %p6036_p3 = scmp.lt.s32.totalorder %s462_s23, %s462_s23  ;;  %p6037_p4 = scmp.lt.s32.totalorder %s6028_s22, %s6028_s22 }
  0x20   : > { %p6445_p13 = pneg %p6439_p12 }
  0x21   : > { %p6038_p7 = por %p6037_p4, %p6036_p3 }
  0x22   : > { %p6031_p1 = pnand %p6029_p0, %p6445_p13 }
  0x24   : > { %p6032_p2 = pneg %p6031_p1 }
  0x26   : > { %p6039_p8 = pnand %p6038_p7, %p6032_p2 }
  0x28   : > { %6042 = shalt.err (!%p6039_p8)
}
  0x29   : > { %s6827_s30 = smov 128   ;;  %s6829_s19 = smov 8  }
  0x2a   : > { %s6847_s5 = sld [smem:[#allocation30_spill]]  ;;  %s6054_s27 = scalar_lea.vmem %s494_s18, 2048 }
  0x2b   : > { %p6055_p11 = scmp.ne.s32.totalorder %s494_s18, %s6054_s27  ;;  %p6062_p3 = scmp.lt.s32.totalorder %s494_s18, %s494_s18 }
  0x2c   : > { %p6063_p2 = scmp.lt.s32.totalorder %s6054_s27, %s6054_s27 }
  0x2d   : > { %p6057_p0 = pnand %p6055_p11, %p6445_p13 }
  0x2e   : > { %p6064_p4 = por %p6063_p2, %p6062_p3 }
  0x2f   : > { %p6058_p1 = pneg %p6057_p0 }
  0x30   : > { %5351 = dma.hbm_to_vmem [thread:$0]  (!%p6439_p12), %s6847_s5, 6144, %s462_s23, [#allocation7], %s6827_s30, %s6827_s30, %s6829_s19  }
  0x31   : > { %p6065_p7 = pnand %p6064_p4, %p6058_p1 }
  0x33   : > { %6068 = shalt.err (!%p6065_p7)
}
  0x34   : > { %5357 = dma.hbm_to_vmem [thread:$0]  (!%p6439_p12), %s6809_s9, 2048, %s494_s18, [#allocation10], %s6827_s30, %s6827_s30, %s6829_s19  }
  0x35   : > { %s6080_s24 = scalar_lea.vmem %s526_s26, 12288  ;;  %p6088_p9 = scmp.lt.s32.totalorder %s526_s26, %s526_s26 }
  0x36   : > { %p6081_p8 = scmp.ne.s32.totalorder %s526_s26, %s6080_s24  ;;  %p6089_p3 = scmp.lt.s32.totalorder %s6080_s24, %s6080_s24 }
  0x38   : > { %p6083_p11 = pnand %p6081_p8, %p6445_p13  ;;  %p6090_p1 = por %p6089_p3, %p6088_p9 }
  0x3a   : > { %p6084_p0 = pneg %p6083_p11 }
  0x3c   : > { %p6091_p2 = pnand %p6090_p1, %p6084_p0 }
  0x3e   : > { %6094 = shalt.err (!%p6091_p2)
}
  0x3f   : > { %5363 = dma.hbm_to_vmem [thread:$0]  (!%p6439_p12), %s6813_s13, 12288, %s526_s26, [#allocation13], %s6827_s30, %s6827_s30, %s6829_s19  }
  0x40   : > { %s6282_s20 = smov [#allocation3]  }
  0x41   : > { %s445_s23 = sshll.u32 %s6282_s20, 4  ;;  %s446_s23 = int_to_ptr.vmem [resolvable:$true] %s445_s23 }
  0x42   : > { %s6106_s18 = scalar_lea.vmem %s446_s23, 3072  ;;  %p6114_p8 = scmp.lt.s32.totalorder %s446_s23, %s446_s23 }
  0x43   : > { %p6107_p4 = scmp.ne.s32.totalorder %s446_s23, %s6106_s18  ;;  %p6115_p11 = scmp.lt.s32.totalorder %s6106_s18, %s6106_s18 }
  0x45   : > { %p6109_p7 = pnand %p6107_p4, %p6445_p13  ;;  %p6116_p0 = por %p6115_p11, %p6114_p8 }
  0x47   : > { %p6110_p9 = pneg %p6109_p7 }
  0x49   : > { %p6117_p3 = pnand %p6116_p0, %p6110_p9 }
  0x4b   : > { %6120 = shalt.err (!%p6117_p3)
}
  0x4c   : > { %s6283_s22 = smov 64   ;;  %s6284_s24 = smov 4  }
  0x4d   : > { %5348 = dma.hbm_to_vmem [thread:$0]  (!%p6439_p12), %s6803_s3, 3072, %s446_s23, [#allocation4], %s6283_s22, %s6283_s22, %s6284_s24  }
  0x4e   : > { %s6285_s17 = smov [#allocation8]   ;;  %s6286_s30 = smov [#allocation11]  }
  0x4f   : > { %s477_s20 = sshll.u32 %s6285_s17, 4  ;;  %s509_s19 = sshll.u32 %s6286_s30, 4  ;;  %s478_s20 = int_to_ptr.vmem [resolvable:$true] %s477_s20  ;;  %s510_s19 = int_to_ptr.vmem [resolvable:$true] %s509_s19 }
  0x50   : > { %s6132_s5 = scalar_lea.vmem %s478_s20, 12288  ;;  %p6140_p7 = scmp.lt.s32.totalorder %s478_s20, %s478_s20 }
  0x51   : > { %p6133_p1 = scmp.ne.s32.totalorder %s478_s20, %s6132_s5  ;;  %p6141_p9 = scmp.lt.s32.totalorder %s6132_s5, %s6132_s5 }
  0x53   : > { %p6135_p2 = pnand %p6133_p1, %p6445_p13  ;;  %p6142_p8 = por %p6141_p9, %p6140_p7 }
  0x55   : > { %p6136_p4 = pneg %p6135_p2 }
  0x57   : > { %p6143_p11 = pnand %p6142_p8, %p6136_p4 }
  0x59   : > { %6146 = shalt.err (!%p6143_p11)
}
  0x5a   : > { %s6848_s18 = smov 8   ;;  %s6849_s23 = smov 128  }
  0x5b   : > { %5354 = dma.hbm_to_vmem [thread:$0]  (!%p6439_p12), %s6807_s7, 12288, %s478_s20, [#allocation7], %s6849_s23, %s6849_s23, %s6848_s18  }
  0x5c   : > { %s6158_s30 = scalar_lea.vmem %s510_s19, 12288  ;;  %p6166_p2 = scmp.lt.s32.totalorder %s510_s19, %s510_s19 }
  0x5d   : > { %p6159_p0 = scmp.ne.s32.totalorder %s510_s19, %s6158_s30  ;;  %p6167_p6 = scmp.lt.s32.totalorder %s6158_s30, %s6158_s30 }
  0x5f   : > { %p6161_p3 = pnand %p6159_p0, %p6445_p13  ;;  %p6168_p7 = por %p6167_p6, %p6166_p2 }
  0x61   : > { %p6162_p1 = pneg %p6161_p3 }
  0x63   : > { %p6169_p4 = pnand %p6168_p7, %p6162_p1 }
  0x65   : > { %6172 = shalt.err (!%p6169_p4)
}
  0x66   : > { %5360 = dma.hbm_to_vmem [thread:$0]  (!%p6439_p12), %s6811_s11, 12288, %s510_s19, [#allocation10], %s6849_s23, %s6849_s23, %s6848_s18  }
  0x67   : > { %s6287_s26 = smov [#allocation14]  }
  0x68   : > { %s541_s17 = sshll.u32 %s6287_s26, 4  ;;  %s542_s17 = int_to_ptr.vmem [resolvable:$true] %s541_s17 }
  0x69   : > { %s6184_s20 = scalar_lea.vmem %s542_s17, 4096  ;;  %p6192_p11 = scmp.lt.s32.totalorder %s542_s17, %s542_s17 }
  0x6a   : > { %p6185_p9 = scmp.ne.s32.totalorder %s542_s17, %s6184_s20  ;;  %p6193_p0 = scmp.lt.s32.totalorder %s6184_s20, %s6184_s20 }
  0x6c   : > { %p6187_p8 = pnand %p6185_p9, %p6445_p13  ;;  %p6194_p3 = por %p6193_p0, %p6192_p11 }
  0x6e   : > { %p6188_p6 = pneg %p6187_p8 }
  0x70   : > { %p6195_p1 = pnand %p6194_p3, %p6188_p6 }
  0x72   : > { %6198 = shalt.err (!%p6195_p1)
}
  0x73   : > { %5366 = dma.hbm_to_vmem [thread:$0]  (!%p6439_p12), %s6815_s15, 4096, %s542_s17, [#allocation13], %s6849_s23, %s6849_s23, %s6848_s18  }
  0x74   : > { %568 = sbr.rel (%p6431_p10) target bundleno = 2279 (0x8e7), region = 88  ;;  %p6850_p13 = scmp.eq.s32.totalorder (!%p6431_p10), %s6403_s28, 0 }
  0x79   : > { %6242 = dma.done.wait (%p6850_p13), [#allocation4], 3072   ;;  %p6851_p2 = pmov %p6850_p13 }
  0x7b   : > { %6244 = vsyncadd (%p6851_p2), [#allocation4], 4294964224  ;;  %p6852_p7 = pmov %p6851_p2 }
  0x7c   : > { %p6853_p4 = pmov %p6851_p2 }
  0x7d   : > { %6246 = dma.done.wait (%p6852_p7), [#allocation7], 18432  }
  0x7e   : > { %6248 = vsyncadd (%p6853_p4), [#allocation7], 4294948864  ;;  %p6854_p9 = pmov %p6851_p2 }
  0x7f   : > { %p6855_p12 = pmov %p6851_p2 }
  0x80   : > { %6250 = dma.done.wait (%p6854_p9), [#allocation10], 14336  }
  0x81   : > { %6252 = vsyncadd (%p6855_p12), [#allocation10], 4294952960  ;;  %p6856_p10 = pmov %p6851_p2 }
  0x82   : > { %p6857_p8 = pmov %p6851_p2 }
  0x83   : > { %6254 = dma.done.wait (%p6856_p10), [#allocation13], 16384  }
  0x84   : > { %6256 = vsyncadd (%p6857_p8), [#allocation13], 4294950912  ;;  %p643_p6 = scmp.lt.s32.totalorder %s6403_s28, 1  ;;  %v6288_v0 = vmov 0   ;;  %s6858_s23 = sld [smem:[#allocation27_spill]]  ;;  %vm716_vm0 = vcmask 1042432  }
  0x85   : > { %649 = vst [vmem:[#allocation2] sm:$0x33] %v6288_v0  ;;  %650 = vst [vmem:[#allocation2 + $0x10] sm:$0xcc] %v6288_v0  ;;  %755 = vmatprep.mubr.bf16.mxu1 %v6288_v0  ;;  %922 = vmatprep.mubr.bf16.mxu0 %v6288_v0  ;;  %vm659_vm1 = vcmask 1041408   ;;  %vm660_vm2 = vcmask 1045508  }
  0x86   : > { %s644_s0 = scalar_select %p643_p6, %s6403_s28, 1  ;;  %vm670_vm3 = vcmask 44034   ;;  %vm672_vm4 = vcmask 44032   ;;  %vm6556_vm5 = vmor %vm659_vm1, %vm660_vm2  ;;  %vm674_vm6 = vcmask 41984   ;;  %vm689_vm7 = vsmask.f32 6400 }
  0x87   : > { %s6859_s27 = sld [smem:[#allocation28_spill]]  ;;  %vm858_vm8 = vsmask.f32 5376  ;;  %vm712_vm9 = vcmask 48128   ;;  %vm787_vm10 = vcmask 1045504   ;;  %v5441_v55 = vld [vmem:[#allocation3 + $0x78] sm:$0xff]  }
  0x88   : > { %s5180_s21 = sshll.u32 %s644_s0, 4  ;;  %v6289_v56 = vmov 0.0   ;;  %v5442_v57 = vld [vmem:[#allocation3 + $0x38] sm:$0xff]   ;;  %v5443_v58 = vld [vmem:[#allocation3 + $0x70] sm:$0xff]   ;;  %v5445_v60 = vld [vmem:[#allocation3 + $0x68] sm:$0xff]   ;;  %vm6290_vm11 = vmmov 0  }
  0x89   : > { %v5444_v59 = vld [vmem:[#allocation3 + $0x30] sm:$0xff]   ;;  %v5446_v61 = vld [vmem:[#allocation3 + $0x28] sm:$0xff]   ;;  %v5447_v62 = vld [vmem:[#allocation3 + $0x60] sm:$0xff]   ;;  %s6863_s2 = sld [smem:[#allocation29_spill]]  ;;  %vm1547_vm12 = vcmask 1046528   ;;  %vm1871_vm13 = vcmask 1044480  }
  0x8a   : > { %s647_s24 = scalar_lea.vmem %s6858_s23, %s5180_s21  ;;  %v5448_v63 = vld [vmem:[#allocation3 + $0x20] sm:$0xff]   ;;  %vm4562_vm14 = vcmask 1040384   ;;  %s641_s18 = sand.u32 1, %s6267_s25  }
  0x8b   : > { %v651_v3 = vld [vmem:[%s647_s24] sm:$0xff]  ;;  %v652_v7 = vld [vmem:[%s647_s24 + $0x8] sm:$0xff]  ;;  %s5177_s23 = sshll.u32 %s6403_s28, 4  ;;  %s642_s24 = scalar_lea.vmem [#allocation15], %s641_s18 }
  0x8c   : > { %v5181_v8 = vpack.c.bf16 %v651_v3, %v651_v3  ;;  %v5182_v10 = vpack.c.bf16 %v652_v7, %v652_v7  ;;  %v5451_v3 = vld [vmem:[#allocation3 + $0x50] sm:$0xff]   ;;  %v5455_v7 = vld [vmem:[#allocation3 + $0x40] sm:$0xff]   ;;  %s4588_s30 = sshll.u32 %s642_s24, 4  ;;  %s6864_s26 = sld [smem:[#allocation31_spill]]  ;;  %s4589_s30 = int_to_ptr.vmem [resolvable:$true] %s4588_s30 }
  0x8d   : > { %s6860_s17 = smov %s6859_s27  ;;  %v680_v1 = vld [vmem:[%s6859_s27] sm:$0x77]  ;;  %s4576_s19 = scalar_lea.sflag [#allocation5], %s641_s18 }
  0x8e   : > { %v4740_v2 = vld [vmem:[%s6860_s17 + $0x8] sm:$0x77]  ;;  %v4737_v4 = vcombine.high %v680_v1, %v680_v1  ;;  %v4736_v5 = vcombine.low %v680_v1, %v680_v1  ;;  %v4746_v9 = vld [vmem:[%s6860_s17 + $0x10] sm:$0x77]  ;;  %v662_v14 = vrot.slane %v5181_v8, 6  ;;  %v664_v16 = vrot.slane %v5182_v10, 6 }
  0x8f   : > { %v4743_v6 = vcombine.high %v4740_v2, %v4740_v2  ;;  %v4749_v11 = vcombine.high %v4746_v9, %v4746_v9  ;;  %v4748_v12 = vcombine.low %v4746_v9, %v4746_v9  ;;  %v4742_v28 = vcombine.low %v4740_v2, %v4740_v2  ;;  %v5449_v1 = vld [vmem:[#allocation3 + $0x58] sm:$0xff]   ;;  %v5456_v8 = vld [vmem:[#allocation3] sm:$0xff]   ;;  %s6199_s0 = scalar_lea.vmem %s4589_s30, 16  ;;  %s6291_s21 = smov [#allocation15]  }
  0x90   : > { %4738 = vmatprep.subr.msk.bf16.mxu1 %vm716_vm0, %v4737_v4  ;;  %v718_v13 = vsel %vm716_vm0, %v4736_v5, 0  ;;  %v663_v18 = vrot.slane %v662_v14, 4  ;;  %671 = vst.msk [vmem:[#allocation2] sm:$0xc] %vm670_vm3, %v662_v14  ;;  %v666_v19 = vrot.slane %v664_v16, 4  ;;  %v5450_v2 = vld [vmem:[#allocation3 + $0x18] sm:$0xff]   ;;  %v767_v9 = vlaneseq  ;;  %p6200_p11 = scmp.ne.s32.totalorder %s4589_s30, %s6199_s0 }
  0x91   : > { %738 = vmatpush1.bf16.msra.mxu1 %v718_v13  ;;  %4750 = vmatprep.subr.msk.bf16.mxu0 %vm716_vm0, %v4749_v11  ;;  %v885_v17 = vsel %vm716_vm0, %v4748_v12, 0  ;;  %v800_v47 = vsel %vm716_vm0, %v4742_v28, 0  ;;  %v5452_v4 = vld [vmem:[#allocation3 + $0x10] sm:$0xff]   ;;  %v5453_v5 = vld [vmem:[#allocation3 + $0x48] sm:$0xff]   ;;  %s6203_s29 = sshll.u32 %s6291_s21, 4  ;;  %s6204_s29 = int_to_ptr.vmem [resolvable:$false] %s6203_s29 }
  0x92   : > { %4744 = vmatprep.subr.msk.bf16.mxu1 %vm716_vm0, %v4743_v6  ;;  %905 = vmatpush1.bf16.msra.mxu0 %v885_v17  ;;  %v665_v20 = vsel %vm6556_vm5, %v663_v18, %v664_v16  ;;  %675 = vst.msk [vmem:[#allocation2 + $0x10] sm:$0x3] %vm674_vm6, %v666_v19  ;;  %v5454_v6 = vld [vmem:[#allocation3 + $0x8] sm:$0xff]   ;;  %v768_v10 = vshrl.u32 %v767_v9, 7  ;;  %s6865_s20 = smov %s6864_s26  ;;  %s4586_s22 = scalar_lea.hbm %s6864_s26, %s5177_s23 }
  0x93   : > { %673 = vst.msk [vmem:[#allocation2 + $0x8] sm:$0xf] %vm672_vm4, %v665_v20  ;;  %5275 = vmatprep.subr.bf16.mxu0 %v6289_v56  ;;  %v676_v12 = vld [vmem:[%s6863_s2] sm:$0x3]  ;;  %p6201_p0 = pnand %p6200_p11, %p6420_p5  ;;  %s6205_s28 = scalar_lea.vmem %s6204_s29, 32 }
  0x94   : > { %v6593_v11 = vsub.s32 1, %v768_v10  ;;  %v6598_v13 = vsub.s32 0, %v768_v10  ;;  %v5465_v10 = vld [vmem:[#allocation3 + $0x90] sm:$0xff]   ;;  %v5967_v15 = vld [vmem:[#allocation12 + $0x260] ss:$8 sps:$4 sm:$0xff]   ;;  %p6206_p1 = scmp.lt.s32.totalorder %s4589_s30, %s6204_s29  ;;  %p6207_p13 = scmp.lt.s32.totalorder %s6205_s28, %s6199_s0 }
  0x95   : > { %p6202_p3 = pneg %p6201_p0 }
  0x96   : > { %v774_v14 = vrot.slane %v676_v12, %v6593_v11  ;;  %v770_v18 = vrot.slane %v676_v12, %v6598_v13  ;;  %p6208_p2 = por %p6207_p13, %p6206_p1 }
  0x97   : > { %v677_v21 = vld [vmem:[#allocation2] sm:$0xe] }
  0x98   : > { %v781_v22 = vld [vmem:[#allocation2] sm:$0xc]  ;;  %p6209_p7 = pnand %p6208_p2, %p6202_p3 }
  0x99   : > { %v5436_v25 = vld [vmem:[#allocation2 + $0x10] ss:$0 sps:$4 sm:$0x33]  }
  0x9a   : > { %v678_v23 = vld [vmem:[#allocation2 + $0x8] sm:$0xf]  ;;  %v5440_v27 = vld [vmem:[#allocation2 + $0x10] ss:$0 sps:$4 sm:$0x77]   ;;  %v699_v31 = vshrl.u32 %v5436_v25, 16 }
  0x9b   : > { %v4734_v24 = vcombine.low %v677_v21, %v678_v23  ;;  %v4741_v26 = vcombine.low %v781_v22, %v678_v23  ;;  %v702_v32 = vshll.u32 %v5436_v25, 16  ;;  %v868_v35 = vshrl.u32 %v5440_v27, 16 }
  0x9c   : > { %v871_v36 = vshll.u32 %v5440_v27, 16  ;;  %v701_v39 = vrot.slane %v699_v31, 1  ;;  %v789_v53 = vrot.slane %v5436_v25, 2 }
  0x9d   : > { %v691_v29 = vshrl.u32 %v4734_v24, 16  ;;  %v694_v30 = vshll.u32 %v4734_v24, 16  ;;  %v860_v33 = vshrl.u32 %v4741_v26, 16  ;;  %v863_v34 = vshll.u32 %v4741_v26, 16 }
  0x9e   : > { %v704_v40 = vrot.slane %v702_v32, 2  ;;  %v870_v43 = vrot.slane %v868_v35, 2  ;;  %v873_v44 = vrot.slane %v871_v36, 3  ;;  %v788_v52 = vrot.slane %v4741_v26, 2 }
  0x9f   : > { %v693_v37 = vrot.slane %v691_v29, 1  ;;  %v696_v38 = vrot.slane %v694_v30, 2  ;;  %v862_v41 = vrot.slane %v860_v33, 2  ;;  %v865_v42 = vrot.slane %v863_v34, 3 }
  0xa0   : > { %v705_v46 = vor.u32 %v704_v40, %v701_v39  ;;  %v874_v49 = vor.u32 %v873_v44, %v870_v43  ;;  %v790_v54 = vsel %vm787_vm10, %v788_v52, %v789_v53 }
  0xa1   : > { %v697_v45 = vor.u32 %v696_v38, %v693_v37  ;;  %v866_v48 = vor.u32 %v865_v42, %v862_v41 }
  0xa3   : > { %v706_v50 = vsel %vm689_vm7, %v697_v45, %v705_v46  ;;  %v875_v51 = vsel %vm858_vm8, %v866_v48, %v874_v49 }
  0xa4   : > { %4739 = vmatmul.mubr.msk.bf16.vlgmr.msra.gmra.mxu1 %vm712_vm9, %v706_v50  ;;  %4751 = vmatmul.mubr.msk.bf16.vlgmr.msra.gmra.mxu0 %vm712_vm9, %v875_v51 }
  0xa5   : > { %820 = vmatpush1.bf16.msra.mxu1 %v800_v47  ;;  %837 = vmatprep.mubr.bf16.mxu1 %v6288_v0 }
  0xa6   : > { %5255 = vmatprep.subr.bf16.mxu1 %v6289_v56  ;;  %5276 = vmatpush3.bf16.msra.mxu0 %v5441_v55 }
  0xa7   : > { %5277 = vmatprep.subr.bf16.mxu0 %v6289_v56  ;;  %5291 = vmatprep.mubr.msk.bf16.mxu0 %vm6290_vm11, %v6289_v56 }
  0xaa   : > { %5278 = vmatpush3.bf16.msra.mxu0 %v5443_v58 }
  0xab   : > { %5279 = vmatprep.subr.bf16.mxu0 %v6289_v56 }
  0xac   : > { %4745 = vmatmul.mubr.msk.bf16.vlgmr.msra.gmra.mxu1 %vm712_vm9, %v790_v54 }
  0xad   : > { %5256 = vmatpush3.bf16.msra.mxu1 %v5442_v57  ;;  %5271 = vmatprep.mubr.msk.bf16.mxu1 %vm6290_vm11, %v6289_v56 }
  0xae   : > { %5257 = vmatprep.subr.bf16.mxu1 %v6289_v56  ;;  %5280 = vmatpush3.bf16.msra.mxu0 %v5445_v60 }
  0xaf   : > { %5281 = vmatprep.subr.bf16.mxu0 %v6289_v56 }
  0xb1   : > { %5258 = vmatpush3.bf16.msra.mxu1 %v5444_v59 }
  0xb2   : > { %5259 = vmatprep.subr.bf16.mxu1 %v6289_v56  ;;  %5282 = vmatpush3.bf16.msra.mxu0 %v5447_v62 }
  0xb3   : > { %5283 = vmatprep.subr.bf16.mxu0 %v6289_v56 }
  0xb5   : > { %5260 = vmatpush3.bf16.msra.mxu1 %v5446_v61 }
  0xb6   : > { %5261 = vmatprep.subr.bf16.mxu1 %v6289_v56  ;;  %5284 = vmatpush3.bf16.msra.mxu0 %v5449_v1 }
  0xb7   : > { %5285 = vmatprep.subr.bf16.mxu0 %v6289_v56 }
  0xb9   : > { %5262 = vmatpush3.bf16.msra.mxu1 %v5448_v63 }
  0xba   : > { %5263 = vmatprep.subr.bf16.mxu1 %v6289_v56  ;;  %5286 = vmatpush3.bf16.msra.mxu0 %v5451_v3  ;;  %v5460_v3 = vld [vmem:[#allocation3 + $0xb8] sm:$0xff]  }
  0xbb   : > { %5287 = vmatprep.subr.bf16.mxu0 %v6289_v56 }
  0xbd   : > { %5264 = vmatpush3.bf16.msra.mxu1 %v5450_v2 }
  0xbe   : > { %5265 = vmatprep.subr.bf16.mxu1 %v6289_v56  ;;  %5288 = vmatpush3.bf16.msra.mxu0 %v5453_v5  ;;  %v5461_v5 = vld [vmem:[#allocation3 + $0xb0] sm:$0xff]  }
  0xbf   : > { %5289 = vmatprep.subr.bf16.mxu0 %v6289_v56 }
  0xc1   : > { %5266 = vmatpush3.bf16.msra.mxu1 %v5452_v4 }
  0xc2   : > { %5267 = vmatprep.subr.bf16.mxu1 %v6289_v56  ;;  %5290 = vmatpush3.bf16.msra.mxu0 %v5455_v7  ;;  %v5463_v7 = vld [vmem:[#allocation3 + $0xa0] sm:$0xff]  }
  0xc5   : > { %5268 = vmatpush3.bf16.msra.mxu1 %v5454_v6  ;;  %v5462_v6 = vld [vmem:[#allocation3 + $0xa8] sm:$0xff]  }
  0xc6   : > { %5269 = vmatprep.subr.bf16.mxu1 %v6289_v56 }
  0xc9   : > { %5270 = vmatpush3.bf16.msra.mxu1 %v5456_v8  ;;  %v5464_v8 = vld [vmem:[#allocation3 + $0x98] sm:$0xff]  }
  0xca   : > { %5295 = vmatprep.subr.bf16.mxu1 %v6289_v56 }
 0x164   : > { %v757_v16 = vpop.f32.mrf.mxu1  ;;  %v924_v21 = vpop.f32.mrf.mxu0 }
 0x165   : > { %v777_v23 = vadd.f32 %v770_v18, %v757_v16 }
 0x166   : > { %v759_v17 = vpop.f32.mrf.mxu1  ;;  %v926_v27 = vpop.f32.mrf.mxu0 }
 0x167   : > { %v778_v19 = vadd.f32 %v774_v14, %v759_v17 }
 0x168   : > { %v761_v20 = vpop.f32.mrf.mxu1  ;;  %v928_v36 = vpop.f32.mrf.mxu0 }
 0x169   : > { %v779_v29 = vadd.f32 %v770_v18, %v761_v20  ;;  %v5466_v18 = vld [vmem:[#allocation3 + $0x88] sm:$0xff]  }
 0x16a   : > { %v763_v22 = vpop.f32.mrf.mxu1 }
 0x16b   : > { %v6602_v24 = vadd.f32 %v774_v14, %v763_v22 }
 0x16c   : > { %v839_v25 = vpop.f32.mrf.mxu1 }
 0x16d   : > { %v848_v26 = vadd.f32 %v839_v25, %v777_v23  ;;  %v5467_v23 = vld [vmem:[#allocation3 + $0x80] sm:$0xff]  }
 0x16e   : > { %v841_v28 = vpop.f32.mrf.mxu1 }
 0x16f   : > { %v933_v30 = vadd.f32 %v924_v21, %v848_v26  ;;  %v849_v31 = vadd.f32 %v841_v28, %v778_v19  ;;  %v5469_v28 = vld [vmem:[#allocation9 + $0x70] ss:$8 sps:$4 sm:$0xff]  }
 0x170   : > { %v843_v32 = vpop.f32.mrf.mxu1 }
 0x171   : > { %v937_v33 = vmax.f32 %v933_v30, 0.0  ;;  %v6604_v34 = vadd.f32 %v926_v27, %v849_v31  ;;  %v850_v35 = vadd.f32 %v843_v32, %v779_v29  ;;  %v5471_v29 = vld [vmem:[#allocation9 + $0x74] ss:$8 sps:$4 sm:$0xff]   ;;  %v5474_v30 = vld [vmem:[#allocation9 + $0x64] ss:$8 sps:$4 sm:$0xff]  }
 0x172   : > { %1460 = vmatprep.subr.bf16.mxu0 %v5471_v29  ;;  %v5472_v31 = vld [vmem:[#allocation9 + $0x60] ss:$8 sps:$4 sm:$0xff]   ;;  %v5484_v32 = vld [vmem:[#allocation6 + $0x70] ss:$8 sps:$4 sm:$0xff]  }
 0x173   : > { %v5183_v37 = vpack.c.bf16 %v937_v33, %v937_v33  ;;  %v935_v38 = vadd.f32 %v928_v36, %v850_v35  ;;  %v5486_v33 = vld [vmem:[#allocation6 + $0x74] ss:$8 sps:$4 sm:$0xff]   ;;  %v5480_v36 = vld [vmem:[#allocation9 + $0x44] ss:$8 sps:$4 sm:$0xff]  }
 0x174   : > { %v5477_v35 = vld [vmem:[#allocation9 + $0x54] ss:$8 sps:$4 sm:$0xff]  }
 0x175   : > { %v945_v39 = vrot.slane %v5183_v37, 6  ;;  %v938_v40 = vmax.f32 %v935_v38, 0.0  ;;  %v5478_v37 = vld [vmem:[#allocation9 + $0x40] ss:$8 sps:$4 sm:$0xff]   ;;  %v5483_v38 = vld [vmem:[#allocation9 + $0x34] ss:$8 sps:$4 sm:$0xff]  }
 0x177   : > { %953 = vst [vmem:[#allocation2] sm:$0xc] %v945_v39  ;;  %v5184_v41 = vpack.c.bf16 %v938_v40, %v938_v40  ;;  %v946_v42 = vrot.slane %v945_v39, 4  ;;  %v5481_v39 = vld [vmem:[#allocation9 + $0x30] ss:$8 sps:$4 sm:$0xff]  }
 0x178   : > { %v5489_v40 = vld [vmem:[#allocation9 + $0x24] ss:$8 sps:$4 sm:$0xff]  }
 0x179   : > { %v947_v43 = vrot.slane %v5184_v41, 6  ;;  %v5492_v41 = vld [vmem:[#allocation6 + $0x64] ss:$8 sps:$4 sm:$0xff]  }
 0x17b   : > { %v948_v44 = vsel %vm6556_vm5, %v946_v42, %v947_v43  ;;  %v949_v45 = vrot.slane %v947_v43, 4  ;;  %v5487_v42 = vld [vmem:[#allocation9 + $0x20] ss:$8 sps:$4 sm:$0xff]  }
 0x17c   : > { %954 = vst [vmem:[#allocation2 + $0x8] sm:$0xf] %v948_v44  ;;  %v5490_v43 = vld [vmem:[#allocation6 + $0x60] ss:$8 sps:$4 sm:$0xff]   ;;  %v5495_v44 = vld [vmem:[#allocation9 + $0x14] ss:$8 sps:$4 sm:$0xff]  }
 0x17d   : > { %955 = vst [vmem:[#allocation2 + $0x10] sm:$0x3] %v949_v45  ;;  %v5498_v45 = vld [vmem:[#allocation6 + $0x54] ss:$8 sps:$4 sm:$0xff]  }
 0x17e   : > { %v1099_v47 = vld [vmem:[#allocation2] sm:$0xc] }
 0x17f   : > { %v957_v48 = vld [vmem:[#allocation2] sm:$0xe] }
 0x183   : > { %v958_v46 = vld [vmem:[#allocation2 + $0x8] sm:$0xf] }
 0x184   : > { %v5457_v49 = vld [vmem:[#allocation2 + $0x10] ss:$0 sps:$4 sm:$0x33]   ;;  %v4765_v50 = vcombine.low %v1099_v47, %v958_v46  ;;  %v4754_v51 = vcombine.low %v957_v48, %v958_v46  ;;  %v5501_v48 = vld [vmem:[#allocation9 + $0x4] ss:$8 sps:$4 sm:$0xff]  }
 0x185   : > { %v1121_v53 = vrot.slane %v5457_v49, 2  ;;  %v993_v57 = vshrl.u32 %v5457_v49, 16  ;;  %v996_v58 = vshll.u32 %v5457_v49, 16  ;;  %v5468_v9 = vld [vmem:[#allocation2 + $0x10] ss:$0 sps:$4 sm:$0x77]  }
 0x186   : > { %v1120_v52 = vrot.slane %v4765_v50, 2  ;;  %v985_v54 = vshrl.u32 %v4754_v51, 16  ;;  %v988_v55 = vshll.u32 %v4754_v51, 16  ;;  %v1237_v12 = vshrl.u32 %v4765_v50, 16  ;;  %v5493_v46 = vld [vmem:[#allocation9 + $0x10] ss:$8 sps:$4 sm:$0xff]  }
 0x187   : > { %v995_v62 = vrot.slane %v993_v57, 1  ;;  %v998_v63 = vrot.slane %v996_v58, 2  ;;  %v1240_v14 = vshll.u32 %v4765_v50, 16  ;;  %v1245_v16 = vshrl.u32 %v5468_v9, 16  ;;  %v5496_v47 = vld [vmem:[#allocation6 + $0x50] ss:$8 sps:$4 sm:$0xff]  }
 0x188   : > { %v1122_v59 = vsel %vm787_vm10, %v1120_v52, %v1121_v53  ;;  %v987_v60 = vrot.slane %v985_v54, 1  ;;  %v990_v61 = vrot.slane %v988_v55, 2  ;;  %v1248_v17 = vshll.u32 %v5468_v9, 16  ;;  %v5504_v49 = vld [vmem:[#allocation6 + $0x44] ss:$8 sps:$4 sm:$0xff]  }
 0x189   : > { %5292 = vmatmul.mubr.bf16.vlgmr.msra.gmra.mxu0 %v1122_v59  ;;  %v999_v2 = vor.u32 %v998_v63, %v995_v62  ;;  %v1239_v19 = vrot.slane %v1237_v12, 2  ;;  %v1242_v20 = vrot.slane %v1240_v14, 3  ;;  %v1247_v21 = vrot.slane %v1245_v16, 2  ;;  %v5499_v50 = vld [vmem:[#allocation9] ss:$8 sps:$4 sm:$0xff]   ;;  %v930_v63 = vpop.f32.mrf.mxu0 }
 0x18a   : > { %v991_v1 = vor.u32 %v990_v61, %v987_v60  ;;  %1492 = vmatprep.mubr.bf16.mxu0 %v6288_v0  ;;  %v1250_v22 = vrot.slane %v1248_v17, 3  ;;  %1461 = vmatpush1.bf16.msra.mxu0 %v5469_v28  ;;  %v5502_v51 = vld [vmem:[#allocation6 + $0x40] ss:$8 sps:$4 sm:$0xff]   ;;  %v5507_v52 = vld [vmem:[#allocation6 + $0xf4] ss:$8 sps:$4 sm:$0xff]  }
 0x18b   : > { %v1243_v25 = vor.u32 %v1242_v20, %v1239_v19  ;;  %1462 = vmatprep.subr.bf16.mxu0 %v5474_v30  ;;  %v5510_v53 = vld [vmem:[#allocation6 + $0x34] ss:$8 sps:$4 sm:$0xff]   ;;  %v5508_v54 = vld [vmem:[#allocation6 + $0x30] ss:$8 sps:$4 sm:$0xff]   ;;  %v5516_v55 = vld [vmem:[#allocation6 + $0x24] ss:$8 sps:$4 sm:$0xff]  }
 0x18c   : > { %v1000_v4 = vsel %vm689_vm7, %v991_v1, %v999_v2  ;;  %v1251_v26 = vor.u32 %v1250_v22, %v1247_v21  ;;  %v5514_v57 = vld [vmem:[#allocation6 + $0x20] ss:$8 sps:$4 sm:$0xff]   ;;  %v5520_v58 = vld [vmem:[#allocation6 + $0x10] ss:$8 sps:$4 sm:$0xff]   ;;  %v5522_v59 = vld [vmem:[#allocation6 + $0x14] ss:$8 sps:$4 sm:$0xff]  }
 0x18d   : > { %5272 = vmatmul.mubr.bf16.vlgmr.msra.gmra.mxu1 %v1000_v4  ;;  %v5526_v60 = vld [vmem:[#allocation6] ss:$8 sps:$4 sm:$0xff]   ;;  %v5528_v61 = vld [vmem:[#allocation6 + $0x4] ss:$8 sps:$4 sm:$0xff]   ;;  %v5534_v62 = vld [vmem:[#allocation6 + $0x174] ss:$8 sps:$4 sm:$0xff]  }
 0x18e   : > { %5296 = vmatpush3.bf16.msra.mxu1 %v5460_v3  ;;  %5311 = vmatprep.mubr.msk.bf16.mxu1 %vm6290_vm11, %v6289_v56  ;;  %v1252_v27 = vsel %vm858_vm8, %v1243_v25, %v1251_v26  ;;  %v845_v3 = vpop.f32.mrf.mxu1 }
 0x18f   : > { %5297 = vmatprep.subr.bf16.mxu1 %v6289_v56  ;;  %1463 = vmatpush1.bf16.msra.mxu0 %v5472_v31  ;;  %v851_v20 = vadd.f32 %v845_v3, %v6602_v24  ;;  %v5554_v3 = vld [vmem:[#allocation6 + $0x144] ss:$8 sps:$4 sm:$0xff]  }
 0x190   : > { %1464 = vmatprep.subr.bf16.mxu0 %v5477_v35 }
 0x191   : > { %v936_v28 = vadd.f32 %v930_v63, %v851_v20  ;;  %v5543_v63 = vld [vmem:[#allocation6 + $0x90] ss:$8 sps:$4 sm:$0xff]   ;;  %v5568_v20 = vld [vmem:[#allocation6 + $0x104] ss:$8 sps:$4 sm:$0xff]  }
 0x192   : > { %5298 = vmatpush3.bf16.msra.mxu1 %v5461_v5 }
 0x193   : > { %5299 = vmatprep.subr.bf16.mxu1 %v6289_v56 }
 0x196   : > { %5300 = vmatpush3.bf16.msra.mxu1 %v5462_v6 }
 0x197   : > { %5301 = vmatprep.subr.bf16.mxu1 %v6289_v56 }
 0x19a   : > { %5302 = vmatpush3.bf16.msra.mxu1 %v5463_v7 }
 0x19b   : > { %5303 = vmatprep.subr.bf16.mxu1 %v6289_v56 }
 0x19e   : > { %5304 = vmatpush3.bf16.msra.mxu1 %v5464_v8 }
 0x19f   : > { %5305 = vmatprep.subr.bf16.mxu1 %v6289_v56 }
 0x1a2   : > { %5306 = vmatpush3.bf16.msra.mxu1 %v5465_v10  ;;  %v4764_v10 = vld [vmem:[%s6804_s4] ss:$0 sm:$0xff] }
 0x1a3   : > { %5307 = vmatprep.subr.bf16.mxu1 %v6289_v56 }
 0x1a6   : > { %5308 = vmatpush3.bf16.msra.mxu1 %v5466_v18 }
 0x1a7   : > { %5309 = vmatprep.subr.bf16.mxu1 %v6289_v56  ;;  %v5475_v56 = vld [vmem:[#allocation9 + $0x50] ss:$8 sps:$4 sm:$0xff]  }
 0x1a8   : > { %1465 = vmatpush1.bf16.msra.mxu0 %v5475_v56  ;;  %v5505_v56 = vld [vmem:[#allocation6 + $0xf0] ss:$8 sps:$4 sm:$0xff]  }
 0x1a9   : > { %1466 = vmatprep.subr.bf16.mxu0 %v5480_v36 }
 0x1aa   : > { %5310 = vmatpush3.bf16.msra.mxu1 %v5467_v23 }
 0x1ab   : > { %1632 = vmatprep.subr.bf16.mxu1 %v5486_v33 }
 0x1ac   : > { %1467 = vmatpush1.bf16.msra.mxu0 %v5478_v37 }
 0x1ad   : > { %5312 = vmatmul.mubr.bf16.vlgmr.msra.gmra.mxu1 %v1252_v27  ;;  %1468 = vmatprep.subr.bf16.mxu0 %v5483_v38  ;;  %v5513_v38 = vld [vmem:[#allocation6 + $0xe4] ss:$8 sps:$4 sm:$0xff]  }
 0x1ae   : > { %1664 = vmatprep.mubr.bf16.mxu1 %v6288_v0  ;;  %1633 = vmatpush1.bf16.msra.mxu1 %v5484_v32 }
 0x1af   : > { %1634 = vmatprep.subr.bf16.mxu1 %v5492_v41 }
 0x1b0   : > { %1469 = vmatpush1.bf16.msra.mxu0 %v5481_v39 }
 0x1b1   : > { %1470 = vmatprep.subr.bf16.mxu0 %v5489_v40  ;;  %v5511_v40 = vld [vmem:[#allocation6 + $0xe0] ss:$8 sps:$4 sm:$0xff]  }
 0x1b2   : > { %1635 = vmatpush1.bf16.msra.mxu1 %v5490_v43  ;;  %v5517_v43 = vld [vmem:[#allocation6 + $0xd0] ss:$8 sps:$4 sm:$0xff]  }
 0x1b3   : > { %1636 = vmatprep.subr.bf16.mxu1 %v5498_v45  ;;  %v5523_v45 = vld [vmem:[#allocation6 + $0xc0] ss:$8 sps:$4 sm:$0xff]  }
 0x1b4   : > { %1471 = vmatpush1.bf16.msra.mxu0 %v5487_v42  ;;  %v5519_v42 = vld [vmem:[#allocation6 + $0xd4] ss:$8 sps:$4 sm:$0xff]  }
 0x1b5   : > { %1472 = vmatprep.subr.bf16.mxu0 %v5495_v44  ;;  %v5525_v44 = vld [vmem:[#allocation6 + $0xc4] ss:$8 sps:$4 sm:$0xff]  }
 0x1b6   : > { %1637 = vmatpush1.bf16.msra.mxu1 %v5496_v47 }
 0x1b7   : > { %1638 = vmatprep.subr.bf16.mxu1 %v5504_v49 }
 0x1b8   : > { %1473 = vmatpush1.bf16.msra.mxu0 %v5493_v46  ;;  %v5531_v46 = vld [vmem:[#allocation6 + $0xb4] ss:$8 sps:$4 sm:$0xff]  }
 0x1b9   : > { %1474 = vmatprep.subr.bf16.mxu0 %v5501_v48 }
 0x1ba   : > { %1639 = vmatpush1.bf16.msra.mxu1 %v5502_v51  ;;  %v5529_v51 = vld [vmem:[#allocation6 + $0xb0] ss:$8 sps:$4 sm:$0xff]  }
 0x1bb   : > { %1640 = vmatprep.subr.bf16.mxu1 %v5510_v53 }
 0x1bc   : > { %1475 = vmatpush1.bf16.msra.mxu0 %v5499_v50 }
 0x1bd   : > { %1799 = vmatprep.subr.bf16.mxu0 %v5507_v52  ;;  %v5532_v52 = vld [vmem:[#allocation6 + $0x170] ss:$8 sps:$4 sm:$0xff]  }
 0x1be   : > { %1641 = vmatpush1.bf16.msra.mxu1 %v5508_v54 }
 0x1bf   : > { %1642 = vmatprep.subr.bf16.mxu1 %v5516_v55  ;;  %v5539_v55 = vld [vmem:[#allocation6 + $0xa4] ss:$8 sps:$4 sm:$0xff]  }
 0x1c2   : > { %1643 = vmatpush1.bf16.msra.mxu1 %v5514_v57  ;;  %v5542_v57 = vld [vmem:[#allocation6 + $0x164] ss:$8 sps:$4 sm:$0xff]  }
 0x1c3   : > { %1644 = vmatprep.subr.bf16.mxu1 %v5522_v59  ;;  %v5537_v59 = vld [vmem:[#allocation6 + $0xa0] ss:$8 sps:$4 sm:$0xff]  }
 0x1c6   : > { %1645 = vmatpush1.bf16.msra.mxu1 %v5520_v58 }
 0x1c7   : > { %1646 = vmatprep.subr.bf16.mxu1 %v5528_v61  ;;  %v5545_v61 = vld [vmem:[#allocation6 + $0x94] ss:$8 sps:$4 sm:$0xff]  }
 0x1ca   : > { %1647 = vmatpush1.bf16.msra.mxu1 %v5526_v60  ;;  %v5540_v60 = vld [vmem:[#allocation6 + $0x160] ss:$8 sps:$4 sm:$0xff]  }
 0x1cb   : > { %1956 = vmatprep.subr.bf16.mxu1 %v5534_v62  ;;  %v5548_v62 = vld [vmem:[#allocation6 + $0x154] ss:$8 sps:$4 sm:$0xff]  }
 0x249   : > { %v1206_v1 = vpop.f32.mrf.mxu0 }
 0x24b   : > { %v5293_v2 = vpop.f32.mrf.mxu0 }
 0x24c   : > { %v5551_v2 = vld [vmem:[#allocation6 + $0x84] ss:$8 sps:$4 sm:$0xff]  }
 0x24d   : > { %v1209_v4 = vpop.f32.mrf.mxu0  ;;  %v1084_v5 = vpop.f32.mrf.mxu1 }
 0x24e   : > { %v1097_v12 = vadd.f32 %v4764_v10, %v1084_v5 }
 0x24f   : > { %v5294_v6 = vpop.f32.mrf.mxu0  ;;  %v5273_v7 = vpop.f32.mrf.mxu1 }
 0x250   : > { %v1213_v16 = vadd.f32 %v1206_v1, %v1097_v12  ;;  %v5546_v1 = vld [vmem:[#allocation6 + $0x150] ss:$8 sps:$4 sm:$0xff]   ;;  %v5549_v7 = vld [vmem:[#allocation6 + $0x80] ss:$8 sps:$4 sm:$0xff]  }
 0x251   : > { %v1087_v8 = vpop.f32.mrf.mxu1  ;;  %v5557_v12 = vld [vmem:[#allocation6 + $0x130] ss:$8 sps:$4 sm:$0xff]  }
 0x252   : > { %v1098_v14 = vadd.f32 %v4764_v10, %v1087_v8  ;;  %v5552_v8 = vld [vmem:[#allocation6 + $0x140] ss:$8 sps:$4 sm:$0xff]  }
 0x253   : > { %v5274_v9 = vpop.f32.mrf.mxu1 }
 0x254   : > { %v1214_v22 = vadd.f32 %v1209_v4, %v1098_v14  ;;  %v5559_v9 = vld [vmem:[#allocation6 + $0x134] ss:$8 sps:$4 sm:$0xff]   ;;  %v5562_v14 = vld [vmem:[#allocation6 + $0x124] ss:$8 sps:$4 sm:$0xff]  }
 0x26d   : > { %v1336_v17 = vpop.f32.mrf.mxu1 }
 0x26e   : > { %v1343_v18 = vadd.f32 %v1336_v17, %v1213_v16  ;;  %v5560_v17 = vld [vmem:[#allocation6 + $0x120] ss:$8 sps:$4 sm:$0xff]  }
 0x26f   : > { %v5313_v19 = vpop.f32.mrf.mxu1 }
 0x270   : > { %v1345_v21 = vmax.f32 %v1343_v18, 0.0  ;;  %v5565_v18 = vld [vmem:[#allocation6 + $0x114] ss:$8 sps:$4 sm:$0xff]   ;;  %v5563_v19 = vld [vmem:[#allocation6 + $0x110] ss:$8 sps:$4 sm:$0xff]  }
 0x271   : > { %v1339_v23 = vpop.f32.mrf.mxu1 }
 0x272   : > { %v1347_v25 = vadd.f32 %v1345_v21, %v6604_v34  ;;  %v1344_v26 = vadd.f32 %v1339_v23, %v1214_v22 }
 0x273   : > { %v5314_v27 = vpop.f32.mrf.mxu1 }
 0x274   : > { %v1349_v29 = vmax.f32 %v1347_v25, 0.0  ;;  %v1346_v30 = vmax.f32 %v1344_v26, 0.0  ;;  %v5566_v25 = vld [vmem:[#allocation6 + $0x100] ss:$8 sps:$4 sm:$0xff]  }
 0x276   : > { %v5185_v31 = vpack.c.bf16 %v1349_v29, %v1349_v29  ;;  %v1348_v32 = vadd.f32 %v1346_v30, %v936_v28  ;;  %v5573_v30 = vld [vmem:[#allocation8 + $0x74] ss:$8 sps:$4 sm:$0xff]  }
 0x278   : > { %v1508_v33 = vrot.slane %v5185_v31, 6  ;;  %v1350_v35 = vmax.f32 %v1348_v32, 0.0  ;;  %v5574_v31 = vld [vmem:[#allocation8 + $0x170] ss:$8 sps:$4 sm:$0xff]   ;;  %v5576_v32 = vld [vmem:[#allocation8 + $0x174] ss:$8 sps:$4 sm:$0xff]  }
 0x27a   : > { %1516 = vst [vmem:[#allocation2] sm:$0xc] %v1508_v33  ;;  %v1351_v36 = vpack.c.bf16 %v1350_v35, %v1349_v29  ;;  %v5186_v37 = vpack.c.bf16 %v1350_v35, %v1350_v35  ;;  %v1509_v24 = vrot.slane %v1508_v33, 4  ;;  %v5571_v29 = vld [vmem:[#allocation8 + $0x70] ss:$8 sps:$4 sm:$0xff]  }
 0x27b   : > { %v5577_v33 = vld [vmem:[#allocation8 + $0x60] ss:$8 sps:$4 sm:$0xff]   ;;  %v5579_v35 = vld [vmem:[#allocation8 + $0x64] ss:$8 sps:$4 sm:$0xff]  }
 0x27c   : > { %v1510_v39 = vrot.slane %v5186_v37, 6  ;;  %1493 = vmatmul.mubr.bf16.vlgmr.msra.gmra.mxu0 %v1351_v36  ;;  %v5582_v36 = vld [vmem:[#allocation8 + $0x164] ss:$8 sps:$4 sm:$0xff]   ;;  %v5583_v37 = vld [vmem:[#allocation8 + $0x50] ss:$8 sps:$4 sm:$0xff]  }
 0x27d   : > { %1800 = vmatpush1.bf16.msra.mxu0 %v5505_v56  ;;  %1831 = vmatprep.mubr.bf16.mxu0 %v6288_v0  ;;  %v5580_v56 = vld [vmem:[#allocation8 + $0x160] ss:$8 sps:$4 sm:$0xff]  }
 0x27e   : > { %v1511_v34 = vsel %vm6556_vm5, %v1509_v24, %v1510_v39  ;;  %v1512_v41 = vrot.slane %v1510_v39, 4  ;;  %1801 = vmatprep.subr.bf16.mxu0 %v5513_v38  ;;  %v5585_v38 = vld [vmem:[#allocation8 + $0x54] ss:$8 sps:$4 sm:$0xff]   ;;  %v5586_v24 = vld [vmem:[#allocation8 + $0x150] ss:$8 sps:$4 sm:$0xff]  }
 0x27f   : > { %1517 = vst [vmem:[#allocation2 + $0x8] sm:$0xf] %v1511_v34  ;;  %v5588_v39 = vld [vmem:[#allocation8 + $0x154] ss:$8 sps:$4 sm:$0xff]   ;;  %v5591_v34 = vld [vmem:[#allocation8 + $0x44] ss:$8 sps:$4 sm:$0xff]  }
 0x280   : > { %1518 = vst [vmem:[#allocation2 + $0x10] sm:$0x3] %v1512_v41  ;;  %v5594_v41 = vld [vmem:[#allocation8 + $0x144] ss:$8 sps:$4 sm:$0xff]  }
 0x281   : > { %1802 = vmatpush1.bf16.msra.mxu0 %v5511_v40  ;;  %v1520_v47 = vld [vmem:[#allocation2] sm:$0xe] }
 0x282   : > { %1803 = vmatprep.subr.bf16.mxu0 %v5519_v42  ;;  %v1690_v4 = vld [vmem:[#allocation2] sm:$0xc]  ;;  %v5597_v42 = vld [vmem:[#allocation8 + $0x34] ss:$8 sps:$4 sm:$0xff]  }
 0x283   : > { %v1846_v21 = vld [vmem:[#allocation2] sm:$0x8] }
 0x284   : > { %v5589_v40 = vld [vmem:[#allocation8 + $0x40] ss:$8 sps:$4 sm:$0xff]  }
 0x285   : > { %1804 = vmatpush1.bf16.msra.mxu0 %v5517_v43  ;;  %v5592_v43 = vld [vmem:[#allocation8 + $0x140] ss:$8 sps:$4 sm:$0xff]  }
 0x286   : > { %1805 = vmatprep.subr.bf16.mxu0 %v5525_v44  ;;  %v6630_v48 = vld [vmem:[#allocation2 + $0x8] sm:$0xf] }
 0x287   : > { %v4801_v49 = vcombine.low %v1520_v47, %v6630_v48  ;;  %v5536_v50 = vld [vmem:[#allocation2 + $0x10] ss:$0 sps:$4 sm:$0x11]   ;;  %v4819_v5 = vcombine.low %v1690_v4, %v6630_v48  ;;  %v4837_v22 = vcombine.low %v1846_v21, %v6630_v48  ;;  %v5603_v47 = vld [vmem:[#allocation8 + $0x24] ss:$8 sps:$4 sm:$0xff]  }
 0x288   : > { %v1549_v54 = vrot.slane %v5536_v50, 1  ;;  %v5556_v6 = vld [vmem:[#allocation2 + $0x10] ss:$0 sps:$4 sm:$0x33]   ;;  %v5601_v48 = vld [vmem:[#allocation8 + $0x20] ss:$8 sps:$4 sm:$0xff]  }
 0x289   : > { %1806 = vmatpush1.bf16.msra.mxu0 %v5523_v45  ;;  %v1548_v53 = vrot.slane %v4801_v49, 1  ;;  %v1716_v10 = vrot.slane %v5556_v6, 2  ;;  %v5570_v23 = vld [vmem:[#allocation2 + $0x10] ss:$0 sps:$4 sm:$0x77]   ;;  %v1872_v26 = vrot.slane %v4837_v22, 3 }
 0x28a   : > { %1807 = vmatprep.subr.bf16.mxu0 %v5531_v46  ;;  %v1873_v27 = vrot.slane %v5570_v23, 3  ;;  %v5595_v44 = vld [vmem:[#allocation8 + $0x30] ss:$8 sps:$4 sm:$0xff]   ;;  %v5600_v45 = vld [vmem:[#allocation8 + $0x134] ss:$8 sps:$4 sm:$0xff]  }
 0x28b   : > { %v1550_v58 = vsel %vm1547_vm12, %v1548_v53, %v1549_v54  ;;  %v5598_v46 = vld [vmem:[#allocation8 + $0x130] ss:$8 sps:$4 sm:$0xff]   ;;  %v5606_v49 = vld [vmem:[#allocation8 + $0x124] ss:$8 sps:$4 sm:$0xff]   ;;  %v5604_v50 = vld [vmem:[#allocation8 + $0x120] ss:$8 sps:$4 sm:$0xff]  }
 0x28c   : > { %1665 = vmatmul.mubr.bf16.vlgmr.msra.gmra.mxu1 %v1550_v58  ;;  %v1874_v28 = vsel %vm1871_vm13, %v1872_v26, %v1873_v27  ;;  %v5610_v53 = vld [vmem:[#allocation8 + $0x110] ss:$8 sps:$4 sm:$0xff]   ;;  %v5612_v54 = vld [vmem:[#allocation8 + $0x114] ss:$8 sps:$4 sm:$0xff]   ;;  %v5618_v58 = vld [vmem:[#allocation8 + $0x104] ss:$8 sps:$4 sm:$0xff]  }
 0x28d   : > { %1808 = vmatpush1.bf16.msra.mxu0 %v5529_v51  ;;  %1957 = vmatpush1.bf16.msra.mxu1 %v5532_v52  ;;  %v5609_v51 = vld [vmem:[#allocation8 + $0x14] ss:$8 sps:$4 sm:$0xff]   ;;  %v5607_v52 = vld [vmem:[#allocation8 + $0x10] ss:$8 sps:$4 sm:$0xff]   ;;  %v5628_v4 = vld [vmem:[#allocation8 + $0x1e0] ss:$8 sps:$4 sm:$0xff]  }
 0x28e   : > { %1809 = vmatprep.subr.bf16.mxu0 %v5539_v55  ;;  %1958 = vmatprep.subr.bf16.mxu1 %v5542_v57  ;;  %v5615_v55 = vld [vmem:[#allocation8 + $0x4] ss:$8 sps:$4 sm:$0xff]   ;;  %v5613_v57 = vld [vmem:[#allocation8] ss:$8 sps:$4 sm:$0xff]   ;;  %v5631_v6 = vld [vmem:[#allocation8 + $0xd0] ss:$8 sps:$4 sm:$0xff]  }
 0x28f   : > { %1988 = vmatprep.mubr.bf16.mxu1 %v6288_v0  ;;  %v1715_v0 = vrot.slane %v4819_v5, 2  ;;  %v5633_v5 = vld [vmem:[#allocation8 + $0xd4] ss:$8 sps:$4 sm:$0xff]   ;;  %v5652_v21 = vld [vmem:[#allocation8 + $0x1a0] ss:$8 sps:$4 sm:$0xff]  }
 0x290   : > { %v5654_v22 = vld [vmem:[#allocation8 + $0x1a4] ss:$8 sps:$4 sm:$0xff]   ;;  %v5657_v23 = vld [vmem:[#allocation8 + $0x94] ss:$8 sps:$4 sm:$0xff]   ;;  %v5655_v26 = vld [vmem:[#allocation8 + $0x90] ss:$8 sps:$4 sm:$0xff]  }
 0x291   : > { %1810 = vmatpush1.bf16.msra.mxu0 %v5537_v59  ;;  %1959 = vmatpush1.bf16.msra.mxu1 %v5540_v60  ;;  %v1717_v16 = vsel %vm787_vm10, %v1715_v0, %v1716_v10  ;;  %v5616_v59 = vld [vmem:[#allocation8 + $0x100] ss:$8 sps:$4 sm:$0xff]   ;;  %v5621_v60 = vld [vmem:[#allocation8 + $0xf4] ss:$8 sps:$4 sm:$0xff]   ;;  %v5642_v10 = vld [vmem:[#allocation8 + $0x1c4] ss:$8 sps:$4 sm:$0xff]  }
 0x292   : > { %1811 = vmatprep.subr.bf16.mxu0 %v5545_v61  ;;  %1960 = vmatprep.subr.bf16.mxu1 %v5548_v62  ;;  %v5624_v61 = vld [vmem:[#allocation8 + $0x1f4] ss:$8 sps:$4 sm:$0xff]   ;;  %v5619_v62 = vld [vmem:[#allocation8 + $0xf0] ss:$8 sps:$4 sm:$0xff]   ;;  %v5637_v0 = vld [vmem:[#allocation8 + $0xc0] ss:$8 sps:$4 sm:$0xff]  }
 0x293   : > { %v5658_v27 = vld [vmem:[#allocation8 + $0x190] ss:$8 sps:$4 sm:$0xff]  }
 0x295   : > { %1812 = vmatpush1.bf16.msra.mxu0 %v5543_v63  ;;  %1961 = vmatpush1.bf16.msra.mxu1 %v5546_v1  ;;  %v5622_v63 = vld [vmem:[#allocation8 + $0x1f0] ss:$8 sps:$4 sm:$0xff]   ;;  %v5627_v1 = vld [vmem:[#allocation8 + $0xe4] ss:$8 sps:$4 sm:$0xff]  }
 0x296   : > { %1813 = vmatprep.subr.bf16.mxu0 %v5551_v2  ;;  %1962 = vmatprep.subr.bf16.mxu1 %v5554_v3  ;;  %v5625_v2 = vld [vmem:[#allocation8 + $0xe0] ss:$8 sps:$4 sm:$0xff]   ;;  %v5630_v3 = vld [vmem:[#allocation8 + $0x1e4] ss:$8 sps:$4 sm:$0xff]  }
 0x299   : > { %1814 = vmatpush1.bf16.msra.mxu0 %v5549_v7  ;;  %1963 = vmatpush1.bf16.msra.mxu1 %v5552_v8  ;;  %v5636_v7 = vld [vmem:[#allocation8 + $0x1d4] ss:$8 sps:$4 sm:$0xff]   ;;  %v5634_v8 = vld [vmem:[#allocation8 + $0x1d0] ss:$8 sps:$4 sm:$0xff]  }
 0x29a   : > { %1964 = vmatprep.subr.bf16.mxu1 %v5559_v9  ;;  %2245 = vmatprep.subr.bf16.mxu0 %v5573_v30  ;;  %v5639_v9 = vld [vmem:[#allocation8 + $0xc4] ss:$8 sps:$4 sm:$0xff]   ;;  %v5661_v30 = vld [vmem:[#allocation8 + $0x80] ss:$8 sps:$4 sm:$0xff]  }
 0x29c   : > { %1832 = vmatmul.mubr.bf16.vlgmr.msra.gmra.mxu0 %v1717_v16  ;;  %v5643_v16 = vld [vmem:[#allocation8 + $0xb0] ss:$8 sps:$4 sm:$0xff]  }
 0x29d   : > { %1965 = vmatpush1.bf16.msra.mxu1 %v5557_v12  ;;  %2246 = vmatpush1.bf16.msra.mxu0 %v5571_v29  ;;  %v5640_v12 = vld [vmem:[#allocation8 + $0x1c0] ss:$8 sps:$4 sm:$0xff]   ;;  %v5666_v29 = vld [vmem:[#allocation8 + $0x184] ss:$8 sps:$4 sm:$0xff]  }
 0x29e   : > { %1966 = vmatprep.subr.bf16.mxu1 %v5562_v14  ;;  %2247 = vmatprep.subr.bf16.mxu0 %v5579_v35  ;;  %v5645_v14 = vld [vmem:[#allocation8 + $0xb4] ss:$8 sps:$4 sm:$0xff]  }
 0x2a1   : > { %1967 = vmatpush1.bf16.msra.mxu1 %v5560_v17  ;;  %2248 = vmatpush1.bf16.msra.mxu0 %v5577_v33  ;;  %v5648_v17 = vld [vmem:[#allocation8 + $0x1b4] ss:$8 sps:$4 sm:$0xff]  }
 0x2a2   : > { %1968 = vmatprep.subr.bf16.mxu1 %v5565_v18  ;;  %2249 = vmatprep.subr.bf16.mxu0 %v5585_v38  ;;  %v5646_v18 = vld [vmem:[#allocation8 + $0x1b0] ss:$8 sps:$4 sm:$0xff]   ;;  %v1519_v38 = vld [vmem:[%s6806_s6] sm:$0x3] }
 0x2a5   : > { %1969 = vmatpush1.bf16.msra.mxu1 %v5563_v19  ;;  %2250 = vmatpush1.bf16.msra.mxu0 %v5583_v37  ;;  %v5649_v19 = vld [vmem:[#allocation8 + $0xa0] ss:$8 sps:$4 sm:$0xff]  }
 0x2a6   : > { %1970 = vmatprep.subr.bf16.mxu1 %v5568_v20  ;;  %2251 = vmatprep.subr.bf16.mxu0 %v5591_v34  ;;  %v5651_v20 = vld [vmem:[#allocation8 + $0xa4] ss:$8 sps:$4 sm:$0xff]  }
 0x2a9   : > { %1971 = vmatpush1.bf16.msra.mxu1 %v5566_v25  ;;  %2252 = vmatpush1.bf16.msra.mxu0 %v5589_v40  ;;  %v5660_v25 = vld [vmem:[#allocation8 + $0x194] ss:$8 sps:$4 sm:$0xff]   ;;  %v1679_v40 = vrot.slane %v1519_v38, %v6598_v13 }
 0x2aa   : > { %2516 = vmatprep.subr.bf16.mxu1 %v5576_v32  ;;  %2253 = vmatprep.subr.bf16.mxu0 %v5597_v42  ;;  %v5671_v32 = vld [vmem:[#allocation8 + $0x274] ss:$8 sps:$4 sm:$0xff]   ;;  %v1683_v42 = vrot.slane %v1519_v38, %v6593_v11 }
 0x2ac   : > { %1989 = vmatmul.mubr.bf16.vlgmr.msra.gmra.mxu1 %v1874_v28  ;;  %v5663_v28 = vld [vmem:[#allocation8 + $0x84] ss:$8 sps:$4 sm:$0xff]  }
 0x2ad   : > { %2517 = vmatpush1.bf16.msra.mxu1 %v5574_v31  ;;  %2254 = vmatpush1.bf16.msra.mxu0 %v5595_v44  ;;  %v5664_v31 = vld [vmem:[#allocation8 + $0x180] ss:$8 sps:$4 sm:$0xff]  }
 0x2ae   : > { %2518 = vmatprep.subr.bf16.mxu1 %v5582_v36  ;;  %2255 = vmatprep.subr.bf16.mxu0 %v5603_v47 }
 0x2b1   : > { %2519 = vmatpush1.bf16.msra.mxu1 %v5580_v56  ;;  %2256 = vmatpush1.bf16.msra.mxu0 %v5601_v48 }
 0x2b2   : > { %2520 = vmatprep.subr.bf16.mxu1 %v5588_v39  ;;  %2257 = vmatprep.subr.bf16.mxu0 %v5609_v51 }
 0x2b5   : > { %2521 = vmatpush1.bf16.msra.mxu1 %v5586_v24  ;;  %2258 = vmatpush1.bf16.msra.mxu0 %v5607_v52 }
 0x2b6   : > { %2522 = vmatprep.subr.bf16.mxu1 %v5594_v41  ;;  %2259 = vmatprep.subr.bf16.mxu0 %v5615_v55 }
 0x2b9   : > { %2523 = vmatpush1.bf16.msra.mxu1 %v5592_v43  ;;  %2260 = vmatpush1.bf16.msra.mxu0 %v5613_v57 }
 0x2ba   : > { %2524 = vmatprep.subr.bf16.mxu1 %v5600_v45  ;;  %2261 = vmatprep.subr.bf16.mxu0 %v5621_v60 }
 0x2bd   : > { %2525 = vmatpush1.bf16.msra.mxu1 %v5598_v46  ;;  %2262 = vmatpush2.bf16.msra.mxu0 %v5619_v62 }
 0x2be   : > { %2526 = vmatprep.subr.bf16.mxu1 %v5606_v49  ;;  %2263 = vmatprep.subr.bf16.mxu0 %v5627_v1 }
 0x2c1   : > { %2527 = vmatpush1.bf16.msra.mxu1 %v5604_v50  ;;  %2264 = vmatpush2.bf16.msra.mxu0 %v5625_v2 }
 0x2c2   : > { %2528 = vmatprep.subr.bf16.mxu1 %v5612_v54  ;;  %2265 = vmatprep.subr.bf16.mxu0 %v5633_v5 }
 0x2c5   : > { %2529 = vmatpush1.bf16.msra.mxu1 %v5610_v53  ;;  %2266 = vmatpush2.bf16.msra.mxu0 %v5631_v6 }
 0x2c6   : > { %2530 = vmatprep.subr.bf16.mxu1 %v5618_v58  ;;  %2267 = vmatprep.subr.bf16.mxu0 %v5639_v9 }
 0x2c9   : > { %2531 = vmatpush1.bf16.msra.mxu1 %v5616_v59  ;;  %2268 = vmatpush2.bf16.msra.mxu0 %v5637_v0 }
 0x2ca   : > { %2532 = vmatprep.subr.bf16.mxu1 %v5624_v61  ;;  %2269 = vmatprep.subr.bf16.mxu0 %v5645_v14 }
 0x2cd   : > { %2533 = vmatpush2.bf16.msra.mxu1 %v5622_v63  ;;  %2270 = vmatpush2.bf16.msra.mxu0 %v5643_v16 }
 0x2ce   : > { %2534 = vmatprep.subr.bf16.mxu1 %v5630_v3  ;;  %2271 = vmatprep.subr.bf16.mxu0 %v5651_v20 }
 0x2d1   : > { %2535 = vmatpush2.bf16.msra.mxu1 %v5628_v4  ;;  %2272 = vmatpush2.bf16.msra.mxu0 %v5649_v19 }
 0x2d2   : > { %2536 = vmatprep.subr.bf16.mxu1 %v5636_v7  ;;  %2273 = vmatprep.subr.bf16.mxu0 %v5657_v23 }
 0x2d5   : > { %2537 = vmatpush2.bf16.msra.mxu1 %v5634_v8  ;;  %2274 = vmatpush2.bf16.msra.mxu0 %v5655_v26 }
 0x2d6   : > { %2538 = vmatprep.subr.bf16.mxu1 %v5642_v10  ;;  %2275 = vmatprep.subr.bf16.mxu0 %v5663_v28 }
 0x2d9   : > { %2539 = vmatpush2.bf16.msra.mxu1 %v5640_v12  ;;  %2276 = vmatpush2.bf16.msra.mxu0 %v5661_v30 }
 0x2da   : > { %2540 = vmatprep.subr.bf16.mxu1 %v5648_v17  ;;  %2776 = vmatprep.subr.bf16.mxu0 %v5671_v32 }
 0x2dd   : > { %2541 = vmatpush2.bf16.msra.mxu1 %v5646_v18 }
 0x2de   : > { %2542 = vmatprep.subr.bf16.mxu1 %v5654_v22 }
 0x2e1   : > { %2543 = vmatpush2.bf16.msra.mxu1 %v5652_v21 }
 0x2e2   : > { %2544 = vmatprep.subr.bf16.mxu1 %v5660_v25 }
 0x2e5   : > { %2545 = vmatpush2.bf16.msra.mxu1 %v5658_v27 }
 0x2e6   : > { %2546 = vmatprep.subr.bf16.mxu1 %v5666_v29 }
 0x2e9   : > { %2547 = vmatpush2.bf16.msra.mxu1 %v5664_v31 }
 0x33c   : > { %v6639_v33 = vpop.f32.mrf.mxu0 }
 0x33e   : > { %v6641_v35 = vpop.f32.mrf.mxu0 }
 0x340   : > { %v6643_v56 = vpop.f32.mrf.mxu0 }
 0x342   : > { %v6645_v37 = vpop.f32.mrf.mxu0 }
 0x34c   : > { %v1666_v36 = vpop.f32.mrf.mxu1 }
 0x34d   : > { %v1686_v43 = vadd.f32 %v1679_v40, %v1666_v36 }
 0x34e   : > { %v1668_v24 = vpop.f32.mrf.mxu1 }
 0x34f   : > { %v1687_v46 = vadd.f32 %v1683_v42, %v1668_v24 }
 0x350   : > { %v1670_v34 = vpop.f32.mrf.mxu1 }
 0x351   : > { %v1688_v49 = vadd.f32 %v1679_v40, %v1670_v34  ;;  %v5669_v34 = vld [vmem:[#allocation8 + $0x270] ss:$8 sps:$4 sm:$0xff]  }
 0x352   : > { %v1672_v44 = vpop.f32.mrf.mxu1 }
 0x353   : > { %v1689_v54 = vadd.f32 %v1683_v42, %v1672_v44 }
 0x35c   : > { %v1833_v39 = vpop.f32.mrf.mxu0 }
 0x35d   : > { %v1842_v47 = vadd.f32 %v1833_v39, %v1686_v43 }
 0x35e   : > { %v1835_v41 = vpop.f32.mrf.mxu0 }
 0x35f   : > { %v1843_v50 = vadd.f32 %v1835_v41, %v1687_v46 }
 0x360   : > { %v1837_v45 = vpop.f32.mrf.mxu0 }
 0x361   : > { %v1844_v55 = vadd.f32 %v1837_v45, %v1688_v49  ;;  %v5675_v49 = vld [vmem:[#allocation8 + $0x260] ss:$8 sps:$4 sm:$0xff]  }
 0x362   : > { %v1839_v52 = vpop.f32.mrf.mxu0 }
 0x363   : > { %v1845_v59 = vadd.f32 %v1839_v52, %v1689_v54  ;;  %v5683_v52 = vld [vmem:[#allocation8 + $0x244] ss:$8 sps:$4 sm:$0xff]   ;;  %v5686_v54 = vld [vmem:[#allocation8 + $0x234] ss:$8 sps:$4 sm:$0xff]  }
 0x36c   : > { %v1990_v48 = vpop.f32.mrf.mxu1 }
 0x36d   : > { %v1999_v51 = vadd.f32 %v1990_v48, %v1842_v47  ;;  %v5677_v47 = vld [vmem:[#allocation8 + $0x264] ss:$8 sps:$4 sm:$0xff]  }
 0x36e   : > { %v1992_v53 = vpop.f32.mrf.mxu1 }
 0x36f   : > { %v2000_v57 = vadd.f32 %v1992_v53, %v1843_v50  ;;  %v2003_v60 = vmax.f32 %v1999_v51, 0.0  ;;  %v5680_v50 = vld [vmem:[#allocation8 + $0x254] ss:$8 sps:$4 sm:$0xff]   ;;  %v5678_v51 = vld [vmem:[#allocation8 + $0x250] ss:$8 sps:$4 sm:$0xff]  }
 0x370   : > { %v1994_v58 = vpop.f32.mrf.mxu1  ;;  %v5681_v53 = vld [vmem:[#allocation8 + $0x240] ss:$8 sps:$4 sm:$0xff]  }
 0x371   : > { %v2004_v61 = vmax.f32 %v2000_v57, 0.0  ;;  %v2001_v62 = vadd.f32 %v1994_v58, %v1844_v55  ;;  %v5684_v55 = vld [vmem:[#allocation8 + $0x230] ss:$8 sps:$4 sm:$0xff]   ;;  %v5689_v57 = vld [vmem:[#allocation8 + $0x224] ss:$8 sps:$4 sm:$0xff]  }
 0x372   : > { %v1996_v63 = vpop.f32.mrf.mxu1  ;;  %v5687_v58 = vld [vmem:[#allocation8 + $0x220] ss:$8 sps:$4 sm:$0xff]  }
 0x373   : > { %v5187_v1 = vpack.c.bf16 %v2004_v61, %v2003_v60  ;;  %v2002_v2 = vadd.f32 %v1996_v63, %v1845_v59  ;;  %v2005_v4 = vmax.f32 %v2001_v62, 0.0  ;;  %v5692_v59 = vld [vmem:[#allocation8 + $0x214] ss:$8 sps:$4 sm:$0xff]   ;;  %v5690_v60 = vld [vmem:[#allocation8 + $0x210] ss:$8 sps:$4 sm:$0xff]  }
 0x374   : > { %v5695_v61 = vld [vmem:[#allocation8 + $0x204] ss:$8 sps:$4 sm:$0xff]   ;;  %v5693_v62 = vld [vmem:[#allocation8 + $0x200] ss:$8 sps:$4 sm:$0xff]   ;;  %v5698_v63 = vld [vmem:[#allocation8 + $0x2f4] ss:$8 sps:$4 sm:$0xff]  }
 0x375   : > { %v2017_v3 = vrot.slane %v5187_v1, 6  ;;  %v2006_v5 = vmax.f32 %v2002_v2, 0.0  ;;  %v5696_v1 = vld [vmem:[#allocation8 + $0x2f0] ss:$8 sps:$4 sm:$0xff]   ;;  %v5701_v2 = vld [vmem:[#allocation8 + $0x2e4] ss:$8 sps:$4 sm:$0xff]  }
 0x377   : > { %2025 = vst [vmem:[#allocation2] sm:$0xcc] %v2017_v3  ;;  %v5188_v6 = vpack.c.bf16 %v2006_v5, %v2005_v4  ;;  %v2018_v9 = vrot.slane %v2017_v3, 4  ;;  %v5699_v3 = vld [vmem:[#allocation8 + $0x2e0] ss:$8 sps:$4 sm:$0xff]  }
 0x378   : > { %v5704_v4 = vld [vmem:[#allocation8 + $0x2d4] ss:$8 sps:$4 sm:$0xff]   ;;  %v5702_v5 = vld [vmem:[#allocation8 + $0x2d0] ss:$8 sps:$4 sm:$0xff]  }
 0x379   : > { %v2019_v7 = vrot.slane %v5188_v6, 6  ;;  %v5707_v6 = vld [vmem:[#allocation8 + $0x2c4] ss:$8 sps:$4 sm:$0xff]  }
 0x37b   : > { %v2021_v8 = vrot.slane %v2019_v7, 4  ;;  %v6654_v0 = vsel %vm6556_vm5, %v2018_v9, %v2019_v7  ;;  %v5705_v7 = vld [vmem:[#allocation8 + $0x2c0] ss:$8 sps:$4 sm:$0xff]   ;;  %v5708_v9 = vld [vmem:[#allocation8 + $0x2b0] ss:$8 sps:$4 sm:$0xff]  }
 0x37d   : > { %2027 = vst [vmem:[#allocation2 + $0x10] sm:$0x33] %v2021_v8  ;;  %v5710_v8 = vld [vmem:[#allocation8 + $0x2b4] ss:$8 sps:$4 sm:$0xff]  }
 0x37e   : > { %v2029_v10 = vld [vmem:[#allocation2] sm:$0xee] }
 0x37f   : > { %v4858_v12 = vcombine.high %v2029_v10, %v6654_v0  ;;  %v2303_v14 = vld [vmem:[#allocation2] sm:$0xcc]  ;;  %v4857_v18 = vcombine.low %v2029_v10, %v6654_v0 }
 0x380   : > { %v6657_v16 = vld [vmem:[#allocation2] sm:$0x88]  ;;  %v4894_v17 = vcombine.high %v2303_v14, %v6654_v0  ;;  %v4893_v19 = vcombine.low %v2303_v14, %v6654_v0  ;;  %v5716_v14 = vld [vmem:[#allocation8 + $0x294] ss:$8 sps:$4 sm:$0xff]  }
 0x381   : > { %v2080_v20 = vrot.slane %v4858_v12, 1  ;;  %v4930_v25 = vcombine.high %v6657_v16, %v6654_v0  ;;  %v2077_v31 = vrot.slane %v4857_v18, 1  ;;  %v5713_v10 = vld [vmem:[#allocation8 + $0x2a4] ss:$8 sps:$4 sm:$0xff]   ;;  %v5711_v12 = vld [vmem:[#allocation8 + $0x2a0] ss:$8 sps:$4 sm:$0xff]  }
 0x382   : > { %v2351_v30 = vrot.slane %v4894_v17, 2  ;;  %v2348_v32 = vrot.slane %v4893_v19, 2  ;;  %v5714_v17 = vld [vmem:[#allocation8 + $0x290] ss:$8 sps:$4 sm:$0xff]   ;;  %v5719_v18 = vld [vmem:[#allocation8 + $0x284] ss:$8 sps:$4 sm:$0xff]  }
 0x383   : > { %v2611_v41 = vrot.slane %v4930_v25, 3 }
 0x384   : > { %v2031_v21 = vld [vmem:[#allocation2 + $0x10] sm:$0x11] }
 0x385   : > { %v2304_v22 = vld [vmem:[#allocation2 + $0x10] sm:$0x33]  ;;  %v4860_v26 = vcombine.high %v2031_v21, %v2031_v21  ;;  %v4859_v28 = vcombine.low %v2031_v21, %v2031_v21  ;;  %v4929_v21 = vcombine.low %v6657_v16, %v6654_v0  ;;  %v5733_v16 = vld [vmem:[#allocation11 + $0x160] ss:$8 sps:$4 sm:$0xff]  }
 0x386   : > { %v6662_v23 = vld [vmem:[#allocation2 + $0x10] sm:$0x77]  ;;  %v4896_v27 = vcombine.high %v2304_v22, %v2304_v22  ;;  %v4895_v29 = vcombine.low %v2304_v22, %v2304_v22 }
 0x387   : > { %v4932_v36 = vcombine.high %v6662_v23, %v6662_v23  ;;  %v2081_v38 = vrot.slane %v4860_v26, 1  ;;  %v2078_v39 = vrot.slane %v4859_v28, 1  ;;  %v4931_v19 = vcombine.low %v6662_v23, %v6662_v23  ;;  %v5723_v28 = vld [vmem:[#allocation11 + $0x74] ss:$8 sps:$4 sm:$0xff]   ;;  %v5724_v23 = vld [vmem:[#allocation11 + $0x60] ss:$8 sps:$4 sm:$0xff]  }
 0x388   : > { %v2352_v24 = vrot.slane %v4896_v27, 2  ;;  %v2349_v40 = vrot.slane %v4895_v29, 2  ;;  %v2608_v25 = vrot.slane %v4929_v21, 3  ;;  %v5721_v27 = vld [vmem:[#allocation11 + $0x70] ss:$8 sps:$4 sm:$0xff]   ;;  %3061 = vmatprep.subr.bf16.mxu1 %v5723_v28 }
 0x389   : > { %v2612_v42 = vrot.slane %v4932_v36, 3  ;;  %v2082_v43 = vsel %vm1547_vm12, %v2080_v20, %v2081_v38  ;;  %v2079_v45 = vsel %vm1547_vm12, %v2077_v31, %v2078_v39  ;;  %v5717_v20 = vld [vmem:[#allocation8 + $0x280] ss:$8 sps:$4 sm:$0xff]   ;;  %v2609_v22 = vrot.slane %v4931_v19, 3  ;;  %v5726_v29 = vld [vmem:[#allocation11 + $0x64] ss:$8 sps:$4 sm:$0xff]  }
 0x38a   : > { %v2353_v44 = vsel %vm787_vm10, %v2351_v30, %v2352_v24  ;;  %v2350_v46 = vsel %vm787_vm10, %v2348_v32, %v2349_v40  ;;  %2277 = vmatprep.mubr.bf16.mxu0 %v2082_v43  ;;  %v5727_v30 = vld [vmem:[#allocation11 + $0x170] ss:$8 sps:$4 sm:$0xff]   ;;  %v5729_v31 = vld [vmem:[#allocation11 + $0x174] ss:$8 sps:$4 sm:$0xff]   ;;  %v5735_v32 = vld [vmem:[#allocation11 + $0x164] ss:$8 sps:$4 sm:$0xff]  }
 0x38b   : > { %2548 = vmatprep.mubr.bf16.mxu1 %v2353_v44  ;;  %2278 = vmatmul.mubr.bf16.vlgmr.msra.gmra.mxu0 %v2079_v45  ;;  %v2613_v48 = vsel %vm1871_vm13, %v2611_v41, %v2612_v42  ;;  %v2610_v26 = vsel %vm1871_vm13, %v2608_v25, %v2609_v22  ;;  %v5732_v0 = vld [vmem:[#allocation11 + $0x54] ss:$8 sps:$4 sm:$0xff]   ;;  %v5730_v38 = vld [vmem:[#allocation11 + $0x50] ss:$8 sps:$4 sm:$0xff]   ;;  %v5738_v24 = vld [vmem:[#allocation11 + $0x44] ss:$8 sps:$4 sm:$0xff]  }
 0x38c   : > { %2549 = vmatmul.mubr.bf16.vlgmr.msra.gmra.mxu1 %v2350_v46  ;;  %2777 = vmatpush1.bf16.msra.mxu0 %v5669_v34  ;;  %v5741_v36 = vld [vmem:[#allocation11 + $0x154] ss:$8 sps:$4 sm:$0xff]   ;;  %v5739_v39 = vld [vmem:[#allocation11 + $0x150] ss:$8 sps:$4 sm:$0xff]   ;;  %v5747_v40 = vld [vmem:[#allocation11 + $0x144] ss:$8 sps:$4 sm:$0xff]  }
 0x38d   : > { %2808 = vmatprep.mubr.bf16.mxu0 %v2613_v48  ;;  %2778 = vmatprep.subr.bf16.mxu0 %v5677_v47  ;;  %v5736_v34 = vld [vmem:[#allocation11 + $0x40] ss:$8 sps:$4 sm:$0xff]   ;;  %v5744_v41 = vld [vmem:[#allocation11 + $0x34] ss:$8 sps:$4 sm:$0xff]   ;;  %v5742_v44 = vld [vmem:[#allocation11 + $0x30] ss:$8 sps:$4 sm:$0xff]  }
 0x38e   : > { %3062 = vmatpush1.bf16.msra.mxu1 %v5721_v27  ;;  %v5745_v42 = vld [vmem:[#allocation11 + $0x140] ss:$8 sps:$4 sm:$0xff]   ;;  %v5753_v43 = vld [vmem:[#allocation11 + $0x134] ss:$8 sps:$4 sm:$0xff]   ;;  %v5750_v45 = vld [vmem:[#allocation11 + $0x24] ss:$8 sps:$4 sm:$0xff]  }
 0x38f   : > { %3063 = vmatprep.subr.bf16.mxu1 %v5726_v29  ;;  %v5751_v46 = vld [vmem:[#allocation11 + $0x130] ss:$8 sps:$4 sm:$0xff]   ;;  %v5759_v47 = vld [vmem:[#allocation11 + $0x124] ss:$8 sps:$4 sm:$0xff]   ;;  %v5748_v48 = vld [vmem:[#allocation11 + $0x20] ss:$8 sps:$4 sm:$0xff]  }
 0x390   : > { %2779 = vmatpush1.bf16.msra.mxu0 %v5675_v49  ;;  %v5756_v49 = vld [vmem:[#allocation11 + $0x14] ss:$8 sps:$4 sm:$0xff]   ;;  %v5793_v19 = vld [vmem:[#allocation11 + $0x1c0] ss:$8 sps:$4 sm:$0xff]   ;;  %v5802_v21 = vld [vmem:[#allocation11 + $0x90] ss:$8 sps:$4 sm:$0xff]  }
 0x391   : > { %2780 = vmatprep.subr.bf16.mxu0 %v5680_v50  ;;  %v5757_v50 = vld [vmem:[#allocation11 + $0x120] ss:$8 sps:$4 sm:$0xff]   ;;  %v5801_v22 = vld [vmem:[#allocation11 + $0x1b4] ss:$8 sps:$4 sm:$0xff]   ;;  %v5799_v25 = vld [vmem:[#allocation11 + $0x1b0] ss:$8 sps:$4 sm:$0xff]  }
 0x392   : > { %3064 = vmatpush1.bf16.msra.mxu1 %v5724_v23  ;;  %v5805_v27 = vld [vmem:[#allocation11 + $0x1a0] ss:$8 sps:$4 sm:$0xff]   ;;  %v5807_v28 = vld [vmem:[#allocation11 + $0x1a4] ss:$8 sps:$4 sm:$0xff]   ;;  %v5811_v23 = vld [vmem:[#allocation11 + $0x190] ss:$8 sps:$4 sm:$0xff]  }
 0x393   : > { %3065 = vmatprep.subr.bf16.mxu1 %v5732_v0  ;;  %v5808_v29 = vld [vmem:[#allocation11 + $0x80] ss:$8 sps:$4 sm:$0xff]  }
 0x394   : > { %2781 = vmatpush1.bf16.msra.mxu0 %v5678_v51  ;;  %v5765_v51 = vld [vmem:[#allocation11 + $0x114] ss:$8 sps:$4 sm:$0xff]   ;;  %v5817_v0 = vld [vmem:[#allocation11 + $0x180] ss:$8 sps:$4 sm:$0xff]  }
 0x395   : > { %2782 = vmatprep.subr.bf16.mxu0 %v5683_v52  ;;  %v5754_v52 = vld [vmem:[#allocation11 + $0x10] ss:$8 sps:$4 sm:$0xff]  }
 0x396   : > { %3066 = vmatpush1.bf16.msra.mxu1 %v5730_v38 }
 0x397   : > { %3067 = vmatprep.subr.bf16.mxu1 %v5738_v24 }
 0x398   : > { %2783 = vmatpush1.bf16.msra.mxu0 %v5681_v53  ;;  %v5762_v53 = vld [vmem:[#allocation11 + $0x4] ss:$8 sps:$4 sm:$0xff]  }
 0x399   : > { %2784 = vmatprep.subr.bf16.mxu0 %v5686_v54  ;;  %v5763_v54 = vld [vmem:[#allocation11 + $0x110] ss:$8 sps:$4 sm:$0xff]  }
 0x39a   : > { %3068 = vmatpush1.bf16.msra.mxu1 %v5736_v34 }
 0x39b   : > { %3069 = vmatprep.subr.bf16.mxu1 %v5744_v41 }
 0x39c   : > { %2785 = vmatpush1.bf16.msra.mxu0 %v5684_v55  ;;  %v5771_v55 = vld [vmem:[#allocation11 + $0x104] ss:$8 sps:$4 sm:$0xff]  }
 0x39d   : > { %2786 = vmatprep.subr.bf16.mxu0 %v5689_v57  ;;  %v5760_v57 = vld [vmem:[#allocation11] ss:$8 sps:$4 sm:$0xff]  }
 0x39e   : > { %3070 = vmatpush1.bf16.msra.mxu1 %v5742_v44 }
 0x39f   : > { %3071 = vmatprep.subr.bf16.mxu1 %v5750_v45 }
 0x3a0   : > { %2787 = vmatpush1.bf16.msra.mxu0 %v5687_v58  ;;  %v5768_v58 = vld [vmem:[#allocation11 + $0xf4] ss:$8 sps:$4 sm:$0xff]  }
 0x3a1   : > { %2788 = vmatprep.subr.bf16.mxu0 %v5692_v59  ;;  %v5769_v59 = vld [vmem:[#allocation11 + $0x100] ss:$8 sps:$4 sm:$0xff]  }
 0x3a2   : > { %3072 = vmatpush1.bf16.msra.mxu1 %v5748_v48 }
 0x3a3   : > { %3073 = vmatprep.subr.bf16.mxu1 %v5756_v49 }
 0x3a4   : > { %2789 = vmatpush1.bf16.msra.mxu0 %v5690_v60  ;;  %v5766_v60 = vld [vmem:[#allocation11 + $0xf0] ss:$8 sps:$4 sm:$0xff]  }
 0x3a5   : > { %2790 = vmatprep.subr.bf16.mxu0 %v5695_v61  ;;  %v5774_v61 = vld [vmem:[#allocation11 + $0xe4] ss:$8 sps:$4 sm:$0xff]  }
 0x3a6   : > { %3074 = vmatpush1.bf16.msra.mxu1 %v5754_v52 }
 0x3a7   : > { %3075 = vmatprep.subr.bf16.mxu1 %v5762_v53 }
 0x3a8   : > { %2791 = vmatpush1.bf16.msra.mxu0 %v5693_v62  ;;  %v5772_v62 = vld [vmem:[#allocation11 + $0xe0] ss:$8 sps:$4 sm:$0xff]  }
 0x3a9   : > { %2792 = vmatprep.subr.bf16.mxu0 %v5698_v63  ;;  %v5780_v63 = vld [vmem:[#allocation11 + $0xd4] ss:$8 sps:$4 sm:$0xff]  }
 0x3aa   : > { %3076 = vmatpush1.bf16.msra.mxu1 %v5760_v57 }
 0x3ab   : > { %3077 = vmatprep.subr.bf16.mxu1 %v5768_v58 }
 0x3ac   : > { %2793 = vmatpush2.bf16.msra.mxu0 %v5696_v1  ;;  %v5778_v1 = vld [vmem:[#allocation11 + $0xd0] ss:$8 sps:$4 sm:$0xff]  }
 0x3ad   : > { %2794 = vmatprep.subr.bf16.mxu0 %v5701_v2  ;;  %v5777_v2 = vld [vmem:[#allocation11 + $0x1f4] ss:$8 sps:$4 sm:$0xff]  }
 0x3ae   : > { %3078 = vmatpush2.bf16.msra.mxu1 %v5766_v60 }
 0x3af   : > { %3079 = vmatprep.subr.bf16.mxu1 %v5774_v61 }
 0x3b0   : > { %2795 = vmatpush2.bf16.msra.mxu0 %v5699_v3  ;;  %v5775_v3 = vld [vmem:[#allocation11 + $0x1f0] ss:$8 sps:$4 sm:$0xff]  }
 0x3b1   : > { %2796 = vmatprep.subr.bf16.mxu0 %v5704_v4  ;;  %v5786_v4 = vld [vmem:[#allocation11 + $0xc4] ss:$8 sps:$4 sm:$0xff]  }
 0x3b2   : > { %3080 = vmatpush2.bf16.msra.mxu1 %v5772_v62 }
 0x3b3   : > { %3081 = vmatprep.subr.bf16.mxu1 %v5780_v63 }
 0x3b4   : > { %2797 = vmatpush2.bf16.msra.mxu0 %v5702_v5  ;;  %v5784_v5 = vld [vmem:[#allocation11 + $0xc0] ss:$8 sps:$4 sm:$0xff]  }
 0x3b5   : > { %2798 = vmatprep.subr.bf16.mxu0 %v5707_v6  ;;  %v5783_v6 = vld [vmem:[#allocation11 + $0x1e4] ss:$8 sps:$4 sm:$0xff]  }
 0x3b6   : > { %3082 = vmatpush2.bf16.msra.mxu1 %v5778_v1 }
 0x3b7   : > { %3083 = vmatprep.subr.bf16.mxu1 %v5786_v4 }
 0x3b8   : > { %2799 = vmatpush2.bf16.msra.mxu0 %v5705_v7  ;;  %v5781_v7 = vld [vmem:[#allocation11 + $0x1e0] ss:$8 sps:$4 sm:$0xff]  }
 0x3b9   : > { %2800 = vmatprep.subr.bf16.mxu0 %v5710_v8  ;;  %v5792_v8 = vld [vmem:[#allocation11 + $0xb4] ss:$8 sps:$4 sm:$0xff]  }
 0x3ba   : > { %3084 = vmatpush2.bf16.msra.mxu1 %v5784_v5 }
 0x3bb   : > { %3085 = vmatprep.subr.bf16.mxu1 %v5792_v8 }
 0x3bc   : > { %2801 = vmatpush2.bf16.msra.mxu0 %v5708_v9  ;;  %v5790_v9 = vld [vmem:[#allocation11 + $0xb0] ss:$8 sps:$4 sm:$0xff]  }
 0x3bd   : > { %2802 = vmatprep.subr.bf16.mxu0 %v5713_v10  ;;  %v5789_v10 = vld [vmem:[#allocation11 + $0x1d4] ss:$8 sps:$4 sm:$0xff]  }
 0x3be   : > { %3086 = vmatpush2.bf16.msra.mxu1 %v5790_v9 }
 0x3c0   : > { %2803 = vmatpush2.bf16.msra.mxu0 %v5711_v12  ;;  %v5787_v12 = vld [vmem:[#allocation11 + $0x1d0] ss:$8 sps:$4 sm:$0xff]  }
 0x3c1   : > { %2804 = vmatprep.subr.bf16.mxu0 %v5716_v14  ;;  %v5798_v14 = vld [vmem:[#allocation11 + $0xa4] ss:$8 sps:$4 sm:$0xff]  }
 0x3c2   : > { %3087 = vmatprep.subr.bf16.mxu1 %v5798_v14 }
 0x3c4   : > { %2805 = vmatpush2.bf16.msra.mxu0 %v5714_v17  ;;  %v5796_v17 = vld [vmem:[#allocation11 + $0xa0] ss:$8 sps:$4 sm:$0xff]  }
 0x3c5   : > { %2806 = vmatprep.subr.bf16.mxu0 %v5719_v18  ;;  %v5795_v18 = vld [vmem:[#allocation11 + $0x1c4] ss:$8 sps:$4 sm:$0xff]   ;;  %3088 = vmatpush2.bf16.msra.mxu1 %v5796_v17 }
 0x3c8   : > { %2807 = vmatpush2.bf16.msra.mxu0 %v5717_v20  ;;  %v5804_v20 = vld [vmem:[#allocation11 + $0x94] ss:$8 sps:$4 sm:$0xff]  }
 0x3c9   : > { %3336 = vmatprep.subr.bf16.mxu0 %v5729_v31  ;;  %3089 = vmatprep.subr.bf16.mxu1 %v5804_v20  ;;  %v5816_v31 = vld [vmem:[#allocation11 + $0x274] ss:$8 sps:$4 sm:$0xff]  }
 0x3ca   : > { %3090 = vmatpush2.bf16.msra.mxu1 %v5802_v21 }
 0x3cb   : > { %2809 = vmatmul.mubr.bf16.vlgmr.msra.gmra.mxu0 %v2610_v26  ;;  %v5810_v26 = vld [vmem:[#allocation11 + $0x84] ss:$8 sps:$4 sm:$0xff]  }
 0x3cc   : > { %3337 = vmatpush1.bf16.msra.mxu0 %v5727_v30  ;;  %3091 = vmatprep.subr.bf16.mxu1 %v5810_v26  ;;  %v5813_v30 = vld [vmem:[#allocation11 + $0x194] ss:$8 sps:$4 sm:$0xff]  }
 0x3cd   : > { %3338 = vmatprep.subr.bf16.mxu0 %v5735_v32  ;;  %v5819_v32 = vld [vmem:[#allocation11 + $0x184] ss:$8 sps:$4 sm:$0xff]  }
 0x3ce   : > { %3092 = vmatpush2.bf16.msra.mxu1 %v5808_v29  ;;  %v5814_v29 = vld [vmem:[#allocation11 + $0x270] ss:$8 sps:$4 sm:$0xff]  }
 0x3cf   : > { %3584 = vmatprep.subr.bf16.mxu1 %v5816_v31 }
 0x3d0   : > { %3339 = vmatpush1.bf16.msra.mxu0 %v5733_v16 }
 0x3d1   : > { %3340 = vmatprep.subr.bf16.mxu0 %v5741_v36  ;;  %v2028_v36 = vld [vmem:[%s6808_s8] sm:$0x3] }
 0x3d2   : > { %v2292_v24 = vrot.slane %v2028_v36, %v6598_v13 }
 0x3d4   : > { %3341 = vmatpush1.bf16.msra.mxu0 %v5739_v39 }
 0x3d5   : > { %3342 = vmatprep.subr.bf16.mxu0 %v5747_v40  ;;  %v2296_v40 = vrot.slane %v2028_v36, %v6593_v11 }
 0x3d8   : > { %3343 = vmatpush1.bf16.msra.mxu0 %v5745_v42  ;;  %v1368_v42 = vld [vmem:[%s6810_s10] sm:$0x3] }
 0x3d9   : > { %3344 = vmatprep.subr.bf16.mxu0 %v5753_v43  ;;  %v1377_v49 = vrot.slane %v1368_v42, %v6593_v11 }
 0x3db   : > { %v1497_v61 = vadd.f32 %v6641_v35, %v1377_v49 }
 0x3dc   : > { %3345 = vmatpush1.bf16.msra.mxu0 %v5751_v46  ;;  %v1373_v46 = vrot.slane %v1368_v42, %v6598_v13 }
 0x3dd   : > { %3346 = vmatprep.subr.bf16.mxu0 %v5759_v47 }
 0x3de   : > { %v1495_v57 = vadd.f32 %v6639_v33, %v1373_v46  ;;  %v1501_v33 = vadd.f32 %v6645_v37, %v1377_v49  ;;  %v5828_v49 = vld [vmem:[#allocation11 + $0x240] ss:$8 sps:$4 sm:$0xff]  }
 0x3e0   : > { %3347 = vmatpush1.bf16.msra.mxu0 %v5757_v50 }
 0x3e1   : > { %3348 = vmatprep.subr.bf16.mxu0 %v5765_v51 }
 0x3e4   : > { %3349 = vmatpush1.bf16.msra.mxu0 %v5763_v54 }
 0x3e5   : > { %3350 = vmatprep.subr.bf16.mxu0 %v5771_v55 }
 0x3e8   : > { %3351 = vmatpush1.bf16.msra.mxu0 %v5769_v59 }
 0x3e9   : > { %3352 = vmatprep.subr.bf16.mxu0 %v5777_v2 }
 0x3ec   : > { %3353 = vmatpush2.bf16.msra.mxu0 %v5775_v3 }
 0x3ed   : > { %3354 = vmatprep.subr.bf16.mxu0 %v5783_v6  ;;  %v1499_v6 = vadd.f32 %v6643_v56, %v1373_v46  ;;  %v5830_v46 = vld [vmem:[#allocation11 + $0x244] ss:$8 sps:$4 sm:$0xff]  }
 0x3f0   : > { %3355 = vmatpush2.bf16.msra.mxu0 %v5781_v7 }
 0x3f1   : > { %3356 = vmatprep.subr.bf16.mxu0 %v5789_v10 }
 0x3f4   : > { %3357 = vmatpush2.bf16.msra.mxu0 %v5787_v12 }
 0x3f5   : > { %3358 = vmatprep.subr.bf16.mxu0 %v5795_v18 }
 0x3f8   : > { %3359 = vmatpush2.bf16.msra.mxu0 %v5793_v19 }
 0x3f9   : > { %3360 = vmatprep.subr.bf16.mxu0 %v5801_v22 }
 0x3fc   : > { %3361 = vmatpush2.bf16.msra.mxu0 %v5799_v25 }
 0x3fd   : > { %3362 = vmatprep.subr.bf16.mxu0 %v5807_v28 }
 0x400   : > { %3363 = vmatpush2.bf16.msra.mxu0 %v5805_v27 }
 0x401   : > { %3364 = vmatprep.subr.bf16.mxu0 %v5813_v30 }
 0x404   : > { %3365 = vmatpush2.bf16.msra.mxu0 %v5811_v23  ;;  %v5823_v23 = vld [vmem:[#allocation11 + $0x264] ss:$8 sps:$4 sm:$0xff]  }
 0x405   : > { %3366 = vmatprep.subr.bf16.mxu0 %v5819_v32 }
 0x408   : > { %3367 = vmatpush2.bf16.msra.mxu0 %v5817_v0  ;;  %v5821_v0 = vld [vmem:[#allocation11 + $0x260] ss:$8 sps:$4 sm:$0xff]  }
 0x44b   : > { %v2279_v16 = vpop.f32.mrf.mxu0 }
 0x44c   : > { %v2550_v39 = vpop.f32.mrf.mxu1  ;;  %v2299_v41 = vadd.f32 %v2292_v24, %v2279_v16 }
 0x44d   : > { %v2281_v38 = vpop.f32.mrf.mxu0 }
 0x44e   : > { %v2552_v43 = vpop.f32.mrf.mxu1  ;;  %v2300_v44 = vadd.f32 %v2296_v40, %v2281_v38  ;;  %v2559_v47 = vadd.f32 %v2550_v39, %v2299_v41 }
 0x44f   : > { %v2283_v34 = vpop.f32.mrf.mxu0 }
 0x450   : > { %v2301_v48 = vadd.f32 %v2292_v24, %v2283_v34  ;;  %v2554_v50 = vpop.f32.mrf.mxu1  ;;  %v2560_v52 = vadd.f32 %v2552_v43, %v2300_v44  ;;  %v5827_v24 = vld [vmem:[#allocation11 + $0x254] ss:$8 sps:$4 sm:$0xff]  }
 0x451   : > { %v2285_v45 = vpop.f32.mrf.mxu0 }
 0x452   : > { %v2302_v53 = vadd.f32 %v2296_v40, %v2285_v45  ;;  %v2561_v58 = vadd.f32 %v2554_v50, %v2301_v48  ;;  %v2556_v62 = vpop.f32.mrf.mxu1  ;;  %v5825_v45 = vld [vmem:[#allocation11 + $0x250] ss:$8 sps:$4 sm:$0xff]   ;;  %v5833_v50 = vld [vmem:[#allocation11 + $0x234] ss:$8 sps:$4 sm:$0xff]  }
 0x454   : > { %v2562_v1 = vadd.f32 %v2556_v62, %v2302_v53  ;;  %v5834_v53 = vld [vmem:[#allocation11 + $0x220] ss:$8 sps:$4 sm:$0xff]  }
 0x455   : > { %v5846_v62 = vld [vmem:[#allocation11 + $0x2e0] ss:$8 sps:$4 sm:$0xff]  }
 0x48b   : > { %v2810_v51 = vpop.f32.mrf.mxu0 }
 0x48c   : > { %v2819_v54 = vadd.f32 %v2810_v51, %v2559_v47  ;;  %v5831_v51 = vld [vmem:[#allocation11 + $0x230] ss:$8 sps:$4 sm:$0xff]  }
 0x48d   : > { %v2812_v55 = vpop.f32.mrf.mxu0 }
 0x48e   : > { %v2823_v59 = vmax.f32 %v2819_v54, 0.0  ;;  %v2820_v60 = vadd.f32 %v2812_v55, %v2560_v52  ;;  %v5836_v52 = vld [vmem:[#allocation11 + $0x224] ss:$8 sps:$4 sm:$0xff]   ;;  %v5839_v54 = vld [vmem:[#allocation11 + $0x214] ss:$8 sps:$4 sm:$0xff]  }
 0x48f   : > { %v2814_v63 = vpop.f32.mrf.mxu0  ;;  %v5837_v55 = vld [vmem:[#allocation11 + $0x210] ss:$8 sps:$4 sm:$0xff]  }
 0x490   : > { %v6690_v2 = vadd.f32 %v2823_v59, %v1495_v57  ;;  %v2824_v3 = vmax.f32 %v2820_v60, 0.0  ;;  %v2821_v4 = vadd.f32 %v2814_v63, %v2561_v58  ;;  %v5842_v57 = vld [vmem:[#allocation11 + $0x204] ss:$8 sps:$4 sm:$0xff]   ;;  %v5840_v58 = vld [vmem:[#allocation11 + $0x200] ss:$8 sps:$4 sm:$0xff]  }
 0x491   : > { %v2816_v5 = vpop.f32.mrf.mxu0  ;;  %v5845_v59 = vld [vmem:[#allocation11 + $0x2f4] ss:$8 sps:$4 sm:$0xff]   ;;  %v5843_v60 = vld [vmem:[#allocation11 + $0x2f0] ss:$8 sps:$4 sm:$0xff]  }
 0x492   : > { %v6693_v7 = vadd.f32 %v2824_v3, %v1497_v61  ;;  %v2825_v8 = vmax.f32 %v2821_v4, 0.0  ;;  %v2822_v9 = vadd.f32 %v2816_v5, %v2562_v1  ;;  %v2831_v10 = vmax.f32 %v6690_v2, 0.0  ;;  %v5848_v61 = vld [vmem:[#allocation11 + $0x2e4] ss:$8 sps:$4 sm:$0xff]   ;;  %v5851_v63 = vld [vmem:[#allocation11 + $0x2d4] ss:$8 sps:$4 sm:$0xff]  }
 0x493   : > { %v5849_v1 = vld [vmem:[#allocation11 + $0x2d0] ss:$8 sps:$4 sm:$0xff]   ;;  %v5854_v3 = vld [vmem:[#allocation11 + $0x2c4] ss:$8 sps:$4 sm:$0xff]   ;;  %v5852_v4 = vld [vmem:[#allocation11 + $0x2c0] ss:$8 sps:$4 sm:$0xff]  }
 0x494   : > { %v2832_v35 = vmax.f32 %v6693_v7, 0.0  ;;  %v6698_v12 = vadd.f32 %v2825_v8, %v1499_v6  ;;  %v2826_v14 = vmax.f32 %v2822_v9, 0.0  ;;  %v5857_v5 = vld [vmem:[#allocation11 + $0x2b4] ss:$8 sps:$4 sm:$0xff]   ;;  %v5855_v6 = vld [vmem:[#allocation11 + $0x2b0] ss:$8 sps:$4 sm:$0xff]  }
 0x495   : > { %v5860_v8 = vld [vmem:[#allocation11 + $0x2a4] ss:$8 sps:$4 sm:$0xff]   ;;  %v5858_v9 = vld [vmem:[#allocation11 + $0x2a0] ss:$8 sps:$4 sm:$0xff]  }
 0x496   : > { %v5189_v17 = vpack.c.bf16 %v2832_v35, %v2831_v10  ;;  %v6704_v18 = vadd.f32 %v2826_v14, %v1501_v33  ;;  %v2833_v19 = vmax.f32 %v6698_v12, 0.0  ;;  %v5863_v33 = vld [vmem:[#allocation11 + $0x294] ss:$8 sps:$4 sm:$0xff]   ;;  %v5861_v14 = vld [vmem:[#allocation11 + $0x290] ss:$8 sps:$4 sm:$0xff]  }
 0x498   : > { %v2845_v56 = vrot.slane %v5189_v17, 6  ;;  %v2834_v20 = vmax.f32 %v6704_v18, 0.0  ;;  %v5866_v17 = vld [vmem:[#allocation11 + $0x284] ss:$8 sps:$4 sm:$0xff]  }
 0x49a   : > { %2853 = vst [vmem:[#allocation2] sm:$0xcc] %v2845_v56  ;;  %v5190_v37 = vpack.c.bf16 %v2834_v20, %v2833_v19  ;;  %v2846_v25 = vrot.slane %v2845_v56, 4  ;;  %v5864_v56 = vld [vmem:[#allocation11 + $0x280] ss:$8 sps:$4 sm:$0xff]  }
 0x49c   : > { %v2847_v21 = vrot.slane %v5190_v37, 6 }
 0x49e   : > { %v2849_v22 = vrot.slane %v2847_v21, 4  ;;  %v6714_v26 = vsel %vm6556_vm5, %v2846_v25, %v2847_v21  ;;  %v5867_v21 = vld [vmem:[#allocation12 + $0x70] ss:$8 sps:$4 sm:$0xff]   ;;  %v5872_v25 = vld [vmem:[#allocation12 + $0x64] ss:$8 sps:$4 sm:$0xff]  }
 0x4a0   : > { %2855 = vst [vmem:[#allocation2 + $0x10] sm:$0x33] %v2849_v22  ;;  %v5869_v22 = vld [vmem:[#allocation12 + $0x74] ss:$8 sps:$4 sm:$0xff]  }
 0x4a1   : > { %v2857_v27 = vld [vmem:[#allocation2] sm:$0xff]  ;;  %3861 = vmatprep.subr.bf16.mxu0 %v5869_v22  ;;  %v5947_v22 = vld [vmem:[#allocation12 + $0x1b4] ss:$8 sps:$4 sm:$0xff]  }
 0x4a2   : > { %v4968_v28 = vcombine.high %v2857_v27, %v6714_v26  ;;  %v4967_v30 = vcombine.low %v2857_v27, %v6714_v26  ;;  %v3119_v31 = vld [vmem:[#allocation2] sm:$0xcc]  ;;  %v5873_v27 = vld [vmem:[#allocation12 + $0x170] ss:$8 sps:$4 sm:$0xff]  }
 0x4a3   : > { %v5002_v32 = vcombine.high %v3119_v31, %v6714_v26  ;;  %v5001_v16 = vcombine.low %v3119_v31, %v6714_v26  ;;  %v5878_v31 = vld [vmem:[#allocation12 + $0x54] ss:$8 sps:$4 sm:$0xff]  }
 0x4a4   : > { %3093 = vmatprep.mubr.bf16.mxu1 %v4968_v28  ;;  %v5875_v28 = vld [vmem:[#allocation12 + $0x174] ss:$8 sps:$4 sm:$0xff]  }
 0x4a5   : > { %3094 = vmatmul.mubr.bf16.vlgmr.msra.gmra.mxu1 %v4967_v30  ;;  %v3171_v41 = vrot.slane %v5002_v32, 2  ;;  %v3168_v43 = vrot.slane %v5001_v16, 2  ;;  %v5881_v30 = vld [vmem:[#allocation12 + $0x164] ss:$8 sps:$4 sm:$0xff]   ;;  %v5887_v32 = vld [vmem:[#allocation12 + $0x154] ss:$8 sps:$4 sm:$0xff]  }
 0x4a6   : > { %3585 = vmatpush1.bf16.msra.mxu1 %v5814_v29  ;;  %v5870_v29 = vld [vmem:[#allocation12 + $0x60] ss:$8 sps:$4 sm:$0xff]   ;;  %v5885_v16 = vld [vmem:[#allocation12 + $0x150] ss:$8 sps:$4 sm:$0xff]  }
 0x4a7   : > { %v6720_v36 = vld [vmem:[#allocation2 + $0x10] sm:$0xff]  ;;  %3586 = vmatprep.subr.bf16.mxu1 %v5823_v23  ;;  %v5879_v23 = vld [vmem:[#allocation12 + $0x160] ss:$8 sps:$4 sm:$0xff]  }
 0x4a8   : > { %v3121_v38 = vld [vmem:[#allocation2 + $0x10] sm:$0x33]  ;;  %v5038_v39 = vcombine.high %v6714_v26, %v6720_v36  ;;  %v5037_v37 = vcombine.low %v6714_v26, %v6720_v36  ;;  %v5884_v26 = vld [vmem:[#allocation12 + $0x44] ss:$8 sps:$4 sm:$0xff]  }
 0x4a9   : > { %v5004_v40 = vcombine.high %v3121_v38, %v3121_v38  ;;  %v5003_v34 = vcombine.low %v3121_v38, %v3121_v38  ;;  %v5893_v36 = vld [vmem:[#allocation12 + $0x144] ss:$8 sps:$4 sm:$0xff]   ;;  %v5882_v38 = vld [vmem:[#allocation12 + $0x40] ss:$8 sps:$4 sm:$0xff]  }
 0x4aa   : > { %3616 = vmatprep.mubr.bf16.mxu1 %v5038_v39  ;;  %3587 = vmatpush1.bf16.msra.mxu1 %v5821_v0  ;;  %v5876_v0 = vld [vmem:[#allocation12 + $0x50] ss:$8 sps:$4 sm:$0xff]   ;;  %v5891_v39 = vld [vmem:[#allocation12 + $0x140] ss:$8 sps:$4 sm:$0xff]  }
 0x4ab   : > { %v3172_v42 = vrot.slane %v5004_v40, 2  ;;  %v3169_v44 = vrot.slane %v5003_v34, 2  ;;  %3588 = vmatprep.subr.bf16.mxu1 %v5827_v24  ;;  %v5890_v24 = vld [vmem:[#allocation12 + $0x34] ss:$8 sps:$4 sm:$0xff]   ;;  %v5888_v34 = vld [vmem:[#allocation12 + $0x30] ss:$8 sps:$4 sm:$0xff]  }
 0x4ac   : > { %v5899_v40 = vld [vmem:[#allocation12 + $0x134] ss:$8 sps:$4 sm:$0xff]  }
 0x4ad   : > { %v3173_v47 = vsel %vm787_vm10, %v3171_v41, %v3172_v42  ;;  %v3170_v48 = vsel %vm787_vm10, %v3168_v43, %v3169_v44  ;;  %v5896_v41 = vld [vmem:[#allocation12 + $0x24] ss:$8 sps:$4 sm:$0xff]   ;;  %v5897_v42 = vld [vmem:[#allocation12 + $0x130] ss:$8 sps:$4 sm:$0xff]   ;;  %v5894_v44 = vld [vmem:[#allocation12 + $0x20] ss:$8 sps:$4 sm:$0xff]  }
 0x4ae   : > { %3368 = vmatprep.mubr.bf16.mxu0 %v3173_v47  ;;  %3589 = vmatpush1.bf16.msra.mxu1 %v5825_v45  ;;  %v5905_v43 = vld [vmem:[#allocation12 + $0x124] ss:$8 sps:$4 sm:$0xff]   ;;  %v5902_v45 = vld [vmem:[#allocation12 + $0x14] ss:$8 sps:$4 sm:$0xff]  }
 0x4af   : > { %3369 = vmatmul.mubr.bf16.vlgmr.msra.gmra.mxu0 %v3170_v48  ;;  %3590 = vmatprep.subr.bf16.mxu1 %v5830_v46  ;;  %v5903_v46 = vld [vmem:[#allocation12 + $0x120] ss:$8 sps:$4 sm:$0xff]   ;;  %v5911_v47 = vld [vmem:[#allocation12 + $0x114] ss:$8 sps:$4 sm:$0xff]   ;;  %v5900_v48 = vld [vmem:[#allocation12 + $0x10] ss:$8 sps:$4 sm:$0xff]  }
 0x4b0   : > { %3862 = vmatpush1.bf16.msra.mxu0 %v5867_v21  ;;  %v5948_v21 = vld [vmem:[#allocation12 + $0x90] ss:$8 sps:$4 sm:$0xff]  }
 0x4b1   : > { %3863 = vmatprep.subr.bf16.mxu0 %v5872_v25  ;;  %v5945_v25 = vld [vmem:[#allocation12 + $0x1b0] ss:$8 sps:$4 sm:$0xff]  }
 0x4b2   : > { %3591 = vmatpush1.bf16.msra.mxu1 %v5828_v49  ;;  %v5908_v49 = vld [vmem:[#allocation12 + $0x4] ss:$8 sps:$4 sm:$0xff]  }
 0x4b3   : > { %3592 = vmatprep.subr.bf16.mxu1 %v5833_v50  ;;  %v5909_v50 = vld [vmem:[#allocation12 + $0x110] ss:$8 sps:$4 sm:$0xff]  }
 0x4b4   : > { %3864 = vmatpush1.bf16.msra.mxu0 %v5870_v29  ;;  %v5951_v29 = vld [vmem:[#allocation12 + $0x1a0] ss:$8 sps:$4 sm:$0xff]  }
 0x4b5   : > { %3865 = vmatprep.subr.bf16.mxu0 %v5878_v31  ;;  %v5959_v31 = vld [vmem:[#allocation12 + $0x194] ss:$8 sps:$4 sm:$0xff]  }
 0x4b6   : > { %3593 = vmatpush1.bf16.msra.mxu1 %v5831_v51  ;;  %v5917_v51 = vld [vmem:[#allocation12 + $0x104] ss:$8 sps:$4 sm:$0xff]  }
 0x4b7   : > { %3594 = vmatprep.subr.bf16.mxu1 %v5836_v52  ;;  %v5906_v52 = vld [vmem:[#allocation12] ss:$8 sps:$4 sm:$0xff]  }
 0x4b8   : > { %3866 = vmatpush1.bf16.msra.mxu0 %v5876_v0  ;;  %v5965_v0 = vld [vmem:[#allocation12 + $0x184] ss:$8 sps:$4 sm:$0xff]  }
 0x4b9   : > { %3867 = vmatprep.subr.bf16.mxu0 %v5884_v26  ;;  %v5963_v26 = vld [vmem:[#allocation12 + $0x180] ss:$8 sps:$4 sm:$0xff]  }
 0x4ba   : > { %3595 = vmatpush1.bf16.msra.mxu1 %v5834_v53  ;;  %v5914_v53 = vld [vmem:[#allocation12 + $0xf4] ss:$8 sps:$4 sm:$0xff]  }
 0x4bb   : > { %3596 = vmatprep.subr.bf16.mxu1 %v5839_v54  ;;  %v5915_v54 = vld [vmem:[#allocation12 + $0x100] ss:$8 sps:$4 sm:$0xff]  }
 0x4bc   : > { %3868 = vmatpush1.bf16.msra.mxu0 %v5882_v38 }
 0x4bd   : > { %3869 = vmatprep.subr.bf16.mxu0 %v5890_v24 }
 0x4be   : > { %3597 = vmatpush1.bf16.msra.mxu1 %v5837_v55  ;;  %v5923_v55 = vld [vmem:[#allocation12 + $0x1f4] ss:$8 sps:$4 sm:$0xff]  }
 0x4bf   : > { %3598 = vmatprep.subr.bf16.mxu1 %v5842_v57  ;;  %v5912_v57 = vld [vmem:[#allocation12 + $0xf0] ss:$8 sps:$4 sm:$0xff]  }
 0x4c0   : > { %3870 = vmatpush1.bf16.msra.mxu0 %v5888_v34 }
 0x4c1   : > { %3871 = vmatprep.subr.bf16.mxu0 %v5896_v41 }
 0x4c2   : > { %3599 = vmatpush1.bf16.msra.mxu1 %v5840_v58  ;;  %v5920_v58 = vld [vmem:[#allocation12 + $0xe4] ss:$8 sps:$4 sm:$0xff]  }
 0x4c3   : > { %3600 = vmatprep.subr.bf16.mxu1 %v5845_v59  ;;  %v5921_v59 = vld [vmem:[#allocation12 + $0x1f0] ss:$8 sps:$4 sm:$0xff]  }
 0x4c4   : > { %3872 = vmatpush1.bf16.msra.mxu0 %v5894_v44 }
 0x4c5   : > { %3873 = vmatprep.subr.bf16.mxu0 %v5902_v45 }
 0x4c6   : > { %3601 = vmatpush2.bf16.msra.mxu1 %v5843_v60  ;;  %v5918_v60 = vld [vmem:[#allocation12 + $0xe0] ss:$8 sps:$4 sm:$0xff]  }
 0x4c7   : > { %3602 = vmatprep.subr.bf16.mxu1 %v5848_v61  ;;  %v5926_v61 = vld [vmem:[#allocation12 + $0xd4] ss:$8 sps:$4 sm:$0xff]  }
 0x4c8   : > { %3874 = vmatpush1.bf16.msra.mxu0 %v5900_v48 }
 0x4c9   : > { %3875 = vmatprep.subr.bf16.mxu0 %v5908_v49 }
 0x4ca   : > { %3603 = vmatpush2.bf16.msra.mxu1 %v5846_v62  ;;  %v5924_v62 = vld [vmem:[#allocation12 + $0xd0] ss:$8 sps:$4 sm:$0xff]  }
 0x4cb   : > { %3604 = vmatprep.subr.bf16.mxu1 %v5851_v63  ;;  %v5932_v63 = vld [vmem:[#allocation12 + $0xc4] ss:$8 sps:$4 sm:$0xff]  }
 0x4cc   : > { %3876 = vmatpush1.bf16.msra.mxu0 %v5906_v52 }
 0x4cd   : > { %3877 = vmatprep.subr.bf16.mxu0 %v5914_v53 }
 0x4ce   : > { %3605 = vmatpush2.bf16.msra.mxu1 %v5849_v1  ;;  %v5930_v1 = vld [vmem:[#allocation12 + $0xc0] ss:$8 sps:$4 sm:$0xff]  }
 0x4cf   : > { %3606 = vmatprep.subr.bf16.mxu1 %v5854_v3  ;;  %v5929_v3 = vld [vmem:[#allocation12 + $0x1e4] ss:$8 sps:$4 sm:$0xff]  }
 0x4d0   : > { %3878 = vmatpush2.bf16.msra.mxu0 %v5912_v57 }
 0x4d1   : > { %3879 = vmatprep.subr.bf16.mxu0 %v5920_v58 }
 0x4d2   : > { %3607 = vmatpush2.bf16.msra.mxu1 %v5852_v4  ;;  %v5927_v4 = vld [vmem:[#allocation12 + $0x1e0] ss:$8 sps:$4 sm:$0xff]  }
 0x4d3   : > { %3608 = vmatprep.subr.bf16.mxu1 %v5857_v5  ;;  %v5938_v5 = vld [vmem:[#allocation12 + $0xb4] ss:$8 sps:$4 sm:$0xff]  }
 0x4d4   : > { %3880 = vmatpush2.bf16.msra.mxu0 %v5918_v60 }
 0x4d5   : > { %3881 = vmatprep.subr.bf16.mxu0 %v5926_v61 }
 0x4d6   : > { %3609 = vmatpush2.bf16.msra.mxu1 %v5855_v6  ;;  %v5936_v6 = vld [vmem:[#allocation12 + $0xb0] ss:$8 sps:$4 sm:$0xff]  }
 0x4d7   : > { %3610 = vmatprep.subr.bf16.mxu1 %v5860_v8  ;;  %v5935_v8 = vld [vmem:[#allocation12 + $0x1d4] ss:$8 sps:$4 sm:$0xff]  }
 0x4d8   : > { %3882 = vmatpush2.bf16.msra.mxu0 %v5924_v62 }
 0x4d9   : > { %3883 = vmatprep.subr.bf16.mxu0 %v5932_v63 }
 0x4da   : > { %3611 = vmatpush2.bf16.msra.mxu1 %v5858_v9  ;;  %v5933_v9 = vld [vmem:[#allocation12 + $0x1d0] ss:$8 sps:$4 sm:$0xff]  }
 0x4db   : > { %3612 = vmatprep.subr.bf16.mxu1 %v5863_v33  ;;  %v5944_v33 = vld [vmem:[#allocation12 + $0xa4] ss:$8 sps:$4 sm:$0xff]  }
 0x4dc   : > { %3884 = vmatpush2.bf16.msra.mxu0 %v5930_v1 }
 0x4dd   : > { %3885 = vmatprep.subr.bf16.mxu0 %v5938_v5 }
 0x4de   : > { %3613 = vmatpush2.bf16.msra.mxu1 %v5861_v14  ;;  %v5942_v14 = vld [vmem:[#allocation12 + $0xa0] ss:$8 sps:$4 sm:$0xff]  }
 0x4df   : > { %3614 = vmatprep.subr.bf16.mxu1 %v5866_v17  ;;  %v5941_v17 = vld [vmem:[#allocation12 + $0x1c4] ss:$8 sps:$4 sm:$0xff]  }
 0x4e0   : > { %3886 = vmatpush2.bf16.msra.mxu0 %v5936_v6 }
 0x4e1   : > { %3887 = vmatprep.subr.bf16.mxu0 %v5944_v33 }
 0x4e2   : > { %3615 = vmatpush2.bf16.msra.mxu1 %v5864_v56  ;;  %v5939_v56 = vld [vmem:[#allocation12 + $0x1c0] ss:$8 sps:$4 sm:$0xff]  }
 0x4e3   : > { %4136 = vmatprep.subr.bf16.mxu1 %v5875_v28  ;;  %v5954_v28 = vld [vmem:[#allocation12 + $0x80] ss:$8 sps:$4 sm:$0xff]  }
 0x4e4   : > { %3888 = vmatpush2.bf16.msra.mxu0 %v5942_v14 }
 0x4e5   : > { %3617 = vmatmul.mubr.bf16.vlgmr.msra.gmra.mxu1 %v5037_v37  ;;  %v5950_v37 = vld [vmem:[#allocation12 + $0x94] ss:$8 sps:$4 sm:$0xff]  }
 0x4e6   : > { %4137 = vmatpush1.bf16.msra.mxu1 %v5873_v27  ;;  %3889 = vmatprep.subr.bf16.mxu0 %v5950_v37  ;;  %v5956_v27 = vld [vmem:[#allocation12 + $0x84] ss:$8 sps:$4 sm:$0xff]  }
 0x4e7   : > { %4138 = vmatprep.subr.bf16.mxu1 %v5881_v30  ;;  %v5953_v30 = vld [vmem:[#allocation12 + $0x1a4] ss:$8 sps:$4 sm:$0xff]  }
 0x4e8   : > { %3890 = vmatpush2.bf16.msra.mxu0 %v5948_v21  ;;  %v5960_v21 = vld [vmem:[#allocation12 + $0x270] ss:$8 sps:$4 sm:$0xff]  }
 0x4e9   : > { %3891 = vmatprep.subr.bf16.mxu0 %v5956_v27 }
 0x4ea   : > { %4139 = vmatpush1.bf16.msra.mxu1 %v5879_v23  ;;  %v5962_v23 = vld [vmem:[#allocation12 + $0x274] ss:$8 sps:$4 sm:$0xff]  }
 0x4eb   : > { %4140 = vmatprep.subr.bf16.mxu1 %v5887_v32  ;;  %v5957_v32 = vld [vmem:[#allocation12 + $0x190] ss:$8 sps:$4 sm:$0xff]  }
 0x4ec   : > { %3892 = vmatpush2.bf16.msra.mxu0 %v5954_v28 }
 0x4ed   : > { %4384 = vmatprep.subr.bf16.mxu0 %v5962_v23 }
 0x4ee   : > { %4141 = vmatpush1.bf16.msra.mxu1 %v5885_v16 }
 0x4ef   : > { %4142 = vmatprep.subr.bf16.mxu1 %v5893_v36  ;;  %v2856_v36 = vld [vmem:[%s6812_s12] sm:$0x3] }
 0x4f0   : > { %v3112_v41 = vrot.slane %v2856_v36, %v6593_v11 }
 0x4f2   : > { %4143 = vmatpush1.bf16.msra.mxu1 %v5891_v39  ;;  %v3108_v39 = vrot.slane %v2856_v36, %v6598_v13 }
 0x4f3   : > { %4144 = vmatprep.subr.bf16.mxu1 %v5899_v40 }
 0x4f6   : > { %4145 = vmatpush1.bf16.msra.mxu1 %v5897_v42 }
 0x4f7   : > { %4146 = vmatprep.subr.bf16.mxu1 %v5905_v43 }
 0x4fa   : > { %4147 = vmatpush1.bf16.msra.mxu1 %v5903_v46 }
 0x4fb   : > { %4148 = vmatprep.subr.bf16.mxu1 %v5911_v47 }
 0x4fe   : > { %4149 = vmatpush1.bf16.msra.mxu1 %v5909_v50 }
 0x4ff   : > { %4150 = vmatprep.subr.bf16.mxu1 %v5917_v51 }
 0x502   : > { %4151 = vmatpush1.bf16.msra.mxu1 %v5915_v54 }
 0x503   : > { %4152 = vmatprep.subr.bf16.mxu1 %v5923_v55 }
 0x506   : > { %4153 = vmatpush2.bf16.msra.mxu1 %v5921_v59 }
 0x507   : > { %4154 = vmatprep.subr.bf16.mxu1 %v5929_v3 }
 0x50a   : > { %4155 = vmatpush2.bf16.msra.mxu1 %v5927_v4 }
 0x50b   : > { %4156 = vmatprep.subr.bf16.mxu1 %v5935_v8 }
 0x50e   : > { %4157 = vmatpush2.bf16.msra.mxu1 %v5933_v9 }
 0x50f   : > { %4158 = vmatprep.subr.bf16.mxu1 %v5941_v17 }
 0x512   : > { %4159 = vmatpush2.bf16.msra.mxu1 %v5939_v56 }
 0x513   : > { %4160 = vmatprep.subr.bf16.mxu1 %v5947_v22 }
 0x516   : > { %4161 = vmatpush2.bf16.msra.mxu1 %v5945_v25  ;;  %v5969_v25 = vld [vmem:[#allocation12 + $0x264] ss:$8 sps:$4 sm:$0xff]  }
 0x517   : > { %4162 = vmatprep.subr.bf16.mxu1 %v5953_v30 }
 0x51a   : > { %4163 = vmatpush2.bf16.msra.mxu1 %v5951_v29 }
 0x51b   : > { %4164 = vmatprep.subr.bf16.mxu1 %v5959_v31  ;;  %v5973_v31 = vld [vmem:[#allocation12 + $0x254] ss:$8 sps:$4 sm:$0xff]  }
 0x51e   : > { %4165 = vmatpush2.bf16.msra.mxu1 %v5957_v32 }
 0x51f   : > { %4166 = vmatprep.subr.bf16.mxu1 %v5965_v0 }
 0x522   : > { %4167 = vmatpush2.bf16.msra.mxu1 %v5963_v26 }
 0x565   : > { %v3095_v16 = vpop.f32.mrf.mxu1 }
 0x566   : > { %v3115_v42 = vadd.f32 %v3108_v39, %v3095_v16 }
 0x567   : > { %v3097_v38 = vpop.f32.mrf.mxu1 }
 0x568   : > { %v3116_v45 = vadd.f32 %v3112_v41, %v3097_v38 }
 0x569   : > { %v3099_v40 = vpop.f32.mrf.mxu1 }
 0x56a   : > { %v3117_v48 = vadd.f32 %v3108_v39, %v3099_v40  ;;  %v5976_v39 = vld [vmem:[#allocation12 + $0x244] ss:$8 sps:$4 sm:$0xff]  }
 0x56b   : > { %v3101_v43 = vpop.f32.mrf.mxu1 }
 0x56c   : > { %v3118_v53 = vadd.f32 %v3112_v41, %v3101_v43  ;;  %v5974_v41 = vld [vmem:[#allocation12 + $0x240] ss:$8 sps:$4 sm:$0xff]   ;;  %v5977_v43 = vld [vmem:[#allocation12 + $0x230] ss:$8 sps:$4 sm:$0xff]  }
 0x56f   : > { %v3370_v24 = vpop.f32.mrf.mxu0 }
 0x570   : > { %v3379_v46 = vadd.f32 %v3370_v24, %v3115_v42  ;;  %v5971_v24 = vld [vmem:[#allocation12 + $0x250] ss:$8 sps:$4 sm:$0xff]   ;;  %v5979_v42 = vld [vmem:[#allocation12 + $0x234] ss:$8 sps:$4 sm:$0xff]  }
 0x571   : > { %v3372_v34 = vpop.f32.mrf.mxu0 }
 0x572   : > { %v3380_v49 = vadd.f32 %v3372_v34, %v3116_v45  ;;  %v5980_v45 = vld [vmem:[#allocation12 + $0x220] ss:$8 sps:$4 sm:$0xff]  }
 0x573   : > { %v3374_v44 = vpop.f32.mrf.mxu0 }
 0x574   : > { %v3381_v54 = vadd.f32 %v3374_v44, %v3117_v48  ;;  %v5982_v44 = vld [vmem:[#allocation12 + $0x224] ss:$8 sps:$4 sm:$0xff]  }
 0x575   : > { %v3376_v51 = vpop.f32.mrf.mxu0  ;;  %v5988_v48 = vld [vmem:[#allocation12 + $0x204] ss:$8 sps:$4 sm:$0xff]  }
 0x576   : > { %v3382_v58 = vadd.f32 %v3376_v51, %v3118_v53  ;;  %v5989_v51 = vld [vmem:[#allocation12 + $0x2f0] ss:$8 sps:$4 sm:$0xff]   ;;  %v5992_v53 = vld [vmem:[#allocation12 + $0x2e0] ss:$8 sps:$4 sm:$0xff]  }
 0x5a5   : > { %v3618_v47 = vpop.f32.mrf.mxu1 }
 0x5a6   : > { %v3627_v50 = vadd.f32 %v3618_v47, %v3379_v46  ;;  %v5985_v46 = vld [vmem:[#allocation12 + $0x214] ss:$8 sps:$4 sm:$0xff]   ;;  %v5983_v47 = vld [vmem:[#allocation12 + $0x210] ss:$8 sps:$4 sm:$0xff]  }
 0x5a7   : > { %v3620_v52 = vpop.f32.mrf.mxu1 }
 0x5a8   : > { %v3628_v55 = vadd.f32 %v3620_v52, %v3380_v49  ;;  %v3631_v59 = vmax.f32 %v3627_v50, 0.0  ;;  %v5986_v49 = vld [vmem:[#allocation12 + $0x200] ss:$8 sps:$4 sm:$0xff]   ;;  %v5991_v50 = vld [vmem:[#allocation12 + $0x2f4] ss:$8 sps:$4 sm:$0xff]  }
 0x5a9   : > { %v3622_v57 = vpop.f32.mrf.mxu1  ;;  %v5994_v52 = vld [vmem:[#allocation12 + $0x2e4] ss:$8 sps:$4 sm:$0xff]  }
 0x5aa   : > { %v3632_v60 = vmax.f32 %v3628_v55, 0.0  ;;  %v3629_v61 = vadd.f32 %v3622_v57, %v3381_v54  ;;  %v5997_v54 = vld [vmem:[#allocation12 + $0x2d4] ss:$8 sps:$4 sm:$0xff]   ;;  %v5995_v55 = vld [vmem:[#allocation12 + $0x2d0] ss:$8 sps:$4 sm:$0xff]  }
 0x5ab   : > { %v3624_v62 = vpop.f32.mrf.mxu1  ;;  %v6000_v57 = vld [vmem:[#allocation12 + $0x2c4] ss:$8 sps:$4 sm:$0xff]  }
 0x5ac   : > { %v5191_v63 = vpack.c.bf16 %v3632_v60, %v3631_v59  ;;  %v3630_v1 = vadd.f32 %v3624_v62, %v3382_v58  ;;  %v3633_v4 = vmax.f32 %v3629_v61, 0.0  ;;  %v5998_v58 = vld [vmem:[#allocation12 + $0x2c0] ss:$8 sps:$4 sm:$0xff]   ;;  %v6003_v59 = vld [vmem:[#allocation12 + $0x2b4] ss:$8 sps:$4 sm:$0xff]  }
 0x5ad   : > { %v6001_v60 = vld [vmem:[#allocation12 + $0x2b0] ss:$8 sps:$4 sm:$0xff]   ;;  %v6006_v61 = vld [vmem:[#allocation12 + $0x2a4] ss:$8 sps:$4 sm:$0xff]   ;;  %v6004_v62 = vld [vmem:[#allocation12 + $0x2a0] ss:$8 sps:$4 sm:$0xff]  }
 0x5ae   : > { %v3645_v3 = vrot.slane %v5191_v63, 6  ;;  %v3634_v5 = vmax.f32 %v3630_v1, 0.0  ;;  %v6009_v63 = vld [vmem:[#allocation12 + $0x294] ss:$8 sps:$4 sm:$0xff]   ;;  %v6007_v1 = vld [vmem:[#allocation12 + $0x290] ss:$8 sps:$4 sm:$0xff]  }
 0x5b0   : > { %3653 = vst [vmem:[#allocation2] sm:$0xcc] %v3645_v3  ;;  %v5192_v6 = vpack.c.bf16 %v3634_v5, %v3633_v4  ;;  %v3646_v8 = vrot.slane %v3645_v3, 4  ;;  %v6012_v3 = vld [vmem:[#allocation12 + $0x284] ss:$8 sps:$4 sm:$0xff]  }
 0x5b1   : > { %v6010_v4 = vld [vmem:[#allocation12 + $0x280] ss:$8 sps:$4 sm:$0xff]  }
 0x5b2   : > { %v3647_v9 = vrot.slane %v5192_v6, 6  ;;  %v4490_v6 = vld [vmem:[#allocation14 + $0xf8] sm:$0xff] }
 0x5b3   : > { %5220 = vmatprep.subr.mxu1 %v4490_v6 }
 0x5b4   : > { %v6735_v33 = vsel %vm6556_vm5, %v3646_v8, %v3647_v9  ;;  %v3649_v14 = vrot.slane %v3647_v9, 4  ;;  %v4474_v8 = vld [vmem:[#allocation14 + $0x78] sm:$0xff]  ;;  %v4489_v9 = vld [vmem:[#allocation14 + $0xf0] sm:$0xff] }
 0x5b5   : > { %3654 = vst [vmem:[#allocation2 + $0x8] sm:$0xff] %v6735_v33 }
 0x5b6   : > { %3655 = vst [vmem:[#allocation2 + $0x10] sm:$0x33] %v3649_v14  ;;  %v4473_v14 = vld [vmem:[#allocation14 + $0x70] sm:$0xff] }
 0x5b7   : > { %v3657_v17 = vld [vmem:[#allocation2] sm:$0xff] }
 0x5b8   : > { %v5073_v56 = vcombine.low %v3657_v17, %v6735_v33  ;;  %v5074_v37 = vcombine.high %v3657_v17, %v6735_v33  ;;  %v3919_v22 = vld [vmem:[#allocation2] sm:$0xcc] }
 0x5b9   : > { %v5108_v27 = vcombine.high %v3919_v22, %v6735_v33  ;;  %v5107_v28 = vcombine.low %v3919_v22, %v6735_v33  ;;  %v4488_v17 = vld [vmem:[#allocation14 + $0xe8] sm:$0xff]  ;;  %v4486_v22 = vld [vmem:[#allocation14 + $0xd8] sm:$0xff] }
 0x5ba   : > { %3893 = vmatprep.mubr.bf16.mxu0 %v5074_v37  ;;  %v4487_v37 = vld [vmem:[#allocation14 + $0xe0] sm:$0xff] }
 0x5bb   : > { %3894 = vmatmul.mubr.bf16.vlgmr.msra.gmra.mxu0 %v5073_v56  ;;  %v3971_v26 = vrot.slane %v5108_v27, 2  ;;  %v3968_v36 = vrot.slane %v5107_v28, 2  ;;  %v4472_v56 = vld [vmem:[#allocation14 + $0x68] sm:$0xff]  ;;  %v4469_v27 = vld [vmem:[#allocation14 + $0x50] sm:$0xff] }
 0x5bc   : > { %4385 = vmatpush1.bf16.msra.mxu0 %v5960_v21  ;;  %v4471_v21 = vld [vmem:[#allocation14 + $0x60] sm:$0xff]  ;;  %v4468_v28 = vld [vmem:[#allocation14 + $0x48] sm:$0xff] }
 0x5bd   : > { %v6742_v29 = vld [vmem:[#allocation2 + $0x10] sm:$0xff]  ;;  %4386 = vmatprep.subr.bf16.mxu0 %v5969_v25  ;;  %v4485_v25 = vld [vmem:[#allocation14 + $0xd0] sm:$0xff] }
 0x5be   : > { %v3921_v30 = vld [vmem:[#allocation2 + $0x10] sm:$0x33]  ;;  %v5144_v23 = vcombine.high %v6735_v33, %v6742_v29  ;;  %v5143_v5 = vcombine.low %v6735_v33, %v6742_v29  ;;  %v4483_v29 = vld [vmem:[#allocation14 + $0xc0] sm:$0xff] }
 0x5bf   : > { %v5110_v32 = vcombine.high %v3921_v30, %v3921_v30  ;;  %v5109_v0 = vcombine.low %v3921_v30, %v3921_v30  ;;  %v4470_v33 = vld [vmem:[#allocation14 + $0x58] sm:$0xff]  ;;  %v4467_v30 = vld [vmem:[#allocation14 + $0x40] sm:$0xff] }
 0x5c0   : > { %4416 = vmatprep.mubr.bf16.mxu0 %v5144_v23  ;;  %4387 = vmatpush1.bf16.msra.mxu0 %v5967_v15  ;;  %v4484_v15 = vld [vmem:[#allocation14 + $0xc8] sm:$0xff]  ;;  %v4466_v23 = vld [vmem:[#allocation14 + $0x38] sm:$0xff] }
 0x5c1   : > { %v3972_v16 = vrot.slane %v5110_v32, 2  ;;  %v3969_v38 = vrot.slane %v5109_v0, 2  ;;  %4388 = vmatprep.subr.bf16.mxu0 %v5973_v31  ;;  %v4482_v31 = vld [vmem:[#allocation14 + $0xb8] sm:$0xff]  ;;  %v4481_v32 = vld [vmem:[#allocation14 + $0xb0] sm:$0xff] }
 0x5c2   : > { %v4465_v0 = vld [vmem:[#allocation14 + $0x30] sm:$0xff] }
 0x5c3   : > { %v3973_v40 = vsel %vm787_vm10, %v3971_v26, %v3972_v16  ;;  %v3970_v34 = vsel %vm787_vm10, %v3968_v36, %v3969_v38  ;;  %v4480_v26 = vld [vmem:[#allocation14 + $0xa8] sm:$0xff]  ;;  %v4479_v36 = vld [vmem:[#allocation14 + $0xa0] sm:$0xff] }
 0x5c4   : > { %4168 = vmatprep.mubr.bf16.mxu1 %v3973_v40  ;;  %4389 = vmatpush1.bf16.msra.mxu0 %v5971_v24  ;;  %v4464_v16 = vld [vmem:[#allocation14 + $0x28] sm:$0xff]  ;;  %v4463_v38 = vld [vmem:[#allocation14 + $0x20] sm:$0xff]  ;;  %v4478_v24 = vld [vmem:[#allocation14 + $0x98] sm:$0xff] }
 0x5c5   : > { %4169 = vmatmul.mubr.bf16.vlgmr.msra.gmra.mxu1 %v3970_v34  ;;  %4390 = vmatprep.subr.bf16.mxu0 %v5976_v39  ;;  %v4462_v39 = vld [vmem:[#allocation14 + $0x18] sm:$0xff]  ;;  %v4477_v40 = vld [vmem:[#allocation14 + $0x90] sm:$0xff] }
 0x5c6   : > { %5221 = vmatpush3.msra.mxu1 %v4474_v8  ;;  %v4461_v34 = vld [vmem:[#allocation14 + $0x10] sm:$0xff] }
 0x5c7   : > { %5222 = vmatprep.subr.mxu1 %v4489_v9 }
 0x5c8   : > { %4391 = vmatpush1.bf16.msra.mxu0 %v5974_v41  ;;  %5223 = vmatpush3.msra.mxu1 %v4473_v14  ;;  %v4476_v41 = vld [vmem:[#allocation14 + $0x88] sm:$0xff] }
 0x5c9   : > { %4392 = vmatprep.subr.bf16.mxu0 %v5979_v42  ;;  %5224 = vmatprep.subr.mxu1 %v4488_v17  ;;  %v4460_v42 = vld [vmem:[#allocation14 + $0x8] sm:$0xff] }
 0x5ca   : > { %5225 = vmatpush3.msra.mxu1 %v4472_v56 }
 0x5cb   : > { %5226 = vmatprep.subr.mxu1 %v4487_v37 }
 0x5cc   : > { %4393 = vmatpush1.bf16.msra.mxu0 %v5977_v43  ;;  %5227 = vmatpush3.msra.mxu1 %v4471_v21  ;;  %v4475_v43 = vld [vmem:[#allocation14 + $0x80] sm:$0xff] }
 0x5cd   : > { %4394 = vmatprep.subr.bf16.mxu0 %v5982_v44  ;;  %5228 = vmatprep.subr.mxu1 %v4486_v22  ;;  %v4459_v44 = vld [vmem:[#allocation14] sm:$0xff] }
 0x5ce   : > { %5229 = vmatpush3.msra.mxu1 %v4470_v33 }
 0x5cf   : > { %5230 = vmatprep.subr.mxu1 %v4485_v25 }
 0x5d0   : > { %4395 = vmatpush1.bf16.msra.mxu0 %v5980_v45  ;;  %5231 = vmatpush3.msra.mxu1 %v4469_v27 }
 0x5d1   : > { %4396 = vmatprep.subr.bf16.mxu0 %v5985_v46  ;;  %5232 = vmatprep.subr.mxu1 %v4484_v15  ;;  %v3656_v46 = vld [vmem:[%s6814_s14] sm:$0x3] }
 0x5d2   : > { %5233 = vmatpush3.msra.mxu1 %v4468_v28 }
 0x5d3   : > { %5234 = vmatprep.subr.mxu1 %v4483_v29 }
 0x5d4   : > { %4397 = vmatpush1.bf16.msra.mxu0 %v5983_v47  ;;  %5235 = vmatpush3.msra.mxu1 %v4467_v30 }
 0x5d5   : > { %4398 = vmatprep.subr.bf16.mxu0 %v5988_v48  ;;  %5236 = vmatprep.subr.mxu1 %v4482_v31 }
 0x5d6   : > { %5237 = vmatpush3.msra.mxu1 %v4466_v23 }
 0x5d7   : > { %5238 = vmatprep.subr.mxu1 %v4481_v32 }
 0x5d8   : > { %4399 = vmatpush1.bf16.msra.mxu0 %v5986_v49  ;;  %5239 = vmatpush3.msra.mxu1 %v4465_v0  ;;  %v3908_v49 = vrot.slane %v3656_v46, %v6598_v13 }
 0x5d9   : > { %4400 = vmatprep.subr.bf16.mxu0 %v5991_v50  ;;  %5240 = vmatprep.subr.mxu1 %v4480_v26 }
 0x5da   : > { %5241 = vmatpush3.msra.mxu1 %v4464_v16 }
 0x5db   : > { %5242 = vmatprep.subr.mxu1 %v4479_v36 }
 0x5dc   : > { %4401 = vmatpush2.bf16.msra.mxu0 %v5989_v51  ;;  %5243 = vmatpush3.msra.mxu1 %v4463_v38 }
 0x5dd   : > { %4402 = vmatprep.subr.bf16.mxu0 %v5994_v52  ;;  %5244 = vmatprep.subr.mxu1 %v4478_v24  ;;  %v3912_v52 = vrot.slane %v3656_v46, %v6593_v11 }
 0x5de   : > { %5245 = vmatpush3.msra.mxu1 %v4462_v39  ;;  %v4491_v39 = vld [vmem:[%s6816_s16] sm:$0x1] }
 0x5df   : > { %5246 = vmatprep.subr.mxu1 %v4477_v40 }
 0x5e0   : > { %4403 = vmatpush2.bf16.msra.mxu0 %v5992_v53  ;;  %5247 = vmatpush3.msra.mxu1 %v4461_v34 }
 0x5e1   : > { %4404 = vmatprep.subr.bf16.mxu0 %v5997_v54  ;;  %5248 = vmatprep.subr.mxu1 %v4476_v41 }
 0x5e2   : > { %5249 = vmatpush3.msra.mxu1 %v4460_v42 }
 0x5e3   : > { %5250 = vmatprep.subr.mxu1 %v4475_v43 }
 0x5e4   : > { %4405 = vmatpush2.bf16.msra.mxu0 %v5995_v55  ;;  %5251 = vmatpush3.msra.mxu1 %v4459_v44 }
 0x5e5   : > { %4406 = vmatprep.subr.bf16.mxu0 %v6000_v57 }
 0x5e8   : > { %4407 = vmatpush2.bf16.msra.mxu0 %v5998_v58 }
 0x5e9   : > { %4408 = vmatprep.subr.bf16.mxu0 %v6003_v59 }
 0x5ec   : > { %4409 = vmatpush2.bf16.msra.mxu0 %v6001_v60 }
 0x5ed   : > { %4410 = vmatprep.subr.bf16.mxu0 %v6006_v61 }
 0x5f0   : > { %4411 = vmatpush2.bf16.msra.mxu0 %v6004_v62 }
 0x5f1   : > { %4412 = vmatprep.subr.bf16.mxu0 %v6009_v63 }
 0x5f4   : > { %4413 = vmatpush2.bf16.msra.mxu0 %v6007_v1 }
 0x5f5   : > { %4414 = vmatprep.subr.bf16.mxu0 %v6012_v3 }
 0x5f8   : > { %4415 = vmatpush2.bf16.msra.mxu0 %v6010_v4 }
 0x5fb   : > { %4417 = vmatmul.mubr.bf16.vlgmr.msra.gmra.mxu0 %v5143_v5 }
 0x67b   : > { %v3895_v45 = vpop.f32.mrf.mxu0 }
 0x67c   : > { %v3915_v53 = vadd.f32 %v3908_v49, %v3895_v45 }
 0x67d   : > { %v3897_v47 = vpop.f32.mrf.mxu0 }
 0x67e   : > { %v3916_v57 = vadd.f32 %v3912_v52, %v3897_v47 }
 0x67f   : > { %v3899_v50 = vpop.f32.mrf.mxu0 }
 0x680   : > { %v3917_v60 = vadd.f32 %v3908_v49, %v3899_v50 }
 0x681   : > { %v3901_v54 = vpop.f32.mrf.mxu0 }
 0x682   : > { %v3918_v3 = vadd.f32 %v3912_v52, %v3901_v54 }
 0x685   : > { %v4170_v48 = vpop.f32.mrf.mxu1 }
 0x686   : > { %v4179_v58 = vadd.f32 %v4170_v48, %v3915_v53 }
 0x687   : > { %v4172_v51 = vpop.f32.mrf.mxu1 }
 0x688   : > { %v4180_v61 = vadd.f32 %v4172_v51, %v3916_v57 }
 0x689   : > { %v4174_v55 = vpop.f32.mrf.mxu1 }
 0x68a   : > { %v4181_v4 = vadd.f32 %v4174_v55, %v3917_v60 }
 0x68b   : > { %v4176_v63 = vpop.f32.mrf.mxu1 }
 0x68c   : > { %v4182_v8 = vadd.f32 %v4176_v63, %v3918_v3 }
 0x6bb   : > { %v4418_v59 = vpop.f32.mrf.mxu0 }
 0x6bc   : > { %v4427_v62 = vadd.f32 %v4418_v59, %v4179_v58 }
 0x6bd   : > { %v4420_v1 = vpop.f32.mrf.mxu0 }
 0x6be   : > { %v4431_v5 = vmax.f32 %v4427_v62, 0.0  ;;  %v4428_v6 = vadd.f32 %v4420_v1, %v4180_v61 }
 0x6bf   : > { %v4422_v13 = vpop.f32.mrf.mxu0 }
 0x6c0   : > { %v4432_v9 = vmax.f32 %v4428_v6, 0.0  ;;  %v4429_v14 = vadd.f32 %v4422_v13, %v4181_v4  ;;  %v4435_v17 = vadd.f32 %v4431_v5, %v2831_v10 }
 0x6c1   : > { %v4424_v11 = vpop.f32.mrf.mxu0 }
 0x6c2   : > { %v4433_v56 = vmax.f32 %v4429_v14, 0.0  ;;  %v4430_v37 = vadd.f32 %v4424_v11, %v4182_v8  ;;  %v4436_v21 = vadd.f32 %v4432_v9, %v2832_v35  ;;  %v4439_v25 = vmax.f32 %v4435_v17, 0.0 }
 0x6c4   : > { %v4437_v22 = vadd.f32 %v4433_v56, %v2833_v19  ;;  %v4434_v33 = vmax.f32 %v4430_v37, 0.0  ;;  %v4440_v28 = vmax.f32 %v4436_v21, 0.0 }
 0x6c6   : > { %v4441_v27 = vmax.f32 %v4437_v22, 0.0  ;;  %v4438_v15 = vadd.f32 %v4434_v33, %v2834_v20 }
 0x6c8   : > { %v4443_v29 = vadd.f32 %v4441_v27, %v4439_v25  ;;  %v4442_v30 = vmax.f32 %v4438_v15, 0.0 }
 0x6ca   : > { %v4444_v31 = vrot.slane %v4443_v29, 4  ;;  %v4450_v2 = vadd.f32 %v4442_v30, %v4440_v28 }
 0x6cc   : > { %v4445_v10 = vadd.f32 %v4444_v31, %v4443_v29  ;;  %v4451_v23 = vrot.slane %v4450_v2, 4 }
 0x6ce   : > { %v4446_v32 = vrot.slane %v4445_v10, 2  ;;  %v4452_v0 = vadd.f32 %v4451_v23, %v4450_v2 }
 0x6d0   : > { %v4447_v7 = vadd.f32 %v4446_v32, %v4445_v10  ;;  %v4453_v35 = vrot.slane %v4452_v0, 2 }
 0x6d2   : > { %v4454_v26 = vadd.f32 %v4453_v35, %v4452_v0  ;;  %v4448_v12 = vrot.slane %v4447_v7, 1 }
 0x6d4   : > { %v4455_v19 = vrot.slane %v4454_v26, 1  ;;  %v4449_v16 = vadd.f32 %v4448_v12, %v4447_v7 }
 0x6d6   : > { %v4456_v36 = vadd.f32 %v4455_v19, %v4454_v26  ;;  %v4457_v24 = vmul.f32 0.0625, %v4449_v16 }
 0x6d8   : > { %v4458_v38 = vmul.f32 0.0625, %v4456_v36 }
 0x6da   : > { %4556 = vmatprep.mubr.f32.mxu1 %v4458_v38 }
 0x6db   : > { %4557 = vmatmul.mubr.f32.vlgmr.msra.gmra.mxu1 %v4457_v24 }
 0x79b   : > { %v5252_v18 = vpop.f32.mrf.mxu1 }
 0x79d   : > { %v5253_v20 = vpop.f32.mrf.mxu1 }
 0x79e   : > { %v5254_v40 = vadd.f32 %v5253_v20, %v5252_v18 }
 0x7a0   : > { %v4559_v34 = vadd.f32 %v5254_v40, %v4491_v39 }
 0x7a2   : > { %v4563_v41 = vsel %vm4562_vm14, %v4559_v34, -inf }
 0x7a3   : > { %4564 = vmax.xlane.f32.xlu0 %v4563_v41 }
 0x82c   : > { %v4565_v42 = vpop.xlane.xlu0 %4564 }
 0x82d   : > { %v4566_v43 = vsub.f32 %v4559_v34, %v4565_v42 }
 0x82f   : > { %v4567_v44 = vmul.f32 1.442695, %v4566_v43 }
 0x831   : > { %6013 = vpow2.f32 %v4567_v44 }
 0x83e   : > { %v6014_v45 = vpop.eup %6013 }
 0x83f   : > { %v4569_v46 = vsel %vm4562_vm14, %v6014_v45, 0.0 }
 0x840   : > { %4570 = vadd.xlane.f32.xlu0 %v4569_v46 }
 0x8c9   : > { %v4571_v47 = vpop.xlane.xlu0 %4570 }
 0x8ca   : > { %6015 = vrcp.f32 %v4571_v47 }
 0x8d7   : > { %v6016_v48 = vpop.eup %6015 }
 0x8d8   : > { %v4573_v49 = vmul.f32 %v6016_v48, %v6014_v45 }
 0x8da   : > { %4574 = vst [vmem:[%s642_s24] sm:$0x1] %v4573_v49 }
 0x8db   : > { %6212 = shalt.err (!%p6209_p7)
}
 0x8dc   : > { %s6213_s2 = scalar_lea.hbm %s4586_s22, 16  ;;  %s6217_s24 = scalar_lea.hbm %s6865_s20, 32 }
 0x8dd   : > { %p6214_p4 = scmp.ne.s32.totalorder %s4586_s22, %s6213_s2  ;;  %p6218_p10 = scmp.lt.s32.totalorder %s4586_s22, %s6865_s20 }
 0x8de   : > { %p6219_p8 = scmp.lt.s32.totalorder %s6217_s24, %s6213_s2 }
 0x8df   : > { %p6215_p9 = pnand %p6214_p4, %p6420_p5 }
 0x8e0   : > { %p6220_p6 = por %p6219_p8, %p6218_p10 }
 0x8e1   : > { %p6216_p12 = pneg %p6215_p9 }
 0x8e3   : > { %p6221_p11 = pnand %p6220_p6, %p6216_p12 }
 0x8e5   : > { %6224 = shalt.err (!%p6221_p11)
}
 0x8e6   : > { %5343 = dma.vmem_to_hbm [thread:$0]  (%p6420_p5), %s4589_s30, 16, %s4586_s22, %s4576_s19  }
 0x8e7 PF: > { %s6866_s26 = sld [smem:[#allocation23_spill]] }
 0x8e8   : > { %s6867_s0 = sld [smem:[#allocation21_spill]] }
 0x8e9   : > { %s6868_s21 = sld [smem:[#allocation26_spill]] }
 0x8ed   : > { %p5385_p0 = scmp.ge.s32.totalorder %s6866_s26, 2 }
 0x8ee   : > { %s4600_s29 = sand.u32 1, %s6867_s0  }
 0x8ef   : > { %p6869_p3 = scmp.ne.s32.totalorder %s6868_s21, 0  ;;  %s4601_s28 = scalar_lea.sflag [#allocation5], %s4600_s29 }
 0x8f1   : > { %p5368_p1 = pnand %p5385_p0, %p6869_p3 }
 0x8f3   : > { %p5369_p13 = pneg %p5368_p1 }
 0x8f5   : > { %6258 = dma.done.wait (%p5369_p13), %s4601_s28, 16  }
 0x8f6   : > { %6260 = vsyncadd (%p5369_p13), %s4601_s28, 4294967280  ;;  %s6870_s27 = sld [smem:[#allocation24_spill]]  ;;  %s6873_s24 = smov %s6267_s25 }
 0x8f7   : > { %s6871_s2 = sld [smem:[#allocation22_spill]] }
 0x8f8   : > { %s6872_s26 = sld [smem:[#allocation25_spill]] }
 0x8fc   : > { %p31_p2 = scmp.ge.s32.totalorder %s6870_s27, 4  }
 0x8fd   : > { %s6874_s25 = smov %s6871_s2 }
 0x8fe   :  { %33 = sbr.rel (!%p31_p2) target bundleno = 13 (0xd), region = 164 }
 0x903   :  { %4605 = vsyncpa [#allocation4], 1 }
 0x904   :  { %4607 = vsyncpa [#allocation4 + $0x1], 1 }
 0x905   :  { %4608 = vsyncpa [#allocation7], 1 }
 0x906   :  { %4609 = vsyncpa [#allocation10], 1 }
 0x907   :  { %4610 = vsyncpa [#allocation13], 1 }
 0x908   :  { %4611 = vsyncpa [#allocation5], 1 }
 0x909   :  { %4613 = vsyncpa [#allocation5 + $0x1], 1 }

</bundles_post_ra>
